<compile_context>
chip_gen: v6e
topology: v6e:2x2x1
jax: 0.10.0
libtpu: 0.0.40
codegen_flags: <defaults>
</compile_context>

<pallas_src>
import functools

import jax
import jax.numpy as jnp
import numpy as np
from jax import lax
from jax.experimental import pallas as pl
from jax.experimental.pallas import tpu as pltpu


# ----------------------------------------------------------------------------
# Pallas kernels
# ----------------------------------------------------------------------------

def _stage_kernel(x_ref, wc_ref, bc_ref, wcf_ref, bcf_ref,
                  xout_ref, d_ref, acc_ref, *, rows):
    """One row-tile of a decompose stage (stages 1..3).

       temp  = x @ wc + bc                 (1x1 compose conv; bf16 MXU, f32 acc)
       xout  = x - temp                    (f32 math, bf16 writeback)
       acc  += sum_rows(x)                 (per-batch pooled accumulator)
       at last tile of the batch:
       d     = (acc / rows) @ (wc@wf) + (bc@wf + bf)  == fc(avgpool(temp))
    """
    t = pl.program_id(1)
    nt = pl.num_programs(1)

    @pl.when(t == 0)
    def _():
        acc_ref[...] = jnp.zeros_like(acc_ref)

    x = x_ref[...]                                                    # (TILE, Ce) f32
    temp = jnp.dot(x.astype(jnp.bfloat16), wc_ref[...],
                   preferred_element_type=jnp.float32) + bc_ref[...]  # (TILE, Ce) f32
    xout_ref[...] = (x - temp).astype(xout_ref.dtype)                 # bf16 writeback
    acc_ref[...] += jnp.sum(x, axis=0, keepdims=True)                 # (1, Ce)

    @pl.when(t == nt - 1)
    def _():
        pooled = acc_ref[...] * (1.0 / rows)                          # (1, Ce)
        d = jnp.dot(pooled.astype(jnp.bfloat16), wcf_ref[...],
                    preferred_element_type=jnp.float32) + bcf_ref[...]  # (1, 512)
        d_ref[...] = jnp.broadcast_to(d[:, None, :], d_ref.shape).astype(d_ref.dtype)


def _pick_tile_rows(rows, target=512):
    """Largest divisor of `rows` that is <= target and a multiple of 8."""
    if rows <= target:
        return rows
    for t in range(target, 7, -1):
        if rows % t == 0 and t % 8 == 0:
            return t
    # TODO(synk): pad the row axis to a multiple of 8 for pathological shapes.
    return rows


def _prep_stage(x_nhwc, wc, bc, wf, bf):
    """Shared wrapper math for the stage kernel and its bf16 mirror reference.

    Folds compose into fc by linearity (fc(avgpool(compose(x))) ==
    mean(x) @ (wc@wf) + (bc@wf + bf)) and lane-packs C=64 stages (2 spatial
    positions per 128-lane row, block-diagonal weight; fc fold absorbs the
    packing exactly)."""
    B, H, W, C = x_nhwc.shape
    N = H * W
    pack = 2 if (C < 128 and N % 2 == 0) else 1
    Ce, rows = C * pack, N // pack
    x2 = x_nhwc.reshape(B * rows, Ce)
    wcf = wc @ wf
    w_pack = jnp.kron(jnp.eye(pack, dtype=wc.dtype), wc).astype(jnp.bfloat16)  # (Ce,Ce)
    b_pack = jnp.tile(bc, (1, pack))                                           # (1,Ce) f32
    wcf_pack = (jnp.tile(wcf, (pack, 1)) / pack).astype(jnp.bfloat16)          # (Ce,512)
    bcf = bc @ wf + bf                                                         # (1,512) f32
    return x2, w_pack, b_pack, wcf_pack, bcf, rows, Ce


def decompose_stage(x_nhwc, wc, bc, wf, bf, *, target_tile_rows=512):
    """x_nhwc: (B,H,W,C); wc: (C,C); bc: (1,C); wf: (C,512); bf: (1,512).

    Returns (x - compose(x)) in bf16 NHWC and d = fc(avgpool(compose(x)))."""
    B, H, W, C = x_nhwc.shape
    x2, w_pack, b_pack, wcf_pack, bcf, rows, Ce = _prep_stage(x_nhwc, wc, bc, wf, bf)
    tile = _pick_tile_rows(rows, target_tile_rows)
    nt = rows // tile

    flops = 2 * (B * rows) * Ce * Ce + 2 * B * Ce * 512
    bytes_accessed = (B * rows * Ce * 4            # x read (f32)
                      + B * rows * Ce * 2          # xout write (bf16)
                      + (Ce * Ce + Ce * 512) * 2   # resident bf16 weights
                      + (Ce + 512) * 4             # biases
                      + B * 8 * 512 * 4)           # d write (padded)

    # Live VMEM ~ 2x f32 in-tile + 2x bf16 out-tile + weights + in-kernel bf16
    # copy of the tile; size the limit off the tile so it holds on v7x (64 MiB
    # physical) while still raising the 16/32 MiB scoped defaults when needed.
    tile_bytes = tile * Ce * 4
    vmem_limit = int(min(100 * 2 ** 20, max(32 * 2 ** 20, 8 * tile_bytes)))

    xout2, d_pad = pl.pallas_call(
        functools.partial(_stage_kernel, rows=rows),
        out_shape=(jax.ShapeDtypeStruct((B * rows, Ce), jnp.bfloat16),
                   jax.ShapeDtypeStruct((B, 8, 512), jnp.float32)),
        grid_spec=pltpu.PrefetchScalarGridSpec(
            num_scalar_prefetch=0,
            grid=(B, nt),
            in_specs=[
                pl.BlockSpec((tile, Ce), lambda b, t: (b * nt + t, 0)),
                pl.BlockSpec((Ce, Ce), lambda b, t: (0, 0)),
                pl.BlockSpec((1, Ce), lambda b, t: (0, 0)),
                pl.BlockSpec((Ce, 512), lambda b, t: (0, 0)),
                pl.BlockSpec((1, 512), lambda b, t: (0, 0)),
            ],
            out_specs=[
                pl.BlockSpec((tile, Ce), lambda b, t: (b * nt + t, 0)),
                pl.BlockSpec((1, 8, 512), lambda b, t: (b, 0, 0)),
            ],
            scratch_shapes=[pltpu.VMEM((1, Ce), jnp.float32)],
        ),
        compiler_params=pltpu.CompilerParams(
            dimension_semantics=("parallel", "arbitrary"),
            vmem_limit_bytes=vmem_limit),
        cost_estimate=pl.CostEstimate(flops=flops, transcendentals=0,
                                      bytes_accessed=bytes_accessed),
    )(x2, w_pack, b_pack, wcf_pack, bcf)
    return xout2.reshape(B, H, W, C), d_pad[:, 0, :]


def _final_kernel(x_ref, wc_ref, bc_ref, wf_ref, bf_ref,
                  d1_ref, d2_ref, d3_ref, fcw_ref, fcb_ref,
                  domain_ref, exp_ref):
    """Fused stage 4 + head (temp4 / x-temp4 never materialized):

       pooled = avgpool(x4)                        (B, C)
       t      = pooled @ wc4 + bc4 == avgpool(temp4)       (linearity)
       exp    = pooled - t         == avgpool(x4 - temp4)
       d4     = t @ wf4 + bf4      == fc4(avgpool(temp4))
       dsum   = d1 + d2 + d3 + d4
       domain = relu(dsum * sigmoid(<dsum, fc_w> + fc_b))
    """
    pooled = jnp.mean(x_ref[...], axis=1)                              # (B, C) f32
    t = jnp.dot(pooled.astype(jnp.bfloat16), wc_ref[...],
                preferred_element_type=jnp.float32) + bc_ref[...]      # (B, C)
    exp_ref[...] = (pooled - t).astype(exp_ref.dtype)
    d4 = jnp.dot(t.astype(jnp.bfloat16), wf_ref[...],
                 preferred_element_type=jnp.float32) + bf_ref[...]     # (B, 512)
    dsum = d1_ref[...] + d2_ref[...] + d3_ref[...] + d4
    # Linear(512,1)+sigmoid gate as VPU multiply + lane reduce (no MXU matvec);
    # the scalar bias comes from SMEM.
    logits = jnp.sum(dsum * fcw_ref[...], axis=-1, keepdims=True) + fcb_ref[0, 0]
    gate = jax.nn.sigmoid(logits)
    domain_ref[...] = jnp.maximum(dsum * gate, 0.0).astype(domain_ref.dtype)


def decompose_final(x_nhwc, wc, bc, wf, bf, d1, d2, d3, fc_w, fc_b):
    """Stage-4 decompose + avgpool + domain gate, fused in one pallas_call."""
    B, H, W, C = x_nhwc.shape
    N = H * W
    x = x_nhwc.reshape(B, N, C).astype(jnp.float32)
    wc_bf = wc.astype(jnp.bfloat16)
    wf_bf = wf.astype(jnp.bfloat16)
    fcw_row = fc_w.reshape(1, 512)            # (512,1) -> (1,512) row vector

    flops = 2 * B * C * C + 2 * B * C * 512 + 8 * B * 512
    bytes_accessed = ((B * N * C + C + 512 + 3 * B * 512 + 512 + 1
                       + 2 * B * 512) * 4 + (C * C + C * 512) * 2)

    domain, exp_feat = pl.pallas_call(
        _final_kernel,
        out_shape=(jax.ShapeDtypeStruct((B, 512), jnp.float32),
                   jax.ShapeDtypeStruct((B, C), jnp.float32)),
        grid_spec=pltpu.PrefetchScalarGridSpec(
            num_scalar_prefetch=0,
            grid=(1,),
            in_specs=[
                pl.BlockSpec((B, N, C), lambda i: (0, 0, 0)),
                pl.BlockSpec((C, C), lambda i: (0, 0)),
                pl.BlockSpec((1, C), lambda i: (0, 0)),
                pl.BlockSpec((C, 512), lambda i: (0, 0)),
                pl.BlockSpec((1, 512), lambda i: (0, 0)),
                pl.BlockSpec((B, 512), lambda i: (0, 0)),
                pl.BlockSpec((B, 512), lambda i: (0, 0)),
                pl.BlockSpec((B, 512), lambda i: (0, 0)),
                pl.BlockSpec((1, 512), lambda i: (0, 0)),
                pl.BlockSpec(memory_space=pltpu.MemorySpace.SMEM),     # fc bias scalar
            ],
            out_specs=[
                pl.BlockSpec((B, 512), lambda i: (0, 0)),
                pl.BlockSpec((B, C), lambda i: (0, 0)),
            ],
        ),
        compiler_params=pltpu.CompilerParams(
            dimension_semantics=("arbitrary",)),
        cost_estimate=pl.CostEstimate(flops=flops, transcendentals=2 * B,
                                      bytes_accessed=bytes_accessed),
    )(x, wc_bf, bc, wf_bf, bf, d1, d2, d3, fcw_row, fc_b)
    return domain, exp_feat


# ----------------------------------------------------------------------------
# Plain-JAX backbone (structural ResNet18 stand-in; deterministic init)
# ----------------------------------------------------------------------------

def _conv(x, w, stride, padding):
    return lax.conv_general_dilated(
        x.astype(w.dtype), w, window_strides=(stride, stride), padding=padding,
        dimension_numbers=('NHWC', 'HWIO', 'NHWC'))


def _bn(x, gamma, beta):
    # eval-mode BN with running_mean=0, running_var=1 (no checkpoint to load)
    return x * gamma + beta


def _max_pool_3x3_s2(x):
    return lax.reduce_window(
        x, -jnp.inf, lax.max,
        window_dimensions=(1, 3, 3, 1),
        window_strides=(1, 2, 2, 1),
        padding=((0, 0), (1, 1), (1, 1), (0, 0)))


def basic_block(x, p):
    out = jax.nn.relu(_bn(_conv(x, p['w1'], p['stride'], ((1, 1), (1, 1))),
                          p['g1'], p['b1']))
    out = _bn(_conv(out, p['w2'], 1, ((1, 1), (1, 1))), p['g2'], p['b2'])
    if 'wd' in p:
        shortcut = _bn(_conv(x, p['wd'], p['stride'], ((0, 0), (0, 0))),
                       p['gd'], p['bd'])
    else:
        shortcut = x
    return jax.nn.relu(out + shortcut)


def _init_conv(key, kh, kw, cin, cout):
    fan_in = kh * kw * cin
    return (jax.random.normal(key, (kh, kw, cin, cout), jnp.float32)
            * jnp.sqrt(2.0 / fan_in))


def init_params(key):
    keys = iter(jax.random.split(key, 64))
    nk = lambda: next(keys)
    params = {}
    params['pre'] = {'w': _init_conv(nk(), 7, 7, 3, 64),
                     'g': jnp.ones((64,), jnp.float32),
                     'b': jnp.zeros((64,), jnp.float32)}

    def make_block(cin, cout, stride):
        p = {'stride': stride,
             'w1': _init_conv(nk(), 3, 3, cin, cout),
             'g1': jnp.ones((cout,), jnp.float32),
             'b1': jnp.zeros((cout,), jnp.float32),
             'w2': _init_conv(nk(), 3, 3, cout, cout),
             'g2': jnp.ones((cout,), jnp.float32),
             'b2': jnp.zeros((cout,), jnp.float32)}
        if stride != 1 or cin != cout:
            p['wd'] = _init_conv(nk(), 1, 1, cin, cout)
            p['gd'] = jnp.ones((cout,), jnp.float32)
            p['bd'] = jnp.zeros((cout,), jnp.float32)
        return p

    params['layer1'] = [make_block(64, 64, 1), make_block(64, 64, 1)]
    params['layer2'] = [make_block(64, 128, 2), make_block(128, 128, 1)]
    params['layer3'] = [make_block(128, 256, 2), make_block(256, 256, 1)]
    params['layer4'] = [make_block(256, 512, 2), make_block(512, 512, 1)]

    def uni(key, shape, fan_in):
        k = 1.0 / float(np.sqrt(fan_in))
        return jax.random.uniform(key, shape, jnp.float32, -k, k)

    for i, c in enumerate([64, 128, 256, 512], start=1):
        params[f'c{i}_w'] = uni(nk(), (c, c), c)        # 1x1 compose conv, (Cin, Cout)
        params[f'c{i}_b'] = uni(nk(), (1, c), c)
        params[f'f{i}_w'] = uni(nk(), (c, 512), c)      # Linear(c, 512), (in, out)
        params[f'f{i}_b'] = uni(nk(), (1, 512), c)
    params['fc_w'] = uni(nk(), (512, 1), 512)           # Linear(512, 1)
    params['fc_b'] = uni(nk(), (1, 1), 512)
    return params


# ----------------------------------------------------------------------------
# Forward (backbone in plain JAX; decompose stages + fused final head in Pallas)
# ----------------------------------------------------------------------------

def model_forward(x_nchw, params, stage_fn, final_fn):
    x = jnp.transpose(x_nchw, (0, 2, 3, 1))  # NCHW -> NHWC
    p = params['pre']
    x = jax.nn.relu(_bn(_conv(x, p['w'], 2, ((3, 3), (3, 3))), p['g'], p['b']))
    x = _max_pool_3x3_s2(x)
    ds = []
    for i, layer in enumerate(['layer1', 'layer2', 'layer3'], start=1):
        for blk in params[layer]:
            x = basic_block(x, blk)
        x, d = stage_fn(x, params[f'c{i}_w'], params[f'c{i}_b'],
                        params[f'f{i}_w'], params[f'f{i}_b'])
        ds.append(d)
    for blk in params['layer4']:
        x = basic_block(x, blk)
    domain, exp_feat = final_fn(x, params['c4_w'], params['c4_b'],
                                params['f4_w'], params['f4_b'],
                                ds[0], ds[1], ds[2],
                                params['fc_w'], params['fc_b'])
    return domain, exp_feat


# ----------------------------------------------------------------------------
# Pure-JAX references
# ----------------------------------------------------------------------------

# (a) literal f32 math of the original PyTorch module (loose check: the Pallas
#     path uses bf16 MXU matmuls + bf16 residual writeback, so expect ~1%
#     relative differences)
def _stage_ref_f32(x_nhwc, wc, bc, wf, bf):
    B, H, W, C = x_nhwc.shape
    x = x_nhwc.reshape(B, H * W, C)
    temp = x @ wc + bc
    xout = x - temp
    d = temp.mean(axis=1) @ wf + bf
    return xout.reshape(B, H, W, C), d


def _final_ref_f32(x_nhwc, wc, bc, wf, bf, d1, d2, d3, fc_w, fc_b):
    B, H, W, C = x_nhwc.shape
    x = x_nhwc.reshape(B, H * W, C)
    temp = x @ wc + bc
    d4 = temp.mean(axis=1) @ wf + bf
    exp_feat = (x - temp).mean(axis=1)
    dsum = d1 + d2 + d3 + d4
    gate = jax.nn.sigmoid(dsum @ fc_w + fc_b)
    domain = jax.nn.relu(dsum * gate)
    return domain, exp_feat


# (b) references mirroring the exact bf16 / packed math of the Pallas kernels
#     (tight check of the kernel plumbing; shares _prep_stage so the folded and
#     packed weights are bit-identical)
def _stage_ref_bf16(x_nhwc, wc, bc, wf, bf):
    B, H, W, C = x_nhwc.shape
    x2, w_pack, b_pack, wcf_pack, bcf, rows, Ce = _prep_stage(x_nhwc, wc, bc, wf, bf)
    temp = jnp.dot(x2.astype(jnp.bfloat16), w_pack,
                   preferred_element_type=jnp.float32) + b_pack
    xout2 = (x2 - temp).astype(jnp.bfloat16)
    pooled = jnp.mean(x2.reshape(B, rows, Ce), axis=1)
    d = jnp.dot(pooled.astype(jnp.bfloat16), wcf_pack,
                preferred_element_type=jnp.float32) + bcf
    return xout2.reshape(B, H, W, C), d


def _final_ref_bf16(x_nhwc, wc, bc, wf, bf, d1, d2, d3, fc_w, fc_b):
    B, H, W, C = x_nhwc.shape
    pooled = jnp.mean(x_nhwc.astype(jnp.float32).reshape(B, H * W, C), axis=1)
    t = jnp.dot(pooled.astype(jnp.bfloat16), wc.astype(jnp.bfloat16),
                preferred_element_type=jnp.float32) + bc
    exp_feat = pooled - t
    d4 = jnp.dot(t.astype(jnp.bfloat16), wf.astype(jnp.bfloat16),
                 preferred_element_type=jnp.float32) + bf
    dsum = d1 + d2 + d3 + d4
    logits = jnp.sum(dsum * fc_w.reshape(1, -1), axis=-1, keepdims=True) + fc_b[0, 0]
    domain = jax.nn.relu(dsum * jax.nn.sigmoid(logits))
    return domain, exp_feat


if __name__ == "__main__":
    key = jax.random.PRNGKey(0)
    pkey, xkey = jax.random.split(key)
    params = init_params(pkey)

    # NumOfLayer=18 style backbone; small deterministic input (B=2, 3x64x64)
    x = jax.random.normal(xkey, (2, 3, 64, 64), jnp.float32)

    fwd = jax.jit(functools.partial(model_forward, params=params,
                                    stage_fn=decompose_stage,
                                    final_fn=decompose_final))
    domain, exp_feat = fwd(x)
    jax.block_until_ready((domain, exp_feat))
    assert domain.shape == (2, 512) and exp_feat.shape == (2, 512)

    # Tight check: mirror of the kernels' bf16/packed math in plain JAX.
    mirror = jax.jit(functools.partial(model_forward, params=params,
                                       stage_fn=_stage_ref_bf16,
                                       final_fn=_final_ref_bf16))
    dom_m, exp_m = mirror(x)

    # Loose check: literal f32 math of the original module.
    spec = jax.jit(functools.partial(model_forward, params=params,
                                     stage_fn=_stage_ref_f32,
                                     final_fn=_final_ref_f32))
    dom_f, exp_f = spec(x)

    def check(got, want, tol):
        got, want = np.asarray(got), np.asarray(want)
        scale = float(np.max(np.abs(want))) + 1e-6
        err = float(np.max(np.abs(got - want)))
        assert err <= tol * scale, (err, scale, tol)

    check(domain, dom_m, 5e-3)
    check(exp_feat, exp_m, 5e-3)
    check(domain, dom_f, 1e-1)
    check(exp_feat, exp_f, 1e-1)
    print("KERNEL_OK")
</pallas_src>

<mosaic_0001>
module attributes {stable_mosaic.version = 11 : i64} {
  func.func @_stage_kernel(%arg0: i32, %arg1: i32, %arg2: memref<128x128xf32, #tpu.memory_space<vmem>>, %arg3: memref<128x128xbf16, #tpu.memory_space<vmem>>, %arg4: memref<1x128xf32, #tpu.memory_space<vmem>>, %arg5: memref<128x512xbf16, #tpu.memory_space<vmem>>, %arg6: memref<1x512xf32, #tpu.memory_space<vmem>>, %arg7: memref<128x128xbf16, #tpu.memory_space<vmem>>, %arg8: memref<1x8x512xf32, #tpu.memory_space<vmem>>, %arg9: memref<1x128xf32, #tpu.memory_space<vmem>>) attributes {dimension_semantics = [#tpu.dimension_semantics<parallel>, #tpu.dimension_semantics<arbitrary>], iteration_bounds = array<i64: 2, 1>, scalar_prefetch = 0 : i64, scratch_operands = 1 : i64, tpu.core_type = #tpu.core_type<tc>, window_params = [{transform_indices = @transform_0, window_bounds = array<i64: 128, 128>}, {pipeline_mode = #tpu.pipeline_mode<synchronous>, transform_indices = @transform_1, window_bounds = array<i64: 128, 128>}, {pipeline_mode = #tpu.pipeline_mode<synchronous>, transform_indices = @transform_2, window_bounds = array<i64: 1, 128>}, {pipeline_mode = #tpu.pipeline_mode<synchronous>, transform_indices = @transform_3, window_bounds = array<i64: 128, 512>}, {pipeline_mode = #tpu.pipeline_mode<synchronous>, transform_indices = @transform_4, window_bounds = array<i64: 1, 512>}, {transform_indices = @transform_5, window_bounds = array<i64: 128, 128>}, {transform_indices = @transform_6, window_bounds = array<i64: 1, 8, 512>}]} {
    %c0_i32 = arith.constant 0 : i32
    %0 = arith.cmpi eq, %arg1, %c0_i32 : i32
    %1 = arith.extui %0 : i1 to i32
    %c0_i32_0 = arith.constant 0 : i32
    %2 = arith.cmpi ne, %1, %c0_i32_0 : i32
    scf.if %2 {
      %cst_15 = arith.constant 0.000000e+00 : f32
      %21 = vector.broadcast %cst_15 : f32 to vector<1x128xf32>
      %c0_16 = arith.constant 0 : index
      %c0_17 = arith.constant 0 : index
      %22 = vector.load %arg9[%c0_16, %c0_17] : memref<1x128xf32, #tpu.memory_space<vmem>>, vector<1x128xf32>
      tpu.vector_store %arg9[%c0_16, %c0_17], %21 {strides = array<i32>} : memref<1x128xf32, #tpu.memory_space<vmem>>, vector<1x128xf32>,
    } else {
    }
    %c0 = arith.constant 0 : index
    %c0_1 = arith.constant 0 : index
    %3 = vector.load %arg2[%c0, %c0_1] : memref<128x128xf32, #tpu.memory_space<vmem>>, vector<128x128xf32>
    %4 = arith.truncf %3 : vector<128x128xf32> to vector<128x128xbf16>
    %c0_2 = arith.constant 0 : index
    %c0_3 = arith.constant 0 : index
    %5 = vector.load %arg3[%c0_2, %c0_3] : memref<128x128xbf16, #tpu.memory_space<vmem>>, vector<128x128xbf16>
    %cst = arith.constant dense<0.000000e+00> : vector<128x128xf32>
    %6 = tpu.matmul %4, %5, %cst {dimension_numbers = #tpu.dot_dimension_numbers<[1], [0], [0], [1], [0, 0, 1, 1], [], []>} : vector<128x128xbf16>, vector<128x128xbf16>, vector<128x128xf32> -> vector<128x128xf32>
    %c0_4 = arith.constant 0 : index
    %c0_5 = arith.constant 0 : index
    %7 = vector.load %arg4[%c0_4, %c0_5] : memref<1x128xf32, #tpu.memory_space<vmem>>, vector<1x128xf32>
    %8 = vector.broadcast %7 : vector<1x128xf32> to vector<128x128xf32>
    %9 = arith.addf %6, %8 : vector<128x128xf32>
    %10 = arith.subf %3, %9 : vector<128x128xf32>
    %11 = arith.truncf %10 : vector<128x128xf32> to vector<128x128xbf16>
    %c0_6 = arith.constant 0 : index
    %c0_7 = arith.constant 0 : index
    %12 = vector.load %arg7[%c0_6, %c0_7] : memref<128x128xbf16, #tpu.memory_space<vmem>>, vector<128x128xbf16>
    tpu.vector_store %arg7[%c0_6, %c0_7], %11 {strides = array<i32>} : memref<128x128xbf16, #tpu.memory_space<vmem>>, vector<128x128xbf16>,
    %c0_8 = arith.constant 0 : index
    %c0_9 = arith.constant 0 : index
    %13 = vector.load %arg9[%c0_8, %c0_9] : memref<1x128xf32, #tpu.memory_space<vmem>>, vector<1x128xf32>
    %cst_10 = arith.constant dense<0.000000e+00> : vector<128xf32>
    %14 = vector.multi_reduction <add>, %3, %cst_10 [0] : vector<128x128xf32> to vector<128xf32>
    %15 = vector.shape_cast %14 : vector<128xf32> to vector<1x128xf32>
    %16 = arith.addf %13, %15 : vector<1x128xf32>
    %c0_11 = arith.constant 0 : index
    %c0_12 = arith.constant 0 : index
    %17 = vector.load %arg9[%c0_11, %c0_12] : memref<1x128xf32, #tpu.memory_space<vmem>>, vector<1x128xf32>
    tpu.vector_store %arg9[%c0_11, %c0_12], %16 {strides = array<i32>} : memref<1x128xf32, #tpu.memory_space<vmem>>, vector<1x128xf32>,
    %c0_i32_13 = arith.constant 0 : i32
    %18 = arith.cmpi eq, %arg1, %c0_i32_13 : i32
    %19 = arith.extui %18 : i1 to i32
    %c0_i32_14 = arith.constant 0 : i32
    %20 = arith.cmpi ne, %19, %c0_i32_14 : i32
    scf.if %20 {
      %c0_15 = arith.constant 0 : index
      %c0_16 = arith.constant 0 : index
      %21 = vector.load %arg9[%c0_15, %c0_16] : memref<1x128xf32, #tpu.memory_space<vmem>>, vector<1x128xf32>
      %cst_17 = arith.constant 7.812500e-03 : f32
      %22 = vector.broadcast %cst_17 : f32 to vector<1x128xf32>
      %23 = arith.mulf %21, %22 : vector<1x128xf32>
      %24 = arith.truncf %23 : vector<1x128xf32> to vector<1x128xbf16>
      %c0_18 = arith.constant 0 : index
      %c0_19 = arith.constant 0 : index
      %25 = vector.load %arg5[%c0_18, %c0_19] : memref<128x512xbf16, #tpu.memory_space<vmem>>, vector<128x512xbf16>
      %cst_20 = arith.constant dense<0.000000e+00> : vector<1x512xf32>
      %26 = tpu.matmul %24, %25, %cst_20 {dimension_numbers = #tpu.dot_dimension_numbers<[1], [0], [0], [1], [0, 0, 1, 1], [], []>} : vector<1x128xbf16>, vector<128x512xbf16>, vector<1x512xf32> -> vector<1x512xf32>
      %c0_21 = arith.constant 0 : index
      %c0_22 = arith.constant 0 : index
      %27 = vector.load %arg6[%c0_21, %c0_22] : memref<1x512xf32, #tpu.memory_space<vmem>>, vector<1x512xf32>
      %28 = arith.addf %26, %27 : vector<1x512xf32>
      %29 = vector.shape_cast %28 : vector<1x512xf32> to vector<1x1x512xf32>
      %30 = vector.shape_cast %29 : vector<1x1x512xf32> to vector<1x1x512xf32>
      %31 = vector.broadcast %30 : vector<1x1x512xf32> to vector<1x8x512xf32>
      %c0_23 = arith.constant 0 : index
      %c0_24 = arith.constant 0 : index
      %c0_25 = arith.constant 0 : index
      %32 = vector.load %arg8[%c0_23, %c0_24, %c0_25] : memref<1x8x512xf32, #tpu.memory_space<vmem>>, vector<1x8x512xf32>
      tpu.vector_store %arg8[%c0_23, %c0_24, %c0_25], %31 {strides = array<i32>} : memref<1x8x512xf32, #tpu.memory_space<vmem>>, vector<1x8x512xf32>,
    } else {
    }
    return
  }
  func.func @transform_0(%arg0: i32, %arg1: i32) -> (i32, i32) {
    %c1_i32 = arith.constant 1 : i32
    %0 = arith.muli %arg0, %c1_i32 : i32
    %1 = arith.addi %0, %arg1 : i32
    %c0_i32 = arith.constant 0 : i32
    %c0_i32_0 = arith.constant 0 : i32
    return %1, %c0_i32 : i32, i32
  }
  func.func @transform_1(%arg0: i32, %arg1: i32) -> (i32, i32) {
    %c0_i32 = arith.constant 0 : i32
    %c0_i32_0 = arith.constant 0 : i32
    %c0_i32_1 = arith.constant 0 : i32
    return %c0_i32, %c0_i32_0 : i32, i32
  }
  func.func @transform_2(%arg0: i32, %arg1: i32) -> (i32, i32) {
    %c0_i32 = arith.constant 0 : i32
    %c0_i32_0 = arith.constant 0 : i32
    %c0_i32_1 = arith.constant 0 : i32
    return %c0_i32, %c0_i32_0 : i32, i32
  }
  func.func @transform_3(%arg0: i32, %arg1: i32) -> (i32, i32) {
    %c0_i32 = arith.constant 0 : i32
    %c0_i32_0 = arith.constant 0 : i32
    %c0_i32_1 = arith.constant 0 : i32
    return %c0_i32, %c0_i32_0 : i32, i32
  }
  func.func @transform_4(%arg0: i32, %arg1: i32) -> (i32, i32) {
    %c0_i32 = arith.constant 0 : i32
    %c0_i32_0 = arith.constant 0 : i32
    %c0_i32_1 = arith.constant 0 : i32
    return %c0_i32, %c0_i32_0 : i32, i32
  }
  func.func @transform_5(%arg0: i32, %arg1: i32) -> (i32, i32) {
    %c1_i32 = arith.constant 1 : i32
    %0 = arith.muli %arg0, %c1_i32 : i32
    %1 = arith.addi %0, %arg1 : i32
    %c0_i32 = arith.constant 0 : i32
    %c0_i32_0 = arith.constant 0 : i32
    return %1, %c0_i32 : i32, i32
  }
  func.func @transform_6(%arg0: i32, %arg1: i32) -> (i32, i32, i32) {
    %c0_i32 = arith.constant 0 : i32
    %c0_i32_0 = arith.constant 0 : i32
    %c0_i32_1 = arith.constant 0 : i32
    return %arg0, %c0_i32, %c0_i32_0 : i32, i32, i32
  }
}

module attributes {stable_mosaic.version = 11 : i64} {
  func.func @_stage_kernel(%arg0: i32, %arg1: i32, %arg2: memref<64x128xf32, #tpu.memory_space<vmem>>, %arg3: memref<128x128xbf16, #tpu.memory_space<vmem>>, %arg4: memref<1x128xf32, #tpu.memory_space<vmem>>, %arg5: memref<128x512xbf16, #tpu.memory_space<vmem>>, %arg6: memref<1x512xf32, #tpu.memory_space<vmem>>, %arg7: memref<64x128xbf16, #tpu.memory_space<vmem>>, %arg8: memref<1x8x512xf32, #tpu.memory_space<vmem>>, %arg9: memref<1x128xf32, #tpu.memory_space<vmem>>) attributes {dimension_semantics = [#tpu.dimension_semantics<parallel>, #tpu.dimension_semantics<arbitrary>], iteration_bounds = array<i64: 2, 1>, scalar_prefetch = 0 : i64, scratch_operands = 1 : i64, tpu.core_type = #tpu.core_type<tc>, window_params = [{transform_indices = @transform_0, window_bounds = array<i64: 64, 128>}, {pipeline_mode = #tpu.pipeline_mode<synchronous>, transform_indices = @transform_1, window_bounds = array<i64: 128, 128>}, {pipeline_mode = #tpu.pipeline_mode<synchronous>, transform_indices = @transform_2, window_bounds = array<i64: 1, 128>}, {pipeline_mode = #tpu.pipeline_mode<synchronous>, transform_indices = @transform_3, window_bounds = array<i64: 128, 512>}, {pipeline_mode = #tpu.pipeline_mode<synchronous>, transform_indices = @transform_4, window_bounds = array<i64: 1, 512>}, {transform_indices = @transform_5, window_bounds = array<i64: 64, 128>}, {transform_indices = @transform_6, window_bounds = array<i64: 1, 8, 512>}]} {
    %c0_i32 = arith.constant 0 : i32
    %0 = arith.cmpi eq, %arg1, %c0_i32 : i32
    %1 = arith.extui %0 : i1 to i32
    %c0_i32_0 = arith.constant 0 : i32
    %2 = arith.cmpi ne, %1, %c0_i32_0 : i32
    scf.if %2 {
      %cst_15 = arith.constant 0.000000e+00 : f32
      %21 = vector.broadcast %cst_15 : f32 to vector<1x128xf32>
      %c0_16 = arith.constant 0 : index
      %c0_17 = arith.constant 0 : index
      %22 = vector.load %arg9[%c0_16, %c0_17] : memref<1x128xf32, #tpu.memory_space<vmem>>, vector<1x128xf32>
      tpu.vector_store %arg9[%c0_16, %c0_17], %21 {strides = array<i32>} : memref<1x128xf32, #tpu.memory_space<vmem>>, vector<1x128xf32>,
    } else {
    }
    %c0 = arith.constant 0 : index
    %c0_1 = arith.constant 0 : index
    %3 = vector.load %arg2[%c0, %c0_1] : memref<64x128xf32, #tpu.memory_space<vmem>>, vector<64x128xf32>
    %4 = arith.truncf %3 : vector<64x128xf32> to vector<64x128xbf16>
    %c0_2 = arith.constant 0 : index
    %c0_3 = arith.constant 0 : index
    %5 = vector.load %arg3[%c0_2, %c0_3] : memref<128x128xbf16, #tpu.memory_space<vmem>>, vector<128x128xbf16>
    %cst = arith.constant dense<0.000000e+00> : vector<64x128xf32>
    %6 = tpu.matmul %4, %5, %cst {dimension_numbers = #tpu.dot_dimension_numbers<[1], [0], [0], [1], [0, 0, 1, 1], [], []>} : vector<64x128xbf16>, vector<128x128xbf16>, vector<64x128xf32> -> vector<64x128xf32>
    %c0_4 = arith.constant 0 : index
    %c0_5 = arith.constant 0 : index
    %7 = vector.load %arg4[%c0_4, %c0_5] : memref<1x128xf32, #tpu.memory_space<vmem>>, vector<1x128xf32>
    %8 = vector.broadcast %7 : vector<1x128xf32> to vector<64x128xf32>
    %9 = arith.addf %6, %8 : vector<64x128xf32>
    %10 = arith.subf %3, %9 : vector<64x128xf32>
    %11 = arith.truncf %10 : vector<64x128xf32> to vector<64x128xbf16>
    %c0_6 = arith.constant 0 : index
    %c0_7 = arith.constant 0 : index
    %12 = vector.load %arg7[%c0_6, %c0_7] : memref<64x128xbf16, #tpu.memory_space<vmem>>, vector<64x128xbf16>
    tpu.vector_store %arg7[%c0_6, %c0_7], %11 {strides = array<i32>} : memref<64x128xbf16, #tpu.memory_space<vmem>>, vector<64x128xbf16>,
    %c0_8 = arith.constant 0 : index
    %c0_9 = arith.constant 0 : index
    %13 = vector.load %arg9[%c0_8, %c0_9] : memref<1x128xf32, #tpu.memory_space<vmem>>, vector<1x128xf32>
    %cst_10 = arith.constant dense<0.000000e+00> : vector<128xf32>
    %14 = vector.multi_reduction <add>, %3, %cst_10 [0] : vector<64x128xf32> to vector<128xf32>
    %15 = vector.shape_cast %14 : vector<128xf32> to vector<1x128xf32>
    %16 = arith.addf %13, %15 : vector<1x128xf32>
    %c0_11 = arith.constant 0 : index
    %c0_12 = arith.constant 0 : index
    %17 = vector.load %arg9[%c0_11, %c0_12] : memref<1x128xf32, #tpu.memory_space<vmem>>, vector<1x128xf32>
    tpu.vector_store %arg9[%c0_11, %c0_12], %16 {strides = array<i32>} : memref<1x128xf32, #tpu.memory_space<vmem>>, vector<1x128xf32>,
    %c0_i32_13 = arith.constant 0 : i32
    %18 = arith.cmpi eq, %arg1, %c0_i32_13 : i32
    %19 = arith.extui %18 : i1 to i32
    %c0_i32_14 = arith.constant 0 : i32
    %20 = arith.cmpi ne, %19, %c0_i32_14 : i32
    scf.if %20 {
      %c0_15 = arith.constant 0 : index
      %c0_16 = arith.constant 0 : index
      %21 = vector.load %arg9[%c0_15, %c0_16] : memref<1x128xf32, #tpu.memory_space<vmem>>, vector<1x128xf32>
      %cst_17 = arith.constant 1.562500e-02 : f32
      %22 = vector.broadcast %cst_17 : f32 to vector<1x128xf32>
      %23 = arith.mulf %21, %22 : vector<1x128xf32>
      %24 = arith.truncf %23 : vector<1x128xf32> to vector<1x128xbf16>
      %c0_18 = arith.constant 0 : index
      %c0_19 = arith.constant 0 : index
      %25 = vector.load %arg5[%c0_18, %c0_19] : memref<128x512xbf16, #tpu.memory_space<vmem>>, vector<128x512xbf16>
      %cst_20 = arith.constant dense<0.000000e+00> : vector<1x512xf32>
      %26 = tpu.matmul %24, %25, %cst_20 {dimension_numbers = #tpu.dot_dimension_numbers<[1], [0], [0], [1], [0, 0, 1, 1], [], []>} : vector<1x128xbf16>, vector<128x512xbf16>, vector<1x512xf32> -> vector<1x512xf32>
      %c0_21 = arith.constant 0 : index
      %c0_22 = arith.constant 0 : index
      %27 = vector.load %arg6[%c0_21, %c0_22] : memref<1x512xf32, #tpu.memory_space<vmem>>, vector<1x512xf32>
      %28 = arith.addf %26, %27 : vector<1x512xf32>
      %29 = vector.shape_cast %28 : vector<1x512xf32> to vector<1x1x512xf32>
      %30 = vector.shape_cast %29 : vector<1x1x512xf32> to vector<1x1x512xf32>
      %31 = vector.broadcast %30 : vector<1x1x512xf32> to vector<1x8x512xf32>
      %c0_23 = arith.constant 0 : index
      %c0_24 = arith.constant 0 : index
      %c0_25 = arith.constant 0 : index
      %32 = vector.load %arg8[%c0_23, %c0_24, %c0_25] : memref<1x8x512xf32, #tpu.memory_space<vmem>>, vector<1x8x512xf32>
      tpu.vector_store %arg8[%c0_23, %c0_24, %c0_25], %31 {strides = array<i32>} : memref<1x8x512xf32, #tpu.memory_space<vmem>>, vector<1x8x512xf32>,
    } else {
    }
    return
  }
  func.func @transform_0(%arg0: i32, %arg1: i32) -> (i32, i32) {
    %c1_i32 = arith.constant 1 : i32
    %0 = arith.muli %arg0, %c1_i32 : i32
    %1 = arith.addi %0, %arg1 : i32
    %c0_i32 = arith.constant 0 : i32
    %c0_i32_0 = arith.constant 0 : i32
    return %1, %c0_i32 : i32, i32
  }
  func.func @transform_1(%arg0: i32, %arg1: i32) -> (i32, i32) {
    %c0_i32 = arith.constant 0 : i32
    %c0_i32_0 = arith.constant 0 : i32
    %c0_i32_1 = arith.constant 0 : i32
    return %c0_i32, %c0_i32_0 : i32, i32
  }
  func.func @transform_2(%arg0: i32, %arg1: i32) -> (i32, i32) {
    %c0_i32 = arith.constant 0 : i32
    %c0_i32_0 = arith.constant 0 : i32
    %c0_i32_1 = arith.constant 0 : i32
    return %c0_i32, %c0_i32_0 : i32, i32
  }
  func.func @transform_3(%arg0: i32, %arg1: i32) -> (i32, i32) {
    %c0_i32 = arith.constant 0 : i32
    %c0_i32_0 = arith.constant 0 : i32
    %c0_i32_1 = arith.constant 0 : i32
    return %c0_i32, %c0_i32_0 : i32, i32
  }
  func.func @transform_4(%arg0: i32, %arg1: i32) -> (i32, i32) {
    %c0_i32 = arith.constant 0 : i32
    %c0_i32_0 = arith.constant 0 : i32
    %c0_i32_1 = arith.constant 0 : i32
    return %c0_i32, %c0_i32_0 : i32, i32
  }
  func.func @transform_5(%arg0: i32, %arg1: i32) -> (i32, i32) {
    %c1_i32 = arith.constant 1 : i32
    %0 = arith.muli %arg0, %c1_i32 : i32
    %1 = arith.addi %0, %arg1 : i32
    %c0_i32 = arith.constant 0 : i32
    %c0_i32_0 = arith.constant 0 : i32
    return %1, %c0_i32 : i32, i32
  }
  func.func @transform_6(%arg0: i32, %arg1: i32) -> (i32, i32, i32) {
    %c0_i32 = arith.constant 0 : i32
    %c0_i32_0 = arith.constant 0 : i32
    %c0_i32_1 = arith.constant 0 : i32
    return %arg0, %c0_i32, %c0_i32_0 : i32, i32, i32
  }
}

module attributes {stable_mosaic.version = 11 : i64} {
  func.func @_stage_kernel(%arg0: i32, %arg1: i32, %arg2: memref<16x256xf32, #tpu.memory_space<vmem>>, %arg3: memref<256x256xbf16, #tpu.memory_space<vmem>>, %arg4: memref<1x256xf32, #tpu.memory_space<vmem>>, %arg5: memref<256x512xbf16, #tpu.memory_space<vmem>>, %arg6: memref<1x512xf32, #tpu.memory_space<vmem>>, %arg7: memref<16x256xbf16, #tpu.memory_space<vmem>>, %arg8: memref<1x8x512xf32, #tpu.memory_space<vmem>>, %arg9: memref<1x256xf32, #tpu.memory_space<vmem>>) attributes {dimension_semantics = [#tpu.dimension_semantics<parallel>, #tpu.dimension_semantics<arbitrary>], iteration_bounds = array<i64: 2, 1>, scalar_prefetch = 0 : i64, scratch_operands = 1 : i64, tpu.core_type = #tpu.core_type<tc>, window_params = [{transform_indices = @transform_0, window_bounds = array<i64: 16, 256>}, {pipeline_mode = #tpu.pipeline_mode<synchronous>, transform_indices = @transform_1, window_bounds = array<i64: 256, 256>}, {pipeline_mode = #tpu.pipeline_mode<synchronous>, transform_indices = @transform_2, window_bounds = array<i64: 1, 256>}, {pipeline_mode = #tpu.pipeline_mode<synchronous>, transform_indices = @transform_3, window_bounds = array<i64: 256, 512>}, {pipeline_mode = #tpu.pipeline_mode<synchronous>, transform_indices = @transform_4, window_bounds = array<i64: 1, 512>}, {transform_indices = @transform_5, window_bounds = array<i64: 16, 256>}, {transform_indices = @transform_6, window_bounds = array<i64: 1, 8, 512>}]} {
    %c0_i32 = arith.constant 0 : i32
    %0 = arith.cmpi eq, %arg1, %c0_i32 : i32
    %1 = arith.extui %0 : i1 to i32
    %c0_i32_0 = arith.constant 0 : i32
    %2 = arith.cmpi ne, %1, %c0_i32_0 : i32
    scf.if %2 {
      %cst_15 = arith.constant 0.000000e+00 : f32
      %21 = vector.broadcast %cst_15 : f32 to vector<1x256xf32>
      %c0_16 = arith.constant 0 : index
      %c0_17 = arith.constant 0 : index
      %22 = vector.load %arg9[%c0_16, %c0_17] : memref<1x256xf32, #tpu.memory_space<vmem>>, vector<1x256xf32>
      tpu.vector_store %arg9[%c0_16, %c0_17], %21 {strides = array<i32>} : memref<1x256xf32, #tpu.memory_space<vmem>>, vector<1x256xf32>,
    } else {
    }
    %c0 = arith.constant 0 : index
    %c0_1 = arith.constant 0 : index
    %3 = vector.load %arg2[%c0, %c0_1] : memref<16x256xf32, #tpu.memory_space<vmem>>, vector<16x256xf32>
    %4 = arith.truncf %3 : vector<16x256xf32> to vector<16x256xbf16>
    %c0_2 = arith.constant 0 : index
    %c0_3 = arith.constant 0 : index
    %5 = vector.load %arg3[%c0_2, %c0_3] : memref<256x256xbf16, #tpu.memory_space<vmem>>, vector<256x256xbf16>
    %cst = arith.constant dense<0.000000e+00> : vector<16x256xf32>
    %6 = tpu.matmul %4, %5, %cst {dimension_numbers = #tpu.dot_dimension_numbers<[1], [0], [0], [1], [0, 0, 1, 1], [], []>} : vector<16x256xbf16>, vector<256x256xbf16>, vector<16x256xf32> -> vector<16x256xf32>
    %c0_4 = arith.constant 0 : index
    %c0_5 = arith.constant 0 : index
    %7 = vector.load %arg4[%c0_4, %c0_5] : memref<1x256xf32, #tpu.memory_space<vmem>>, vector<1x256xf32>
    %8 = vector.broadcast %7 : vector<1x256xf32> to vector<16x256xf32>
    %9 = arith.addf %6, %8 : vector<16x256xf32>
    %10 = arith.subf %3, %9 : vector<16x256xf32>
    %11 = arith.truncf %10 : vector<16x256xf32> to vector<16x256xbf16>
    %c0_6 = arith.constant 0 : index
    %c0_7 = arith.constant 0 : index
    %12 = vector.load %arg7[%c0_6, %c0_7] : memref<16x256xbf16, #tpu.memory_space<vmem>>, vector<16x256xbf16>
    tpu.vector_store %arg7[%c0_6, %c0_7], %11 {strides = array<i32>} : memref<16x256xbf16, #tpu.memory_space<vmem>>, vector<16x256xbf16>,
    %c0_8 = arith.constant 0 : index
    %c0_9 = arith.constant 0 : index
    %13 = vector.load %arg9[%c0_8, %c0_9] : memref<1x256xf32, #tpu.memory_space<vmem>>, vector<1x256xf32>
    %cst_10 = arith.constant dense<0.000000e+00> : vector<256xf32>
    %14 = vector.multi_reduction <add>, %3, %cst_10 [0] : vector<16x256xf32> to vector<256xf32>
    %15 = vector.shape_cast %14 : vector<256xf32> to vector<1x256xf32>
    %16 = arith.addf %13, %15 : vector<1x256xf32>
    %c0_11 = arith.constant 0 : index
    %c0_12 = arith.constant 0 : index
    %17 = vector.load %arg9[%c0_11, %c0_12] : memref<1x256xf32, #tpu.memory_space<vmem>>, vector<1x256xf32>
    tpu.vector_store %arg9[%c0_11, %c0_12], %16 {strides = array<i32>} : memref<1x256xf32, #tpu.memory_space<vmem>>, vector<1x256xf32>,
    %c0_i32_13 = arith.constant 0 : i32
    %18 = arith.cmpi eq, %arg1, %c0_i32_13 : i32
    %19 = arith.extui %18 : i1 to i32
    %c0_i32_14 = arith.constant 0 : i32
    %20 = arith.cmpi ne, %19, %c0_i32_14 : i32
    scf.if %20 {
      %c0_15 = arith.constant 0 : index
      %c0_16 = arith.constant 0 : index
      %21 = vector.load %arg9[%c0_15, %c0_16] : memref<1x256xf32, #tpu.memory_space<vmem>>, vector<1x256xf32>
      %cst_17 = arith.constant 6.250000e-02 : f32
      %22 = vector.broadcast %cst_17 : f32 to vector<1x256xf32>
      %23 = arith.mulf %21, %22 : vector<1x256xf32>
      %24 = arith.truncf %23 : vector<1x256xf32> to vector<1x256xbf16>
      %c0_18 = arith.constant 0 : index
      %c0_19 = arith.constant 0 : index
      %25 = vector.load %arg5[%c0_18, %c0_19] : memref<256x512xbf16, #tpu.memory_space<vmem>>, vector<256x512xbf16>
      %cst_20 = arith.constant dense<0.000000e+00> : vector<1x512xf32>
      %26 = tpu.matmul %24, %25, %cst_20 {dimension_numbers = #tpu.dot_dimension_numbers<[1], [0], [0], [1], [0, 0, 1, 1], [], []>} : vector<1x256xbf16>, vector<256x512xbf16>, vector<1x512xf32> -> vector<1x512xf32>
      %c0_21 = arith.constant 0 : index
      %c0_22 = arith.constant 0 : index
      %27 = vector.load %arg6[%c0_21, %c0_22] : memref<1x512xf32, #tpu.memory_space<vmem>>, vector<1x512xf32>
      %28 = arith.addf %26, %27 : vector<1x512xf32>
      %29 = vector.shape_cast %28 : vector<1x512xf32> to vector<1x1x512xf32>
      %30 = vector.shape_cast %29 : vector<1x1x512xf32> to vector<1x1x512xf32>
      %31 = vector.broadcast %30 : vector<1x1x512xf32> to vector<1x8x512xf32>
      %c0_23 = arith.constant 0 : index
      %c0_24 = arith.constant 0 : index
      %c0_25 = arith.constant 0 : index
      %32 = vector.load %arg8[%c0_23, %c0_24, %c0_25] : memref<1x8x512xf32, #tpu.memory_space<vmem>>, vector<1x8x512xf32>
      tpu.vector_store %arg8[%c0_23, %c0_24, %c0_25], %31 {strides = array<i32>} : memref<1x8x512xf32, #tpu.memory_space<vmem>>, vector<1x8x512xf32>,
    } else {
    }
    return
  }
  func.func @transform_0(%arg0: i32, %arg1: i32) -> (i32, i32) {
    %c1_i32 = arith.constant 1 : i32
    %0 = arith.muli %arg0, %c1_i32 : i32
    %1 = arith.addi %0, %arg1 : i32
    %c0_i32 = arith.constant 0 : i32
    %c0_i32_0 = arith.constant 0 : i32
    return %1, %c0_i32 : i32, i32
  }
  func.func @transform_1(%arg0: i32, %arg1: i32) -> (i32, i32) {
    %c0_i32 = arith.constant 0 : i32
    %c0_i32_0 = arith.constant 0 : i32
    %c0_i32_1 = arith.constant 0 : i32
    return %c0_i32, %c0_i32_0 : i32, i32
  }
  func.func @transform_2(%arg0: i32, %arg1: i32) -> (i32, i32) {
    %c0_i32 = arith.constant 0 : i32
    %c0_i32_0 = arith.constant 0 : i32
    %c0_i32_1 = arith.constant 0 : i32
    return %c0_i32, %c0_i32_0 : i32, i32
  }
  func.func @transform_3(%arg0: i32, %arg1: i32) -> (i32, i32) {
    %c0_i32 = arith.constant 0 : i32
    %c0_i32_0 = arith.constant 0 : i32
    %c0_i32_1 = arith.constant 0 : i32
    return %c0_i32, %c0_i32_0 : i32, i32
  }
  func.func @transform_4(%arg0: i32, %arg1: i32) -> (i32, i32) {
    %c0_i32 = arith.constant 0 : i32
    %c0_i32_0 = arith.constant 0 : i32
    %c0_i32_1 = arith.constant 0 : i32
    return %c0_i32, %c0_i32_0 : i32, i32
  }
  func.func @transform_5(%arg0: i32, %arg1: i32) -> (i32, i32) {
    %c1_i32 = arith.constant 1 : i32
    %0 = arith.muli %arg0, %c1_i32 : i32
    %1 = arith.addi %0, %arg1 : i32
    %c0_i32 = arith.constant 0 : i32
    %c0_i32_0 = arith.constant 0 : i32
    return %1, %c0_i32 : i32, i32
  }
  func.func @transform_6(%arg0: i32, %arg1: i32) -> (i32, i32, i32) {
    %c0_i32 = arith.constant 0 : i32
    %c0_i32_0 = arith.constant 0 : i32
    %c0_i32_1 = arith.constant 0 : i32
    return %arg0, %c0_i32, %c0_i32_0 : i32, i32, i32
  }
}

module attributes {stable_mosaic.version = 11 : i64} {
  func.func @_final_kernel(%arg0: i32, %arg1: memref<2x4x512xf32, #tpu.memory_space<vmem>>, %arg2: memref<512x512xbf16, #tpu.memory_space<vmem>>, %arg3: memref<1x512xf32, #tpu.memory_space<vmem>>, %arg4: memref<512x512xbf16, #tpu.memory_space<vmem>>, %arg5: memref<1x512xf32, #tpu.memory_space<vmem>>, %arg6: memref<2x512xf32, #tpu.memory_space<vmem>>, %arg7: memref<2x512xf32, #tpu.memory_space<vmem>>, %arg8: memref<2x512xf32, #tpu.memory_space<vmem>>, %arg9: memref<1x512xf32, #tpu.memory_space<vmem>>, %arg10: memref<1x1xf32, #tpu.memory_space<smem>>, %arg11: memref<2x512xf32, #tpu.memory_space<vmem>>, %arg12: memref<2x512xf32, #tpu.memory_space<vmem>>) attributes {dimension_semantics = [#tpu.dimension_semantics<arbitrary>], iteration_bounds = array<i64: 1>, scalar_prefetch = 0 : i64, scratch_operands = 0 : i64, tpu.core_type = #tpu.core_type<tc>, window_params = [{pipeline_mode = #tpu.pipeline_mode<synchronous>, transform_indices = @transform_0, window_bounds = array<i64: 2, 4, 512>}, {pipeline_mode = #tpu.pipeline_mode<synchronous>, transform_indices = @transform_1, window_bounds = array<i64: 512, 512>}, {pipeline_mode = #tpu.pipeline_mode<synchronous>, transform_indices = @transform_2, window_bounds = array<i64: 1, 512>}, {pipeline_mode = #tpu.pipeline_mode<synchronous>, transform_indices = @transform_3, window_bounds = array<i64: 512, 512>}, {pipeline_mode = #tpu.pipeline_mode<synchronous>, transform_indices = @transform_4, window_bounds = array<i64: 1, 512>}, {pipeline_mode = #tpu.pipeline_mode<synchronous>, transform_indices = @transform_5, window_bounds = array<i64: 2, 512>}, {pipeline_mode = #tpu.pipeline_mode<synchronous>, transform_indices = @transform_6, window_bounds = array<i64: 2, 512>}, {pipeline_mode = #tpu.pipeline_mode<synchronous>, transform_indices = @transform_7, window_bounds = array<i64: 2, 512>}, {pipeline_mode = #tpu.pipeline_mode<synchronous>, transform_indices = @transform_8, window_bounds = array<i64: 1, 512>}, {transform_indices = @transform_9, window_bounds = array<i64: 1, 1>}, {pipeline_mode = #tpu.pipeline_mode<synchronous>, transform_indices = @transform_10, window_bounds = array<i64: 2, 512>}, {pipeline_mode = #tpu.pipeline_mode<synchronous>, transform_indices = @transform_11, window_bounds = array<i64: 2, 512>}]} {
    %c0 = arith.constant 0 : index
    %c0_0 = arith.constant 0 : index
    %c0_1 = arith.constant 0 : index
    %0 = vector.load %arg1[%c0, %c0_0, %c0_1] : memref<2x4x512xf32, #tpu.memory_space<vmem>>, vector<2x4x512xf32>
    %cst = arith.constant dense<0.000000e+00> : vector<2x512xf32>
    %1 = vector.multi_reduction <add>, %0, %cst [1] : vector<2x4x512xf32> to vector<2x512xf32>
    %cst_2 = arith.constant 4.000000e+00 : f32
    %2 = vector.broadcast %cst_2 : f32 to vector<2x512xf32>
    %3 = arith.divf %1, %2 : vector<2x512xf32>
    %4 = arith.truncf %3 : vector<2x512xf32> to vector<2x512xbf16>
    %c0_3 = arith.constant 0 : index
    %c0_4 = arith.constant 0 : index
    %5 = vector.load %arg2[%c0_3, %c0_4] : memref<512x512xbf16, #tpu.memory_space<vmem>>, vector<512x512xbf16>
    %cst_5 = arith.constant dense<0.000000e+00> : vector<2x512xf32>
    %6 = tpu.matmul %4, %5, %cst_5 {dimension_numbers = #tpu.dot_dimension_numbers<[1], [0], [0], [1], [0, 0, 1, 1], [], []>} : vector<2x512xbf16>, vector<512x512xbf16>, vector<2x512xf32> -> vector<2x512xf32>
    %c0_6 = arith.constant 0 : index
    %c0_7 = arith.constant 0 : index
    %7 = vector.load %arg3[%c0_6, %c0_7] : memref<1x512xf32, #tpu.memory_space<vmem>>, vector<1x512xf32>
    %8 = vector.broadcast %7 : vector<1x512xf32> to vector<2x512xf32>
    %9 = arith.addf %6, %8 : vector<2x512xf32>
    %10 = arith.subf %3, %9 : vector<2x512xf32>
    %c0_8 = arith.constant 0 : index
    %c0_9 = arith.constant 0 : index
    %11 = vector.load %arg12[%c0_8, %c0_9] : memref<2x512xf32, #tpu.memory_space<vmem>>, vector<2x512xf32>
    tpu.vector_store %arg12[%c0_8, %c0_9], %10 {strides = array<i32>} : memref<2x512xf32, #tpu.memory_space<vmem>>, vector<2x512xf32>,
    %12 = arith.truncf %9 : vector<2x512xf32> to vector<2x512xbf16>
    %c0_10 = arith.constant 0 : index
    %c0_11 = arith.constant 0 : index
    %13 = vector.load %arg4[%c0_10, %c0_11] : memref<512x512xbf16, #tpu.memory_space<vmem>>, vector<512x512xbf16>
    %cst_12 = arith.constant dense<0.000000e+00> : vector<2x512xf32>
    %14 = tpu.matmul %12, %13, %cst_12 {dimension_numbers = #tpu.dot_dimension_numbers<[1], [0], [0], [1], [0, 0, 1, 1], [], []>} : vector<2x512xbf16>, vector<512x512xbf16>, vector<2x512xf32> -> vector<2x512xf32>
    %c0_13 = arith.constant 0 : index
    %c0_14 = arith.constant 0 : index
    %15 = vector.load %arg5[%c0_13, %c0_14] : memref<1x512xf32, #tpu.memory_space<vmem>>, vector<1x512xf32>
    %16 = vector.broadcast %15 : vector<1x512xf32> to vector<2x512xf32>
    %17 = arith.addf %14, %16 : vector<2x512xf32>
    %c0_15 = arith.constant 0 : index
    %c0_16 = arith.constant 0 : index
    %18 = vector.load %arg6[%c0_15, %c0_16] : memref<2x512xf32, #tpu.memory_space<vmem>>, vector<2x512xf32>
    %c0_17 = arith.constant 0 : index
    %c0_18 = arith.constant 0 : index
    %19 = vector.load %arg7[%c0_17, %c0_18] : memref<2x512xf32, #tpu.memory_space<vmem>>, vector<2x512xf32>
    %20 = arith.addf %18, %19 : vector<2x512xf32>
    %c0_19 = arith.constant 0 : index
    %c0_20 = arith.constant 0 : index
    %21 = vector.load %arg8[%c0_19, %c0_20] : memref<2x512xf32, #tpu.memory_space<vmem>>, vector<2x512xf32>
    %22 = arith.addf %20, %21 : vector<2x512xf32>
    %23 = arith.addf %22, %17 : vector<2x512xf32>
    %c0_21 = arith.constant 0 : index
    %c0_22 = arith.constant 0 : index
    %24 = vector.load %arg9[%c0_21, %c0_22] : memref<1x512xf32, #tpu.memory_space<vmem>>, vector<1x512xf32>
    %25 = vector.broadcast %24 : vector<1x512xf32> to vector<2x512xf32>
    %26 = arith.mulf %23, %25 : vector<2x512xf32>
    %cst_23 = arith.constant dense<0.000000e+00> : vector<2xf32>
    %27 = vector.multi_reduction <add>, %26, %cst_23 [1] : vector<2x512xf32> to vector<2xf32>
    %28 = vector.shape_cast %27 : vector<2xf32> to vector<2x1xf32>
    %c0_24 = arith.constant 0 : index
    %c0_25 = arith.constant 0 : index
    %29 = memref.load %arg10[%c0_24, %c0_25] : memref<1x1xf32, #tpu.memory_space<smem>>
    %30 = vector.broadcast %29 : f32 to vector<2x1xf32>
    %31 = arith.addf %28, %30 : vector<2x1xf32>
    %32 = arith.negf %31 : vector<2x1xf32>
    %33 = math.exp %32 : vector<2x1xf32>
    %cst_26 = arith.constant 1.000000e+00 : f32
    %34 = vector.broadcast %cst_26 : f32 to vector<2x1xf32>
    %35 = arith.addf %34, %33 : vector<2x1xf32>
    %36 = arith.divf %34, %35 : vector<2x1xf32>
    %37 = vector.broadcast %36 : vector<2x1xf32> to vector<2x512xf32>
    %38 = arith.mulf %23, %37 : vector<2x512xf32>
    %cst_27 = arith.constant 0.000000e+00 : f32
    %39 = vector.broadcast %cst_27 : f32 to vector<2x512xf32>
    %40 = arith.maximumf %38, %39 : vector<2x512xf32>
    %c0_28 = arith.constant 0 : index
    %c0_29 = arith.constant 0 : index
    %41 = vector.load %arg11[%c0_28, %c0_29] : memref<2x512xf32, #tpu.memory_space<vmem>>, vector<2x512xf32>
    tpu.vector_store %arg11[%c0_28, %c0_29], %40 {strides = array<i32>} : memref<2x512xf32, #tpu.memory_space<vmem>>, vector<2x512xf32>,
    return
  }
  func.func @transform_0(%arg0: i32) -> (i32, i32, i32) {
    %c0_i32 = arith.constant 0 : i32
    %c0_i32_0 = arith.constant 0 : i32
    %c0_i32_1 = arith.constant 0 : i32
    %c0_i32_2 = arith.constant 0 : i32
    return %c0_i32, %c0_i32_0, %c0_i32_1 : i32, i32, i32
  }
  func.func @transform_1(%arg0: i32) -> (i32, i32) {
    %c0_i32 = arith.constant 0 : i32
    %c0_i32_0 = arith.constant 0 : i32
    %c0_i32_1 = arith.constant 0 : i32
    return %c0_i32, %c0_i32_0 : i32, i32
  }
  func.func @transform_2(%arg0: i32) -> (i32, i32) {
    %c0_i32 = arith.constant 0 : i32
    %c0_i32_0 = arith.constant 0 : i32
    %c0_i32_1 = arith.constant 0 : i32
    return %c0_i32, %c0_i32_0 : i32, i32
  }
  func.func @transform_3(%arg0: i32) -> (i32, i32) {
    %c0_i32 = arith.constant 0 : i32
    %c0_i32_0 = arith.constant 0 : i32
    %c0_i32_1 = arith.constant 0 : i32
    return %c0_i32, %c0_i32_0 : i32, i32
  }
  func.func @transform_4(%arg0: i32) -> (i32, i32) {
    %c0_i32 = arith.constant 0 : i32
    %c0_i32_0 = arith.constant 0 : i32
    %c0_i32_1 = arith.constant 0 : i32
    return %c0_i32, %c0_i32_0 : i32, i32
  }
  func.func @transform_5(%arg0: i32) -> (i32, i32) {
    %c0_i32 = arith.constant 0 : i32
    %c0_i32_0 = arith.constant 0 : i32
    %c0_i32_1 = arith.constant 0 : i32
    return %c0_i32, %c0_i32_0 : i32, i32
  }
  func.func @transform_6(%arg0: i32) -> (i32, i32) {
    %c0_i32 = arith.constant 0 : i32
    %c0_i32_0 = arith.constant 0 : i32
    %c0_i32_1 = arith.constant 0 : i32
    return %c0_i32, %c0_i32_0 : i32, i32
  }
  func.func @transform_7(%arg0: i32) -> (i32, i32) {
    %c0_i32 = arith.constant 0 : i32
    %c0_i32_0 = arith.constant 0 : i32
    %c0_i32_1 = arith.constant 0 : i32
    return %c0_i32, %c0_i32_0 : i32, i32
  }
  func.func @transform_8(%arg0: i32) -> (i32, i32) {
    %c0_i32 = arith.constant 0 : i32
    %c0_i32_0 = arith.constant 0 : i32
    %c0_i32_1 = arith.constant 0 : i32
    return %c0_i32, %c0_i32_0 : i32, i32
  }
  func.func @transform_9(%arg0: i32) -> (i32, i32) {
    %c0_i32 = arith.constant 0 : i32
    %c0_i32_0 = arith.constant 0 : i32
    %c0_i32_1 = arith.constant 0 : i32
    return %c0_i32, %c0_i32_0 : i32, i32
  }
  func.func @transform_10(%arg0: i32) -> (i32, i32) {
    %c0_i32 = arith.constant 0 : i32
    %c0_i32_0 = arith.constant 0 : i32
    %c0_i32_1 = arith.constant 0 : i32
    return %c0_i32, %c0_i32_0 : i32, i32
  }
  func.func @transform_11(%arg0: i32) -> (i32, i32) {
    %c0_i32 = arith.constant 0 : i32
    %c0_i32_0 = arith.constant 0 : i32
    %c0_i32_1 = arith.constant 0 : i32
    return %c0_i32, %c0_i32_0 : i32, i32
  }
}

</mosaic_0001>

<bundles_post_ra>
// kernel: model_forward.4
= control target key start
LH: loop header
LB: loop body
LE: loop exit
PB: predicated region body
PF: predicated region fallthrough
CT: control target
= control target key end

     0   :  { %s1358_s21 = smov 0   ;;  %s1360_s22 = smov 0   ;;  %s1657_s0 = inlined_call_operand.vmem [shape: f32[256,128], index: 0, kind: input, shape index: {}]   ;;  %s1658_s1 = inlined_call_operand.vmem [shape: bf16[128,128], index: 1, kind: input, shape index: {}]   ;;  %s1659_s2 = inlined_call_operand.vmem [shape: f32[1,128], index: 2, kind: input, shape index: {}]   ;;  %s1660_s3 = inlined_call_operand.vmem [shape: bf16[128,512], index: 3, kind: input, shape index: {}]   ;;  %s1661_s4 = inlined_call_operand.vmem [shape: f32[1,512], index: 4, kind: input, shape index: {}]   ;;  %s1662_s5 = inlined_call_operand.vmem [shape: bf16[256,128], index: 5, kind: output, shape index: {0}]   ;;  %s1663_s6 = inlined_call_operand.vmem [shape: f32[2,8,512], index: 6, kind: output, shape index: {1}]  }
   0x1   :  { %s1362_s23 = smov 0  }
   0x2 LB: > { %s29_s24 = sadd.s32 1, %s1315_s22  ;;  %p1037_p0 = scmp.ge.s32.totalorder %s1319_s23, 1  ;;  %s1319_s23 = sphi %s1362_s23, %s17_s23   ;;  %s1315_s22 = sphi %s1360_s22, %s1665_s22   ;;  %s1311_s21 = sphi %s1358_s21, %s1664_s21  }
   0x3   : > { %p31_p1 = scmp.ge.s32.totalorder %s29_s24, 2  ;;  %p234_p2 = scmp.lt.s32.totalorder %s1319_s23, 3 }
   0x5   : > { %s1667_s24 = smov (%p31_p1, %s29_s24), 0  ;;  %p235_p3 = pnand %p1037_p0, %p234_p2 }
   0x6   : > { %s1038_s27 = sshll.u32 (!%p235_p3), %s1311_s21, 4  ;;  %p287_p5 = scmp.lt.s32.totalorder (!%p235_p3), %s1311_s21, 1 }
   0x7   : > { %238 = sbr.rel (%p235_p3) target bundleno = 277 (0x115), region = 40  ;;  %p273_p4 = scmp.lt.s32.totalorder (!%p235_p3), %s1038_s27, 31 }
   0xc   : > { %v1241_v0 = vld [vmem:[%s1658_s1 + $0x38] sm:$0xff]   ;;  %v1242_v1 = vld [vmem:[%s1658_s1 + $0x30] sm:$0xff]   ;;  %s1669_s27 = smov (!%p273_p4, %s1038_s27), 31  ;;  %v1321_v2 = vmov 0.0   ;;  %v1243_v3 = vld [vmem:[%s1658_s1 + $0x28] sm:$0xff]   ;;  %v1322_v4 = vmov 0  }
   0xd   : > { %1183 = vmatprep.subr.bf16.mxu0 %v1241_v0  ;;  %297 = vst [vmem:[#allocation2] sm:$0x1] %v1321_v2  ;;  %s1039_s8 = sshll.u32 %s1669_s27, 3  ;;  %862 = vmatprep.mubr.bf16.mxu1 %v1322_v4  ;;  %v1244_v5 = vld [vmem:[%s1658_s1 + $0x20] sm:$0xff]   ;;  %v1245_v13 = vld [vmem:[%s1658_s1 + $0x18] sm:$0xff]   ;;  %v1246_v21 = vld [vmem:[%s1658_s1 + $0x10] sm:$0xff]  }
   0xe   : > { %1184 = vmatpush3.bf16.msra.mxu0 %v1241_v0  ;;  %s1395_s11 = scalar_lea.vmem %s1657_s0, %s1039_s8  ;;  %v1249_v6 = vld [vmem:[%s1660_s3 + $0xe4] ss:$16 sps:$4 sm:$0xff]   ;;  %v1251_v7 = vld [vmem:[%s1660_s3 + $0xe0] ss:$16 sps:$4 sm:$0xff]   ;;  %v1247_v25 = vld [vmem:[%s1658_s1 + $0x8] sm:$0xff]   ;;  %s1041_s14 = sshll.u32 %s1669_s27, 2 }
   0xf   : > { %1185 = vmatprep.subr.bf16.mxu0 %v1242_v1  ;;  %v1407_v8 = vld [vmem:[%s1395_s11] sm:$0xff]  ;;  %v1410_v9 = vld [vmem:[%s1395_s11 + $0x8] sm:$0xff]  ;;  %830 = vmatprep.subr.bf16.mxu1 %v1249_v6  ;;  %v1417_v12 = vld [vmem:[%s1395_s11 + $0x10] sm:$0xff]  ;;  %s1604_s17 = scalar_lea.vmem %s1662_s5, %s1041_s14  ;;  %s1671_s21 = smov (!%p287_p5, %s1311_s21), 1 }
  0x10   : > { %v314_v10 = vpack.c.bf16 %v1410_v9, %v1407_v8  ;;  %v587_v11 = vadd.f32 %v1410_v9, %v1407_v8  ;;  %831 = vmatpush1.bf16.msra.mxu1 %v1251_v7  ;;  %v1423_v14 = vld [vmem:[%s1395_s11 + $0x18] sm:$0xff]  ;;  %v1255_v16 = vld [vmem:[%s1660_s3 + $0xc4] ss:$16 sps:$4 sm:$0xff]   ;;  %v1257_v17 = vld [vmem:[%s1660_s3 + $0xc0] ss:$16 sps:$4 sm:$0xff]   ;;  %s1103_s19 = sshll.u32 %s1671_s21, 5 }
  0x11   : > { %832 = vmatprep.subr.bf16.mxu1 %v1255_v16  ;;  %v1261_v19 = vld [vmem:[%s1660_s3 + $0xa4] ss:$16 sps:$4 sm:$0xff]   ;;  %v1263_v20 = vld [vmem:[%s1660_s3 + $0xa0] ss:$16 sps:$4 sm:$0xff]   ;;  %v1446_v23 = vld [vmem:[%s1395_s11 + $0x28] sm:$0xff]  ;;  %v315_v47 = vpack.c.bf16 %v1423_v14, %v1417_v12  ;;  %s291_s26 = scalar_lea.vmem %s1663_s6, %s1103_s19 }
  0x12   : > { %1186 = vmatpush3.bf16.msra.mxu0 %v1242_v1  ;;  %1199 = vmatprep.mubr.bf16.mxu0 %v314_v10  ;;  %v588_v15 = vadd.f32 %v587_v11, %v1417_v12  ;;  %v1443_v22 = vld [vmem:[%s1395_s11 + $0x20] sm:$0xff]  ;;  %v1453_v26 = vld [vmem:[%s1395_s11 + $0x30] sm:$0xff]  ;;  %v1463_v30 = vld [vmem:[%s1395_s11 + $0x38] sm:$0xff] }
  0x13   : > { %1187 = vmatprep.subr.bf16.mxu0 %v1243_v3  ;;  %v1267_v28 = vld [vmem:[%s1660_s3 + $0x84] ss:$16 sps:$4 sm:$0xff]   ;;  %v1269_v29 = vld [vmem:[%s1660_s3 + $0x80] ss:$16 sps:$4 sm:$0xff]   ;;  %v1480_v37 = vld [vmem:[%s1395_s11 + $0x48] sm:$0xff]  ;;  %v316_v51 = vpack.c.bf16 %v1446_v23, %v1443_v22  ;;  %v317_v0 = vpack.c.bf16 %v1463_v30, %v1453_v26 }
  0x14   : > { %v589_v18 = vadd.f32 %v588_v15, %v1423_v14  ;;  %833 = vmatpush1.bf16.msra.mxu1 %v1257_v17  ;;  %v1273_v32 = vld [vmem:[%s1660_s3 + $0x64] ss:$16 sps:$4 sm:$0xff]   ;;  %v1275_v36 = vld [vmem:[%s1660_s3 + $0x60] ss:$16 sps:$4 sm:$0xff]   ;;  %v1254_v39 = vld [vmem:[%s1660_s3 + $0xec] ss:$16 sps:$4 sm:$0xff]  }
  0x15   : > { %834 = vmatprep.subr.bf16.mxu1 %v1261_v19  ;;  %v1470_v33 = vld [vmem:[%s1395_s11 + $0x40] sm:$0xff]  ;;  %v1487_v40 = vld [vmem:[%s1395_s11 + $0x50] sm:$0xff]  ;;  %v1494_v43 = vld [vmem:[%s1395_s11 + $0x58] sm:$0xff] }
  0x16   : > { %1188 = vmatpush3.bf16.msra.mxu0 %v1243_v3  ;;  %v590_v24 = vadd.f32 %v589_v18, %v1443_v22  ;;  %v1248_v34 = vld [vmem:[%s1658_s1] sm:$0xff]   ;;  %v1252_v48 = vld [vmem:[%s1660_s3 + $0xe8] ss:$16 sps:$4 sm:$0xff]   ;;  %v1260_v49 = vld [vmem:[%s1660_s3 + $0xcc] ss:$16 sps:$4 sm:$0xff]   ;;  %v318_v2 = vpack.c.bf16 %v1480_v37, %v1470_v33  ;;  %v319_v15 = vpack.c.bf16 %v1494_v43, %v1487_v40 }
  0x17   : > { %1189 = vmatprep.subr.bf16.mxu0 %v1244_v5  ;;  %v1279_v41 = vld [vmem:[%s1660_s3 + $0x44] ss:$16 sps:$4 sm:$0xff]   ;;  %v1281_v44 = vld [vmem:[%s1660_s3 + $0x40] ss:$16 sps:$4 sm:$0xff]   ;;  %v1521_v54 = vld [vmem:[%s1395_s11 + $0x68] sm:$0xff] }
  0x18   : > { %835 = vmatpush1.bf16.msra.mxu1 %v1263_v20  ;;  %v591_v27 = vadd.f32 %v590_v24, %v1446_v23  ;;  %v1285_v45 = vld [vmem:[%s1660_s3 + $0x24] ss:$16 sps:$4 sm:$0xff]   ;;  %v1287_v53 = vld [vmem:[%s1660_s3 + $0x20] ss:$16 sps:$4 sm:$0xff]   ;;  %v1258_v58 = vld [vmem:[%s1660_s3 + $0xc8] ss:$16 sps:$4 sm:$0xff]  }
  0x19   : > { %836 = vmatprep.subr.bf16.mxu1 %v1267_v28  ;;  %v1512_v50 = vld [vmem:[%s1395_s11 + $0x60] sm:$0xff]  ;;  %v1528_v57 = vld [vmem:[%s1395_s11 + $0x70] sm:$0xff]  ;;  %v1266_v60 = vld [vmem:[%s1660_s3 + $0xac] ss:$16 sps:$4 sm:$0xff]  }
  0x1a   : > { %1190 = vmatpush3.bf16.msra.mxu0 %v1244_v5  ;;  %v592_v31 = vadd.f32 %v591_v27, %v1453_v26  ;;  %v1291_v56 = vld [vmem:[%s1660_s3 + $0x4] ss:$16 sps:$4 sm:$0xff]   ;;  %v1538_v61 = vld [vmem:[%s1395_s11 + $0x78] sm:$0xff]  ;;  %v1293_v62 = vld [vmem:[%s1660_s3] ss:$16 sps:$4 sm:$0xff]   ;;  %v320_v17 = vpack.c.bf16 %v1521_v54, %v1512_v50 }
  0x1b   : > { %1191 = vmatprep.subr.bf16.mxu0 %v1245_v13  ;;  %v1264_v1 = vld [vmem:[%s1660_s3 + $0xa8] ss:$16 sps:$4 sm:$0xff]   ;;  %v1272_v5 = vld [vmem:[%s1660_s3 + $0x8c] ss:$16 sps:$4 sm:$0xff]  }
  0x1c   : > { %v593_v35 = vadd.f32 %v592_v31, %v1463_v30  ;;  %837 = vmatpush1.bf16.msra.mxu1 %v1269_v29  ;;  %v1270_v7 = vld [vmem:[%s1660_s3 + $0x88] ss:$16 sps:$4 sm:$0xff]   ;;  %v1278_v11 = vld [vmem:[%s1660_s3 + $0x6c] ss:$16 sps:$4 sm:$0xff]   ;;  %v321_v29 = vpack.c.bf16 %v1538_v61, %v1528_v57 }
  0x1d   : > { %838 = vmatprep.subr.bf16.mxu1 %v1273_v32  ;;  %v1276_v16 = vld [vmem:[%s1660_s3 + $0x68] ss:$16 sps:$4 sm:$0xff]   ;;  %v1284_v19 = vld [vmem:[%s1660_s3 + $0x4c] ss:$16 sps:$4 sm:$0xff]  }
  0x1e   : > { %1192 = vmatpush3.bf16.msra.mxu0 %v1245_v13  ;;  %v594_v38 = vadd.f32 %v593_v35, %v1470_v33  ;;  %v1282_v24 = vld [vmem:[%s1660_s3 + $0x48] ss:$16 sps:$4 sm:$0xff]   ;;  %v1290_v27 = vld [vmem:[%s1660_s3 + $0x2c] ss:$16 sps:$4 sm:$0xff]  }
  0x1f   : > { %1193 = vmatprep.subr.bf16.mxu0 %v1246_v21  ;;  %v1288_v31 = vld [vmem:[%s1660_s3 + $0x28] ss:$16 sps:$4 sm:$0xff]   ;;  %v1296_v32 = vld [vmem:[%s1660_s3 + $0xc] ss:$16 sps:$4 sm:$0xff]  }
  0x20   : > { %839 = vmatpush1.bf16.msra.mxu1 %v1275_v36  ;;  %v595_v42 = vadd.f32 %v594_v38, %v1480_v37 }
  0x21   : > { %840 = vmatprep.subr.bf16.mxu1 %v1279_v41  ;;  %v1592_v41 = vld [vmem:[%s1659_s2] ss:$0 sm:$0xff] }
  0x22   : > { %1194 = vmatpush3.bf16.msra.mxu0 %v1246_v21  ;;  %v596_v46 = vadd.f32 %v595_v42, %v1487_v40  ;;  %v586_v21 = vld [vmem:[#allocation2] sm:$0x1] }
  0x23   : > { %1195 = vmatprep.subr.bf16.mxu0 %v1247_v25 }
  0x24   : > { %v597_v52 = vadd.f32 %v596_v46, %v1494_v43  ;;  %841 = vmatpush1.bf16.msra.mxu1 %v1281_v44 }
  0x25   : > { %842 = vmatprep.subr.bf16.mxu1 %v1285_v45 }
  0x26   : > { %1196 = vmatpush3.bf16.msra.mxu0 %v1247_v25  ;;  %v598_v55 = vadd.f32 %v597_v52, %v1512_v50 }
  0x27   : > { %1197 = vmatprep.subr.bf16.mxu0 %v1248_v34 }
  0x28   : > { %v599_v59 = vadd.f32 %v598_v55, %v1521_v54  ;;  %843 = vmatpush1.bf16.msra.mxu1 %v1287_v53 }
  0x29   : > { %844 = vmatprep.subr.bf16.mxu1 %v1291_v56 }
  0x2a   : > { %1198 = vmatpush3.bf16.msra.mxu0 %v1248_v34  ;;  %v600_v63 = vadd.f32 %v599_v59, %v1528_v57  ;;  %v1294_v34 = vld [vmem:[%s1660_s3 + $0x8] ss:$16 sps:$4 sm:$0xff]  }
  0x2b   : > { %871 = vmatprep.subr.bf16.mxu0 %v1254_v39 }
  0x2c   : > { %v601_v3 = vadd.f32 %v600_v63, %v1538_v61  ;;  %845 = vmatpush1.bf16.msra.mxu1 %v1293_v62 }
  0x2d   : > { %1200 = vmatmul.mubr.bf16.vlgmr.msra.gmra.mxu0 %v315_v47 }
  0x2e   : > { %872 = vmatpush1.bf16.msra.mxu0 %v1252_v48  ;;  %1203 = vmatprep.mubr.bf16.mxu0 %v316_v51  ;;  %v602_v6 = vrot.slane %v601_v3, 4 }
  0x2f   : > { %873 = vmatprep.subr.bf16.mxu0 %v1260_v49 }
  0x30   : > { %v603_v10 = vadd.f32 %v602_v6, %v601_v3 }
  0x32   : > { %874 = vmatpush1.bf16.msra.mxu0 %v1258_v58  ;;  %v604_v13 = vrot.slane %v603_v10, 2 }
  0x33   : > { %875 = vmatprep.subr.bf16.mxu0 %v1266_v60 }
  0x34   : > { %v605_v18 = vadd.f32 %v604_v13, %v603_v10 }
  0x35   : > { %1204 = vmatmul.mubr.bf16.gmra.mxu0 %v317_v0 }
  0x36   : > { %876 = vmatpush1.bf16.msra.mxu0 %v1264_v1  ;;  %1207 = vmatprep.mubr.bf16.mxu0 %v318_v2  ;;  %v606_v20 = vrot.slane %v605_v18, 1 }
  0x37   : > { %877 = vmatprep.subr.bf16.mxu0 %v1272_v5 }
  0x38   : > { %v607_v25 = vadd.f32 %v606_v20, %v605_v18 }
  0x3a   : > { %878 = vmatpush1.bf16.msra.mxu0 %v1270_v7  ;;  %v608_v28 = vadd.f32 %v607_v25, %v586_v21  ;;  %v810_v7 = vlaneseq }
  0x3b   : > { %879 = vmatprep.subr.bf16.mxu0 %v1278_v11 }
  0x3c   : > { %609 = vst [vmem:[#allocation2] sm:$0x1] %v608_v28 }
  0x3d   : > { %1208 = vmatmul.mubr.bf16.gmra.mxu0 %v319_v15 }
  0x3e   : > { %880 = vmatpush1.bf16.msra.mxu0 %v1276_v16  ;;  %1211 = vmatprep.mubr.bf16.mxu0 %v320_v17  ;;  %v811_v16 = vshrl.u32 %v810_v7, 7 }
  0x3f   : > { %881 = vmatprep.subr.bf16.mxu0 %v1284_v19 }
  0x40   : > { %v812_v25 = vsub.s32 0, %v811_v16 }
  0x42   : > { %882 = vmatpush1.bf16.msra.mxu0 %v1282_v24 }
  0x43   : > { %883 = vmatprep.subr.bf16.mxu0 %v1290_v27  ;;  %v613_v35 = vld [vmem:[#allocation2] sm:$0x1]  ;;  %v820_v27 = vsub.s32 2, %v811_v16 }
  0x44   : > { %v614_v36 = vmul.f32 0.0078125, %v613_v35 }
  0x45   : > { %1212 = vmatmul.mubr.bf16.gmra.mxu0 %v321_v29 }
  0x46   : > { %884 = vmatpush1.bf16.msra.mxu0 %v1288_v31  ;;  %903 = vmatprep.mubr.bf16.mxu0 %v1322_v4  ;;  %v615_v38 = vpack.c.bf16 %v614_v36, %v614_v36  ;;  %v816_v31 = vsub.s32 1, %v811_v16 }
  0x47   : > { %885 = vmatprep.subr.bf16.mxu0 %v1296_v32  ;;  %v824_v32 = vsub.s32 3, %v811_v16 }
  0x48   : > { %863 = vmatmul.mubr.bf16.vlgmr.msra.gmra.mxu1 %v615_v38 }
  0x4a   : > { %886 = vmatpush1.bf16.msra.mxu0 %v1294_v34 }
  0x4d   : > { %904 = vmatmul.mubr.bf16.vlgmr.msra.gmra.mxu0 %v615_v38 }
  0xed   : > { %v1201_v39 = vpop.f32.mrf.mxu0 }
  0xee   : > { %v436_v44 = vadd.f32 %v1201_v39, %v1592_v41 }
  0xef   : > { %v427_v42 = vpop.f32.mrf.mxu0 }
  0xf0   : > { %v428_v46 = vadd.f32 %v1592_v41, %v427_v42  ;;  %v492_v48 = vsub.f32 %v1417_v12, %v436_v44 }
  0xf1   : > { %v1202_v45 = vpop.f32.mrf.mxu0 }
  0xf2   : > { %v439_v4 = vadd.f32 %v1202_v45, %v1592_v41  ;;  %v490_v53 = vsub.f32 %v1407_v8, %v428_v46 }
  0xf3   : > { %v430_v47 = vpop.f32.mrf.mxu0 }
  0xf4   : > { %v493_v49 = vsub.f32 %v1423_v14, %v439_v4  ;;  %v431_v51 = vadd.f32 %v1592_v41, %v430_v47 }
  0xf5   : > { %v1205_v52 = vpop.f32.mrf.mxu0 }
  0xf6   : > { %v1128_v55 = vpack.c.bf16 %v493_v49, %v492_v48  ;;  %v491_v56 = vsub.f32 %v1410_v9, %v431_v51  ;;  %v452_v14 = vadd.f32 %v1205_v52, %v1592_v41 }
  0xf7   : > { %v443_v58 = vpop.f32.mrf.mxu0 }
  0xf8   : > { %1160 = vst [vmem:[%s1604_s17 + $0x8] sm:$0xff] %v1128_v55   ;;  %v1123_v12 = vpack.c.bf16 %v491_v56, %v490_v53  ;;  %v444_v60 = vadd.f32 %v1592_v41, %v443_v58  ;;  %v496_v0 = vsub.f32 %v1453_v26, %v452_v14 }
  0xf9   : > { %v1206_v59 = vpop.f32.mrf.mxu0 }
  0xfa   : > { %1124 = vst [vmem:[%s1604_s17] sm:$0xff] %v1123_v12   ;;  %v455_v62 = vadd.f32 %v1206_v59, %v1592_v41  ;;  %v494_v2 = vsub.f32 %v1443_v22, %v444_v60 }
  0xfb   : > { %v446_v63 = vpop.f32.mrf.mxu0 }
  0xfc   : > { %v497_v8 = vsub.f32 %v1463_v30, %v455_v62  ;;  %v447_v9 = vadd.f32 %v1592_v41, %v446_v63 }
  0xfd   : > { %v1209_v1 = vpop.f32.mrf.mxu0 }
  0xfe   : > { %v1138_v3 = vpack.c.bf16 %v497_v8, %v496_v0  ;;  %v495_v5 = vsub.f32 %v1446_v23, %v447_v9  ;;  %v468_v11 = vadd.f32 %v1209_v1, %v1592_v41 }
  0xff   : > { %v459_v6 = vpop.f32.mrf.mxu0 }
 0x100   : > { %1162 = vst [vmem:[%s1604_s17 + $0x18] sm:$0xff] %v1138_v3   ;;  %v1133_v10 = vpack.c.bf16 %v495_v5, %v494_v2  ;;  %v460_v26 = vadd.f32 %v1592_v41, %v459_v6  ;;  %v500_v22 = vsub.f32 %v1487_v40, %v468_v11 }
 0x101   : > { %v1210_v13 = vpop.f32.mrf.mxu0 }
 0x102   : > { %1161 = vst [vmem:[%s1604_s17 + $0x10] sm:$0xff] %v1133_v10   ;;  %v471_v30 = vadd.f32 %v1210_v13, %v1592_v41  ;;  %v498_v19 = vsub.f32 %v1470_v33, %v460_v26 }
 0x103   : > { %v462_v15 = vpop.f32.mrf.mxu0 }
 0x104   : > { %v501_v23 = vsub.f32 %v1494_v43, %v471_v30  ;;  %v463_v17 = vadd.f32 %v1592_v41, %v462_v15  ;;  %v648_v43 = vld [vmem:[%s1661_s4] sm:$0xf] }
 0x105   : > { %v1213_v18 = vpop.f32.mrf.mxu0  ;;  %v813_v34 = vrot.slane %v648_v43, %v812_v25  ;;  %v821_v36 = vrot.slane %v648_v43, %v820_v27  ;;  %v817_v44 = vrot.slane %v648_v43, %v816_v31  ;;  %v825_v45 = vrot.slane %v648_v43, %v824_v32 }
 0x106   : > { %v1148_v20 = vpack.c.bf16 %v501_v23, %v500_v22  ;;  %v499_v21 = vsub.f32 %v1480_v37, %v463_v17  ;;  %v484_v40 = vadd.f32 %v1213_v18, %v1592_v41 }
 0x107   : > { %v475_v24 = vpop.f32.mrf.mxu0 }
 0x108   : > { %1164 = vst [vmem:[%s1604_s17 + $0x28] sm:$0xff] %v1148_v20   ;;  %v1143_v28 = vpack.c.bf16 %v499_v21, %v498_v19  ;;  %v476_v33 = vadd.f32 %v1592_v41, %v475_v24  ;;  %v504_v38 = vsub.f32 %v1528_v57, %v484_v40  ;;  %v864_v47 = vpop.f32.mrf.mxu1 }
 0x109   : > { %v1214_v29 = vpop.f32.mrf.mxu0  ;;  %v865_v51 = vadd.f32 %v864_v47, %v813_v34 }
 0x10a   : > { %1163 = vst [vmem:[%s1604_s17 + $0x20] sm:$0xff] %v1143_v28   ;;  %v487_v37 = vadd.f32 %v1214_v29, %v1592_v41  ;;  %v502_v46 = vsub.f32 %v1512_v50, %v476_v33 }
 0x10b   : > { %v478_v35 = vpop.f32.mrf.mxu0  ;;  %v915_v53 = vrot.slane %v865_v51, %v812_v25 }
 0x10c   : > { %v505_v39 = vsub.f32 %v1538_v61, %v487_v37  ;;  %v479_v42 = vadd.f32 %v1592_v41, %v478_v35  ;;  %v866_v61 = vpop.f32.mrf.mxu1 }
 0x10d   : > { %v905_v49 = vpop.f32.mrf.mxu0  ;;  %v867_v55 = vadd.f32 %v866_v61, %v817_v44  ;;  %928 = vst [vmem:[%s291_s26] sm:$0xff] %v915_v53 }
 0x10e   : > { %v1158_v4 = vpack.c.bf16 %v505_v39, %v504_v38  ;;  %v503_v48 = vsub.f32 %v1521_v54, %v479_v42  ;;  %v906_v52 = vadd.f32 %v905_v49, %v821_v36  ;;  %v868_v58 = vpop.f32.mrf.mxu1 }
 0x10f   : > { %v907_v41 = vpop.f32.mrf.mxu0  ;;  %v919_v54 = vrot.slane %v867_v55, %v812_v25 }
 0x110   : > { %1166 = vst [vmem:[%s1604_s17 + $0x38] sm:$0xff] %v1158_v4   ;;  %v1153_v57 = vpack.c.bf16 %v503_v48, %v502_v46  ;;  %v923_v56 = vrot.slane %v906_v52, %v812_v25  ;;  %v908_v50 = vadd.f32 %v907_v41, %v825_v45  ;;  %v869_v59 = vpop.f32.mrf.mxu1 }
 0x111   : > { %v909_v12 = vpop.f32.mrf.mxu0  ;;  %929 = vst [vmem:[%s291_s26 + $0x8] sm:$0xff] %v919_v54 }
 0x112   : > { %1165 = vst [vmem:[%s1604_s17 + $0x30] sm:$0xff] %v1153_v57   ;;  %930 = vst [vmem:[%s291_s26 + $0x10] sm:$0xff] %v923_v56  ;;  %v927_v14 = vrot.slane %v908_v50, %v812_v25 }
 0x113   : > { %v910_v60 = vpop.f32.mrf.mxu0 }
 0x114   : > { %931 = vst [vmem:[%s291_s26 + $0x18] sm:$0xff] %v927_v14 }
 0x115 PF: > { %s17_s23 = sadd.s32 1, %s1319_s23   ;;  %s1664_s21 = smov %s1315_s22 }
 0x116   : > { %p14_p6 = scmp.ge.s32.totalorder %s17_s23, 4   ;;  %s1665_s22 = smov %s1667_s24 }
 0x118   :  { %16 = sbr.rel (!%p14_p6) target bundleno = 2 (0x2), region = 90 }

// kernel: model_forward.5
= control target key start
LH: loop header
LB: loop body
LE: loop exit
PB: predicated region body
PF: predicated region fallthrough
CT: control target
= control target key end

     0   :  { %s1206_s21 = smov 0   ;;  %s1208_s22 = smov 0   ;;  %s1429_s0 = inlined_call_operand.vmem [shape: f32[128,128], index: 0, kind: input, shape index: {}]   ;;  %s1430_s1 = inlined_call_operand.vmem [shape: bf16[128,128], index: 1, kind: input, shape index: {}]   ;;  %s1431_s2 = inlined_call_operand.vmem [shape: f32[1,128], index: 2, kind: input, shape index: {}]   ;;  %s1432_s3 = inlined_call_operand.vmem [shape: bf16[128,512], index: 3, kind: input, shape index: {}]   ;;  %s1433_s4 = inlined_call_operand.vmem [shape: f32[1,512], index: 4, kind: input, shape index: {}]   ;;  %s1434_s5 = inlined_call_operand.vmem [shape: bf16[128,128], index: 5, kind: output, shape index: {0}]   ;;  %s1435_s6 = inlined_call_operand.vmem [shape: f32[2,8,512], index: 6, kind: output, shape index: {1}]  }
   0x1   :  { %s1210_s23 = smov 0  }
   0x2 LB: > { %s29_s24 = sadd.s32 1, %s1163_s22  ;;  %p937_p0 = scmp.ge.s32.totalorder %s1167_s23, 1  ;;  %s1167_s23 = sphi %s1210_s23, %s17_s23   ;;  %s1163_s22 = sphi %s1208_s22, %s1437_s22   ;;  %s1159_s21 = sphi %s1206_s21, %s1436_s21  }
   0x3   : > { %p31_p1 = scmp.ge.s32.totalorder %s29_s24, 2  ;;  %p234_p2 = scmp.lt.s32.totalorder %s1167_s23, 3 }
   0x5   : > { %s1439_s24 = smov (%p31_p1, %s29_s24), 0  ;;  %p235_p3 = pnand %p937_p0, %p234_p2 }
   0x6   : > { %s938_s27 = sshll.u32 (!%p235_p3), %s1159_s21, 3  ;;  %p287_p5 = scmp.lt.s32.totalorder (!%p235_p3), %s1159_s21, 1 }
   0x7   : > { %238 = sbr.rel (%p235_p3) target bundleno = 277 (0x115), region = 40  ;;  %p273_p4 = scmp.lt.s32.totalorder (!%p235_p3), %s938_s27, 15 }
   0xc   : > { %v1089_v0 = vld [vmem:[%s1430_s1 + $0x38] sm:$0xff]   ;;  %v1090_v1 = vld [vmem:[%s1430_s1 + $0x30] sm:$0xff]   ;;  %s1441_s27 = smov (!%p273_p4, %s938_s27), 15  ;;  %v1169_v2 = vmov 0.0   ;;  %v1091_v3 = vld [vmem:[%s1430_s1 + $0x28] sm:$0xff]   ;;  %v1170_v4 = vmov 0  }
   0xd   : > { %1039 = vmatprep.subr.bf16.mxu0 %v1089_v0  ;;  %297 = vst [vmem:[#allocation2] sm:$0x1] %v1169_v2  ;;  %s939_s8 = sshll.u32 %s1441_s27, 3  ;;  %762 = vmatprep.mubr.bf16.mxu1 %v1170_v4  ;;  %v1092_v5 = vld [vmem:[%s1430_s1 + $0x20] sm:$0xff]   ;;  %v1093_v13 = vld [vmem:[%s1430_s1 + $0x18] sm:$0xff]   ;;  %v1094_v18 = vld [vmem:[%s1430_s1 + $0x10] sm:$0xff]  }
   0xe   : > { %1040 = vmatpush3.bf16.msra.mxu0 %v1089_v0  ;;  %v1096_v6 = vld [vmem:[%s1432_s3 + $0xe4] ss:$16 sps:$4 sm:$0xff]   ;;  %s1249_s15 = scalar_lea.vmem %s1429_s0, %s939_s8  ;;  %v1098_v7 = vld [vmem:[%s1432_s3 + $0xe0] ss:$16 sps:$4 sm:$0xff]   ;;  %v1095_v24 = vld [vmem:[%s1430_s1 + $0x8] sm:$0xff]   ;;  %s941_s13 = sshll.u32 %s1441_s27, 2 }
   0xf   : > { %1041 = vmatprep.subr.bf16.mxu0 %v1090_v1  ;;  %730 = vmatprep.subr.bf16.mxu1 %v1096_v6  ;;  %v1100_v8 = vld [vmem:[%s1432_s3 + $0xc4] ss:$16 sps:$4 sm:$0xff]   ;;  %v1261_v10 = vld [vmem:[%s1249_s15 + $0x8] sm:$0xff]  ;;  %v1102_v12 = vld [vmem:[%s1432_s3 + $0xc0] ss:$16 sps:$4 sm:$0xff]   ;;  %s284_s17 = scalar_lea.vmem %s1434_s5, %s941_s13  ;;  %s1443_s21 = smov (!%p287_p5, %s1159_s21), 1 }
  0x10   : > { %731 = vmatpush1.bf16.msra.mxu1 %v1098_v7  ;;  %v1258_v9 = vld [vmem:[%s1249_s15] sm:$0xff]  ;;  %v1274_v15 = vld [vmem:[%s1249_s15 + $0x10] sm:$0xff]  ;;  %v1290_v21 = vld [vmem:[%s1249_s15 + $0x18] sm:$0xff]  ;;  %s995_s18 = sshll.u32 %s1443_s21, 5 }
  0x11   : > { %v306_v11 = vpack.c.bf16 %v1261_v10, %v1258_v9  ;;  %732 = vmatprep.subr.bf16.mxu1 %v1100_v8  ;;  %v495_v14 = vadd.f32 %v1261_v10, %v1258_v9  ;;  %v1106_v16 = vld [vmem:[%s1432_s3 + $0xa4] ss:$16 sps:$4 sm:$0xff]   ;;  %v1108_v17 = vld [vmem:[%s1432_s3 + $0xa0] ss:$16 sps:$4 sm:$0xff]   ;;  %v1315_v30 = vld [vmem:[%s1249_s15 + $0x28] sm:$0xff]  ;;  %v307_v39 = vpack.c.bf16 %v1290_v21, %v1274_v15  ;;  %s291_s25 = scalar_lea.vmem %s1435_s6, %s995_s18 }
  0x12   : > { %1042 = vmatpush3.bf16.msra.mxu0 %v1090_v1  ;;  %v1112_v19 = vld [vmem:[%s1432_s3 + $0x84] ss:$16 sps:$4 sm:$0xff]   ;;  %v1114_v22 = vld [vmem:[%s1432_s3 + $0x80] ss:$16 sps:$4 sm:$0xff]   ;;  %v1105_v32 = vld [vmem:[%s1432_s3 + $0xec] ss:$16 sps:$4 sm:$0xff]  }
  0x13   : > { %1043 = vmatprep.subr.bf16.mxu0 %v1091_v3  ;;  %1055 = vmatprep.mubr.bf16.mxu0 %v306_v11  ;;  %v496_v20 = vadd.f32 %v495_v14, %v1274_v15  ;;  %v1118_v23 = vld [vmem:[%s1432_s3 + $0x64] ss:$16 sps:$4 sm:$0xff]   ;;  %v1120_v26 = vld [vmem:[%s1432_s3 + $0x60] ss:$16 sps:$4 sm:$0xff]   ;;  %v1332_v37 = vld [vmem:[%s1249_s15 + $0x38] sm:$0xff] }
  0x14   : > { %733 = vmatpush1.bf16.msra.mxu1 %v1102_v12  ;;  %v1124_v27 = vld [vmem:[%s1432_s3 + $0x44] ss:$16 sps:$4 sm:$0xff]   ;;  %v1126_v33 = vld [vmem:[%s1432_s3 + $0x40] ss:$16 sps:$4 sm:$0xff]   ;;  %v1103_v41 = vld [vmem:[%s1432_s3 + $0xe8] ss:$16 sps:$4 sm:$0xff]  }
  0x15   : > { %734 = vmatprep.subr.bf16.mxu1 %v1106_v16  ;;  %v497_v25 = vadd.f32 %v496_v20, %v1290_v21  ;;  %v1099_v28 = vld [vmem:[%s1430_s1] sm:$0xff]   ;;  %v1325_v34 = vld [vmem:[%s1249_s15 + $0x30] sm:$0xff]  ;;  %v1111_v44 = vld [vmem:[%s1432_s3 + $0xcc] ss:$16 sps:$4 sm:$0xff]  }
  0x16   : > { %1044 = vmatpush3.bf16.msra.mxu0 %v1091_v3  ;;  %v1312_v29 = vld [vmem:[%s1249_s15 + $0x20] sm:$0xff]  ;;  %v1109_v48 = vld [vmem:[%s1432_s3 + $0xc8] ss:$16 sps:$4 sm:$0xff]   ;;  %v1117_v50 = vld [vmem:[%s1432_s3 + $0xac] ss:$16 sps:$4 sm:$0xff]   ;;  %v309_v52 = vpack.c.bf16 %v1332_v37, %v1325_v34 }
  0x17   : > { %1045 = vmatprep.subr.bf16.mxu0 %v1092_v5  ;;  %v498_v31 = vadd.f32 %v497_v25, %v1312_v29  ;;  %v1130_v36 = vld [vmem:[%s1432_s3 + $0x24] ss:$16 sps:$4 sm:$0xff]   ;;  %v1132_v40 = vld [vmem:[%s1432_s3 + $0x20] ss:$16 sps:$4 sm:$0xff]   ;;  %v308_v42 = vpack.c.bf16 %v1315_v30, %v1312_v29  ;;  %v1115_v53 = vld [vmem:[%s1432_s3 + $0xa8] ss:$16 sps:$4 sm:$0xff]  }
  0x18   : > { %735 = vmatpush1.bf16.msra.mxu1 %v1108_v17  ;;  %v1136_v45 = vld [vmem:[%s1432_s3 + $0x4] ss:$16 sps:$4 sm:$0xff]   ;;  %v1138_v47 = vld [vmem:[%s1432_s3] ss:$16 sps:$4 sm:$0xff]   ;;  %v1123_v55 = vld [vmem:[%s1432_s3 + $0x8c] ss:$16 sps:$4 sm:$0xff]  }
  0x19   : > { %736 = vmatprep.subr.bf16.mxu1 %v1112_v19  ;;  %v499_v35 = vadd.f32 %v498_v31, %v1315_v30  ;;  %v494_v57 = vld [vmem:[#allocation2] sm:$0x1]  ;;  %v1121_v58 = vld [vmem:[%s1432_s3 + $0x88] ss:$16 sps:$4 sm:$0xff]   ;;  %v1129_v60 = vld [vmem:[%s1432_s3 + $0x6c] ss:$16 sps:$4 sm:$0xff]   ;;  %v710_v31 = vlaneseq }
  0x1a   : > { %1046 = vmatpush3.bf16.msra.mxu0 %v1092_v5  ;;  %v1127_v62 = vld [vmem:[%s1432_s3 + $0x68] ss:$16 sps:$4 sm:$0xff]   ;;  %v1135_v63 = vld [vmem:[%s1432_s3 + $0x4c] ss:$16 sps:$4 sm:$0xff]   ;;  %v944_v11 = vld [vmem:[%s1431_s2] ss:$0 sm:$0xff] }
  0x1b   : > { %1047 = vmatprep.subr.bf16.mxu0 %v1093_v13  ;;  %v500_v38 = vadd.f32 %v499_v35, %v1325_v34  ;;  %v1133_v0 = vld [vmem:[%s1432_s3 + $0x48] ss:$16 sps:$4 sm:$0xff]   ;;  %v1141_v1 = vld [vmem:[%s1432_s3 + $0x2c] ss:$16 sps:$4 sm:$0xff]  }
  0x1c   : > { %737 = vmatpush1.bf16.msra.mxu1 %v1114_v22  ;;  %v1139_v3 = vld [vmem:[%s1432_s3 + $0x28] ss:$16 sps:$4 sm:$0xff]   ;;  %v1144_v5 = vld [vmem:[%s1432_s3 + $0xc] ss:$16 sps:$4 sm:$0xff]  }
  0x1d   : > { %738 = vmatprep.subr.bf16.mxu1 %v1118_v23  ;;  %v501_v43 = vadd.f32 %v500_v38, %v1332_v37  ;;  %v1142_v7 = vld [vmem:[%s1432_s3 + $0x8] ss:$16 sps:$4 sm:$0xff]   ;;  %v711_v38 = vshrl.u32 %v710_v31, 7 }
  0x1e   : > { %1048 = vmatpush3.bf16.msra.mxu0 %v1093_v13 }
  0x1f   : > { %1049 = vmatprep.subr.bf16.mxu0 %v1094_v18  ;;  %v502_v46 = vrot.slane %v501_v43, 4 }
  0x20   : > { %739 = vmatpush1.bf16.msra.mxu1 %v1120_v26 }
  0x21   : > { %740 = vmatprep.subr.bf16.mxu1 %v1124_v27  ;;  %v503_v49 = vadd.f32 %v502_v46, %v501_v43 }
  0x22   : > { %1050 = vmatpush3.bf16.msra.mxu0 %v1094_v18 }
  0x23   : > { %1051 = vmatprep.subr.bf16.mxu0 %v1095_v24  ;;  %v504_v51 = vrot.slane %v503_v49, 2 }
  0x24   : > { %741 = vmatpush1.bf16.msra.mxu1 %v1126_v33 }
  0x25   : > { %742 = vmatprep.subr.bf16.mxu1 %v1130_v36  ;;  %v505_v54 = vadd.f32 %v504_v51, %v503_v49 }
  0x26   : > { %1052 = vmatpush3.bf16.msra.mxu0 %v1095_v24 }
  0x27   : > { %1053 = vmatprep.subr.bf16.mxu0 %v1099_v28  ;;  %v506_v56 = vrot.slane %v505_v54, 1 }
  0x28   : > { %743 = vmatpush1.bf16.msra.mxu1 %v1132_v40 }
  0x29   : > { %744 = vmatprep.subr.bf16.mxu1 %v1136_v45  ;;  %v507_v59 = vadd.f32 %v506_v56, %v505_v54 }
  0x2a   : > { %1054 = vmatpush3.bf16.msra.mxu0 %v1099_v28 }
  0x2b   : > { %771 = vmatprep.subr.bf16.mxu0 %v1105_v32  ;;  %v508_v61 = vadd.f32 %v507_v59, %v494_v57 }
  0x2c   : > { %745 = vmatpush1.bf16.msra.mxu1 %v1138_v47 }
  0x2d   : > { %1056 = vmatmul.mubr.bf16.vlgmr.msra.gmra.mxu0 %v307_v39  ;;  %509 = vst [vmem:[#allocation2] sm:$0x1] %v508_v61 }
  0x2e   : > { %772 = vmatpush1.bf16.msra.mxu0 %v1103_v41  ;;  %1059 = vmatprep.mubr.bf16.mxu0 %v308_v42  ;;  %v712_v42 = vsub.s32 0, %v711_v38 }
  0x2f   : > { %773 = vmatprep.subr.bf16.mxu0 %v1111_v44  ;;  %v548_v44 = vld [vmem:[%s1433_s4] sm:$0xf] }
  0x30   : > { %v713_v45 = vrot.slane %v548_v44, %v712_v42 }
  0x32   : > { %774 = vmatpush1.bf16.msra.mxu0 %v1109_v48  ;;  %v724_v48 = vsub.s32 3, %v711_v38 }
  0x33   : > { %775 = vmatprep.subr.bf16.mxu0 %v1117_v50 }
  0x34   : > { %v513_v2 = vld [vmem:[#allocation2] sm:$0x1] }
  0x35   : > { %1060 = vmatmul.mubr.bf16.gmra.mxu0 %v309_v52 }
  0x36   : > { %776 = vmatpush1.bf16.msra.mxu0 %v1115_v53  ;;  %803 = vmatprep.mubr.bf16.mxu0 %v1170_v4  ;;  %v514_v4 = vmul.f32 0.015625, %v513_v2 }
  0x37   : > { %777 = vmatprep.subr.bf16.mxu0 %v1123_v55  ;;  %v725_v55 = vrot.slane %v548_v44, %v724_v48 }
  0x38   : > { %v515_v6 = vpack.c.bf16 %v514_v4, %v514_v4 }
  0x3a   : > { %778 = vmatpush1.bf16.msra.mxu0 %v1121_v58  ;;  %763 = vmatmul.mubr.bf16.vlgmr.msra.gmra.mxu1 %v515_v6 }
  0x3b   : > { %779 = vmatprep.subr.bf16.mxu0 %v1129_v60 }
  0x3e   : > { %780 = vmatpush1.bf16.msra.mxu0 %v1127_v62 }
  0x3f   : > { %781 = vmatprep.subr.bf16.mxu0 %v1135_v63 }
  0x42   : > { %782 = vmatpush1.bf16.msra.mxu0 %v1133_v0 }
  0x43   : > { %783 = vmatprep.subr.bf16.mxu0 %v1141_v1 }
  0x46   : > { %784 = vmatpush1.bf16.msra.mxu0 %v1139_v3 }
  0x47   : > { %785 = vmatprep.subr.bf16.mxu0 %v1144_v5 }
  0x4a   : > { %786 = vmatpush1.bf16.msra.mxu0 %v1142_v7 }
  0x4d   : > { %804 = vmatmul.mubr.bf16.vlgmr.msra.gmra.mxu0 %v515_v6 }
  0xed   : > { %v1057_v8 = vpop.f32.mrf.mxu0 }
  0xee   : > { %v424_v13 = vadd.f32 %v1057_v8, %v944_v11 }
  0xef   : > { %v415_v12 = vpop.f32.mrf.mxu0 }
  0xf0   : > { %v416_v16 = vadd.f32 %v944_v11, %v415_v12  ;;  %v448_v19 = vsub.f32 %v1274_v15, %v424_v13 }
  0xf1   : > { %v1058_v14 = vpop.f32.mrf.mxu0 }
  0xf2   : > { %v427_v17 = vadd.f32 %v1058_v14, %v944_v11  ;;  %v446_v24 = vsub.f32 %v1258_v9, %v416_v16 }
  0xf3   : > { %v418_v18 = vpop.f32.mrf.mxu0 }
  0xf4   : > { %v449_v20 = vsub.f32 %v1290_v21, %v427_v17  ;;  %v419_v22 = vadd.f32 %v944_v11, %v418_v18 }
  0xf5   : > { %v1061_v23 = vpop.f32.mrf.mxu0 }
  0xf6   : > { %v1012_v25 = vpack.c.bf16 %v449_v20, %v448_v19  ;;  %v447_v26 = vsub.f32 %v1261_v10, %v419_v22  ;;  %v440_v27 = vadd.f32 %v1061_v23, %v944_v11 }
  0xf7   : > { %v431_v28 = vpop.f32.mrf.mxu0 }
  0xf8   : > { %1024 = vst [vmem:[%s284_s17 + $0x8] sm:$0xff] %v1012_v25   ;;  %v1007_v32 = vpack.c.bf16 %v447_v26, %v446_v24  ;;  %v432_v15 = vadd.f32 %v944_v11, %v431_v28  ;;  %v452_v21 = vsub.f32 %v1325_v34, %v440_v27  ;;  %v716_v34 = vsub.s32 1, %v711_v38 }
  0xf9   : > { %v1062_v33 = vpop.f32.mrf.mxu0 }
  0xfa   : > { %1008 = vst [vmem:[%s284_s17] sm:$0xff] %v1007_v32   ;;  %v443_v35 = vadd.f32 %v1062_v33, %v944_v11  ;;  %v450_v9 = vsub.f32 %v1312_v29, %v432_v15  ;;  %v717_v29 = vrot.slane %v548_v44, %v716_v34  ;;  %v764_v46 = vpop.f32.mrf.mxu1 }
  0xfb   : > { %v434_v36 = vpop.f32.mrf.mxu0  ;;  %v765_v47 = vadd.f32 %v764_v46, %v713_v45 }
  0xfc   : > { %v453_v39 = vsub.f32 %v1332_v37, %v443_v35  ;;  %v435_v10 = vadd.f32 %v944_v11, %v434_v36  ;;  %v720_v37 = vsub.s32 2, %v711_v38 }
  0xfd   : > { %v815_v49 = vrot.slane %v765_v47, %v712_v42 }
  0xfe   : > { %v1022_v40 = vpack.c.bf16 %v453_v39, %v452_v21  ;;  %v451_v41 = vsub.f32 %v1315_v30, %v435_v10  ;;  %v766_v30 = vpop.f32.mrf.mxu1  ;;  %v721_v52 = vrot.slane %v548_v44, %v720_v37 }
  0xff   : > { %v767_v50 = vadd.f32 %v766_v30, %v717_v29  ;;  %828 = vst [vmem:[%s291_s25] sm:$0xff] %v815_v49 }
 0x100   : > { %1026 = vst [vmem:[%s284_s17 + $0x18] sm:$0xff] %v1022_v40   ;;  %v1017_v43 = vpack.c.bf16 %v451_v41, %v450_v9  ;;  %v768_v51 = vpop.f32.mrf.mxu1 }
 0x101   : > { %v819_v53 = vrot.slane %v767_v50, %v712_v42 }
 0x102   : > { %1025 = vst [vmem:[%s284_s17 + $0x10] sm:$0xff] %v1017_v43   ;;  %v769_v54 = vpop.f32.mrf.mxu1 }
 0x103   : > { %829 = vst [vmem:[%s291_s25 + $0x8] sm:$0xff] %v819_v53 }
 0x10d   : > { %v805_v56 = vpop.f32.mrf.mxu0 }
 0x10e   : > { %v806_v57 = vadd.f32 %v805_v56, %v721_v52 }
 0x10f   : > { %v807_v58 = vpop.f32.mrf.mxu0 }
 0x110   : > { %v823_v59 = vrot.slane %v806_v57, %v712_v42  ;;  %v808_v60 = vadd.f32 %v807_v58, %v725_v55 }
 0x111   : > { %v809_v61 = vpop.f32.mrf.mxu0 }
 0x112   : > { %830 = vst [vmem:[%s291_s25 + $0x10] sm:$0xff] %v823_v59  ;;  %v827_v62 = vrot.slane %v808_v60, %v712_v42 }
 0x113   : > { %v810_v63 = vpop.f32.mrf.mxu0 }
 0x114   : > { %831 = vst [vmem:[%s291_s25 + $0x18] sm:$0xff] %v827_v62 }
 0x115 PF: > { %s17_s23 = sadd.s32 1, %s1167_s23   ;;  %s1436_s21 = smov %s1163_s22 }
 0x116   : > { %p14_p6 = scmp.ge.s32.totalorder %s17_s23, 4   ;;  %s1437_s22 = smov %s1439_s24 }
 0x118   :  { %16 = sbr.rel (!%p14_p6) target bundleno = 2 (0x2), region = 90 }

// kernel: model_forward.6
= control target key start
LH: loop header
LB: loop body
LE: loop exit
PB: predicated region body
PF: predicated region fallthrough
CT: control target
= control target key end

     0   :  { %s1594_s21 = smov 0   ;;  %s1596_s22 = smov 0   ;;  %s1984_s0 = inlined_call_operand.vmem [shape: f32[32,256], index: 0, kind: input, shape index: {}]   ;;  %s1985_s1 = inlined_call_operand.vmem [shape: bf16[256,256], index: 1, kind: input, shape index: {}]   ;;  %s1986_s2 = inlined_call_operand.vmem [shape: f32[1,256], index: 2, kind: input, shape index: {}]   ;;  %s1987_s3 = inlined_call_operand.vmem [shape: bf16[256,512], index: 3, kind: input, shape index: {}]   ;;  %s1988_s4 = inlined_call_operand.vmem [shape: f32[1,512], index: 4, kind: input, shape index: {}]   ;;  %s1989_s5 = inlined_call_operand.vmem [shape: bf16[32,256], index: 5, kind: output, shape index: {0}]   ;;  %s1990_s6 = inlined_call_operand.vmem [shape: f32[2,8,512], index: 6, kind: output, shape index: {1}]  }
   0x1   :  { %s1598_s23 = smov 0  }
   0x2 LB: > { %s29_s24 = sadd.s32 1, %s1551_s22  ;;  %p1249_p0 = scmp.ge.s32.totalorder %s1555_s23, 1  ;;  %s1555_s23 = sphi %s1598_s23, %s17_s23   ;;  %s1551_s22 = sphi %s1596_s22, %s1994_s22   ;;  %s1547_s21 = sphi %s1594_s21, %s1993_s21  }
   0x3   : > { %p31_p1 = scmp.ge.s32.totalorder %s29_s24, 2  ;;  %p235_p2 = scmp.lt.s32.totalorder %s1555_s23, 3 }
   0x5   : > { %s1996_s24 = smov (%p31_p1, %s29_s24), 0  ;;  %p236_p3 = pnand %p1249_p0, %p235_p2 }
   0x6   : > { %s1250_s11 = sshll.u32 (!%p236_p3), %s1547_s21, 1  ;;  %p292_p5 = scmp.lt.s32.totalorder (!%p236_p3), %s1547_s21, 1 }
   0x7   : > { %239 = sbr.rel (%p236_p3) target bundleno = 341 (0x155), region = 40  ;;  %p276_p4 = scmp.lt.s32.totalorder (!%p236_p3), %s1250_s11, 3 }
   0xc   : > { %v1389_v0 = vld [vmem:[%s1985_s1 + $0x74] ss:$8 sps:$4 sm:$0xff]   ;;  %v301_v1 = vlaneseq  ;;  %v1391_v2 = vld [vmem:[%s1985_s1 + $0x70] ss:$8 sps:$4 sm:$0xff]   ;;  %v1392_v3 = vld [vmem:[%s1985_s1 + $0x64] ss:$8 sps:$4 sm:$0xff]  }
   0xd   : > { %516 = vmatprep.subr.bf16.mxu0 %v1389_v0  ;;  %v1394_v5 = vld [vmem:[%s1985_s1 + $0x60] ss:$8 sps:$4 sm:$0xff]   ;;  %v1557_v6 = vmov 0.0   ;;  %v1395_v7 = vld [vmem:[%s1985_s1 + $0x54] ss:$8 sps:$4 sm:$0xff]   ;;  %s1998_s11 = smov (!%p276_p4, %s1250_s11), 3 }
   0xe   : > { %vm1624_vm0 = vcmp.lt.s32.totalorder %v301_v1, 256  ;;  %517 = vmatpush1.bf16.msra.mxu0 %v1391_v2  ;;  %v1397_v8 = vld [vmem:[%s1985_s1 + $0x50] ss:$8 sps:$4 sm:$0xff]   ;;  %v1398_v9 = vld [vmem:[%s1985_s1 + $0x44] ss:$8 sps:$4 sm:$0xff]   ;;  %s1358_s28 = sshll.u32 %s1998_s11, 4 }
   0xf   : > { %305 = vst.msk [vmem:[#allocation2] sm:$0x3] %vm1624_vm0, %v1557_v6  ;;  %518 = vmatprep.subr.bf16.mxu0 %v1392_v3  ;;  %v1400_v10 = vld [vmem:[%s1985_s1 + $0x40] ss:$8 sps:$4 sm:$0xff]   ;;  %v1401_v11 = vld [vmem:[%s1985_s1 + $0x34] ss:$8 sps:$4 sm:$0xff]   ;;  %s280_s14 = scalar_lea.vmem %s1984_s0, %s1358_s28 }
  0x10   : > { %v1403_v12 = vld [vmem:[%s1985_s1 + $0x30] ss:$8 sps:$4 sm:$0xff]   ;;  %v1404_v13 = vld [vmem:[%s1985_s1 + $0x24] ss:$8 sps:$4 sm:$0xff]   ;;  %v1406_v14 = vld [vmem:[%s1985_s1 + $0x20] ss:$8 sps:$4 sm:$0xff]  }
  0x11   : > { %v1407_v15 = vld [vmem:[%s1985_s1 + $0x14] ss:$8 sps:$4 sm:$0xff]   ;;  %v1436_v17 = vld [vmem:[%s1987_s3 + $0xe0] ss:$16 sps:$4 sm:$0xff]   ;;  %v1679_v20 = vld [vmem:[%s280_s14 + $0x8] sm:$0xff]  ;;  %v1730_v48 = vshrl.u32 %v301_v1, 7 }
  0x12   : > { %519 = vmatpush1.bf16.msra.mxu0 %v1394_v5  ;;  %v1434_v16 = vld [vmem:[%s1987_s3 + $0xe4] ss:$16 sps:$4 sm:$0xff]   ;;  %v1409_v18 = vld [vmem:[%s1985_s1 + $0x10] ss:$8 sps:$4 sm:$0xff]   ;;  %v1412_v28 = vld [vmem:[%s1985_s1] ss:$8 sps:$4 sm:$0xff]  }
  0x13   : > { %520 = vmatprep.subr.bf16.mxu0 %v1395_v7  ;;  %1040 = vmatprep.subr.bf16.mxu1 %v1434_v16  ;;  %v1440_v19 = vld [vmem:[%s1987_s3 + $0xc4] ss:$16 sps:$4 sm:$0xff]   ;;  %v1684_v22 = vld [vmem:[%s280_s14 + $0x18] sm:$0xff]  ;;  %v1442_v23 = vld [vmem:[%s1987_s3 + $0xc0] ss:$16 sps:$4 sm:$0xff]   ;;  %s1359_s9 = sshll.u32 %s1998_s11, 3 }
  0x14   : > { %1041 = vmatpush1.bf16.msra.mxu1 %v1436_v17  ;;  %v1410_v21 = vld [vmem:[%s1985_s1 + $0x4] ss:$8 sps:$4 sm:$0xff]   ;;  %v311_v24 = vpack.c.bf16 %v1684_v22, %v1679_v20  ;;  %v585_v25 = vadd.f32 %v1684_v22, %v1679_v20  ;;  %v1695_v27 = vld [vmem:[%s280_s14 + $0x10] sm:$0xff]  ;;  %v1558_v38 = vmov 1966171168   ;;  %s289_s13 = scalar_lea.vmem %s1989_s5, %s1359_s9  ;;  %s2000_s21 = smov (!%p292_p5, %s1547_s21), 1 }
  0x15   : > { %1042 = vmatprep.subr.bf16.mxu1 %v1440_v19  ;;  %v1693_v26 = vld [vmem:[%s280_s14] sm:$0xff]  ;;  %v1413_v29 = vld [vmem:[%s1985_s1 + $0xf4] ss:$8 sps:$4 sm:$0xff]   ;;  %v1415_v36 = vld [vmem:[%s1985_s1 + $0xf0] ss:$8 sps:$4 sm:$0xff]   ;;  %v596_v39 = vunpack.c.l.s4 %v1558_v38  ;;  %s1360_s15 = sshll.u32 %s2000_s21, 5 }
  0x16   : > { %521 = vmatpush1.bf16.msra.mxu0 %v1397_v8  ;;  %v578_v30 = vadd.f32 %v1695_v27, %v1693_v26  ;;  %548 = vmatprep.mubr.bf16.mxu0 %v311_v24  ;;  %v586_v31 = vrot.slane %v585_v25, 4  ;;  %v1446_v32 = vld [vmem:[%s1987_s3 + $0xa4] ss:$16 sps:$4 sm:$0xff]   ;;  %v1448_v34 = vld [vmem:[%s1987_s3 + $0xa0] ss:$16 sps:$4 sm:$0xff]   ;;  %s296_s18 = scalar_lea.vmem %s1990_s6, %s1360_s15 }
  0x17   : > { %522 = vmatprep.subr.bf16.mxu0 %v1398_v9  ;;  %v1452_v40 = vld [vmem:[%s1987_s3 + $0x84] ss:$16 sps:$4 sm:$0xff]   ;;  %v1454_v44 = vld [vmem:[%s1987_s3 + $0x80] ss:$16 sps:$4 sm:$0xff]   ;;  %v597_v50 = vunpack.c.0.s8 %v596_v39  ;;  %v1457_v38 = vld [vmem:[%s1987_s3 + $0xac] ss:$16 sps:$4 sm:$0xff]  }
  0x18   : > { %1043 = vmatpush1.bf16.msra.mxu1 %v1442_v23  ;;  %v579_v33 = vrot.slane %v578_v30, 4  ;;  %v587_v35 = vadd.f32 %v586_v31, %v585_v25  ;;  %v1416_v41 = vld [vmem:[%s1985_s1 + $0xe4] ss:$8 sps:$4 sm:$0xff]   ;;  %v1418_v47 = vld [vmem:[%s1985_s1 + $0xe0] ss:$8 sps:$4 sm:$0xff]   ;;  %v1825_v31 = vsub.s32 1, %v1730_v48 }
  0x19   : > { %1044 = vmatprep.subr.bf16.mxu1 %v1446_v32  ;;  %v1458_v46 = vld [vmem:[%s1987_s3 + $0x64] ss:$16 sps:$4 sm:$0xff]   ;;  %v1460_v54 = vld [vmem:[%s1987_s3 + $0x60] ss:$16 sps:$4 sm:$0xff]   ;;  %v600_v59 = vsub.s32 %v597_v50, %v1730_v48  ;;  %v1445_v23 = vld [vmem:[%s1987_s3 + $0xec] ss:$16 sps:$4 sm:$0xff]  }
  0x1a   : > { %523 = vmatpush1.bf16.msra.mxu0 %v1400_v10  ;;  %v580_v37 = vadd.f32 %v579_v33, %v578_v30  ;;  %v588_v42 = vrot.slane %v587_v35, 2  ;;  %v1419_v51 = vld [vmem:[%s1985_s1 + $0xd4] ss:$8 sps:$4 sm:$0xff]   ;;  %v1421_v57 = vld [vmem:[%s1985_s1 + $0xd0] ss:$8 sps:$4 sm:$0xff]  }
  0x1b   : > { %524 = vmatprep.subr.bf16.mxu0 %v1401_v11  ;;  %v1464_v56 = vld [vmem:[%s1987_s3 + $0x44] ss:$16 sps:$4 sm:$0xff]   ;;  %v1466_v62 = vld [vmem:[%s1987_s3 + $0x40] ss:$16 sps:$4 sm:$0xff]   ;;  %v1451_v30 = vld [vmem:[%s1987_s3 + $0xcc] ss:$16 sps:$4 sm:$0xff]  }
  0x1c   : > { %v581_v43 = vrot.slane %v580_v37, 2  ;;  %1045 = vmatpush1.bf16.msra.mxu1 %v1448_v34  ;;  %v589_v45 = vadd.f32 %v588_v42, %v587_v35  ;;  %v1422_v60 = vld [vmem:[%s1985_s1 + $0xc4] ss:$8 sps:$4 sm:$0xff]   ;;  %v1424_v0 = vld [vmem:[%s1985_s1 + $0xc0] ss:$8 sps:$4 sm:$0xff]  }
  0x1d   : > { %1046 = vmatprep.subr.bf16.mxu1 %v1452_v40  ;;  %v1470_v63 = vld [vmem:[%s1987_s3 + $0x24] ss:$16 sps:$4 sm:$0xff]   ;;  %v577_v3 = vld [vmem:[#allocation2] sm:$0x3]  ;;  %v1427_v8 = vld [vmem:[%s1985_s1 + $0xb0] ss:$8 sps:$4 sm:$0xff]  }
  0x1e   : > { %525 = vmatpush1.bf16.msra.mxu0 %v1403_v12  ;;  %v582_v49 = vadd.f32 %v581_v43, %v580_v37  ;;  %v590_v52 = vrot.slane %v589_v45, 1  ;;  %v1425_v1 = vld [vmem:[%s1985_s1 + $0xb4] ss:$8 sps:$4 sm:$0xff]   ;;  %v1472_v6 = vld [vmem:[%s1987_s3 + $0x20] ss:$16 sps:$4 sm:$0xff]  }
  0x1f   : > { %526 = vmatprep.subr.bf16.mxu0 %v1404_v13  ;;  %v1476_v7 = vld [vmem:[%s1987_s3 + $0x4] ss:$16 sps:$4 sm:$0xff]   ;;  %v1478_v11 = vld [vmem:[%s1987_s3] ss:$16 sps:$4 sm:$0xff]   ;;  %v1455_v42 = vld [vmem:[%s1987_s3 + $0xa8] ss:$16 sps:$4 sm:$0xff]  }
  0x20   : > { %v583_v53 = vrot.slane %v582_v49, 1  ;;  %1047 = vmatpush1.bf16.msra.mxu1 %v1454_v44  ;;  %v591_v55 = vadd.f32 %v590_v52, %v589_v45  ;;  %v1428_v10 = vld [vmem:[%s1985_s1 + $0xa4] ss:$8 sps:$4 sm:$0xff]   ;;  %v1430_v13 = vld [vmem:[%s1985_s1 + $0xa0] ss:$8 sps:$4 sm:$0xff]  }
  0x21   : > { %1048 = vmatprep.subr.bf16.mxu1 %v1458_v46  ;;  %v1482_v12 = vld [vmem:[%s1987_s3 + $0x1e4] ss:$16 sps:$4 sm:$0xff]   ;;  %v1433_v16 = vld [vmem:[%s1985_s1 + $0x90] ss:$8 sps:$4 sm:$0xff]   ;;  %v1463_v43 = vld [vmem:[%s1987_s3 + $0x8c] ss:$16 sps:$4 sm:$0xff]  }
  0x22   : > { %527 = vmatpush1.bf16.msra.mxu0 %v1406_v14  ;;  %v584_v58 = vadd.f32 %v583_v53, %v582_v49  ;;  %v1431_v4 = vld [vmem:[%s1985_s1 + $0x94] ss:$8 sps:$4 sm:$0xff]   ;;  %v1484_v14 = vld [vmem:[%s1987_s3 + $0x1e0] ss:$16 sps:$4 sm:$0xff]   ;;  %v1437_v17 = vld [vmem:[%s1985_s1 + $0x84] ss:$8 sps:$4 sm:$0xff]  }
  0x23   : > { %528 = vmatprep.subr.bf16.mxu0 %v1407_v15  ;;  %v1488_v15 = vld [vmem:[%s1987_s3 + $0x1c4] ss:$16 sps:$4 sm:$0xff]   ;;  %v1496_v24 = vld [vmem:[%s1987_s3 + $0x1a0] ss:$16 sps:$4 sm:$0xff]   ;;  %v1461_v46 = vld [vmem:[%s1987_s3 + $0x88] ss:$16 sps:$4 sm:$0xff]  }
  0x24   : > { %v594_v61 = vcombine.low %v584_v58, %v591_v55  ;;  %1049 = vmatpush1.bf16.msra.mxu1 %v1460_v54  ;;  %v1494_v19 = vld [vmem:[%s1987_s3 + $0x1a4] ss:$16 sps:$4 sm:$0xff]   ;;  %v1502_v32 = vld [vmem:[%s1987_s3 + $0x180] ss:$16 sps:$4 sm:$0xff]   ;;  %v1469_v49 = vld [vmem:[%s1987_s3 + $0x6c] ss:$16 sps:$4 sm:$0xff]  }
  0x25   : > { %1050 = vmatprep.subr.bf16.mxu1 %v1464_v56  ;;  %v1500_v25 = vld [vmem:[%s1987_s3 + $0x184] ss:$16 sps:$4 sm:$0xff]   ;;  %v1508_v39 = vld [vmem:[%s1987_s3 + $0x160] ss:$16 sps:$4 sm:$0xff]   ;;  %v1467_v52 = vld [vmem:[%s1987_s3 + $0x68] ss:$16 sps:$4 sm:$0xff]  }
  0x26   : > { %529 = vmatpush1.bf16.msra.mxu0 %v1409_v18  ;;  %v601_v2 = vrot.slane %v594_v61, %v600_v59  ;;  %v1490_v18 = vld [vmem:[%s1987_s3 + $0x1c0] ss:$16 sps:$4 sm:$0xff]   ;;  %v1506_v34 = vld [vmem:[%s1987_s3 + $0x164] ss:$16 sps:$4 sm:$0xff]   ;;  %v1475_v54 = vld [vmem:[%s1987_s3 + $0x4c] ss:$16 sps:$4 sm:$0xff]  }
  0x27   : > { %530 = vmatprep.subr.bf16.mxu0 %v1410_v21  ;;  %v1439_v21 = vld [vmem:[%s1985_s1 + $0x80] ss:$8 sps:$4 sm:$0xff]   ;;  %v1512_v40 = vld [vmem:[%s1987_s3 + $0x144] ss:$16 sps:$4 sm:$0xff]   ;;  %v1481_v58 = vld [vmem:[%s1987_s3 + $0x2c] ss:$16 sps:$4 sm:$0xff]  }
  0x28   : > { %v608_v5 = vrot.slane %v601_v2, %v600_v59  ;;  %1051 = vmatpush1.bf16.msra.mxu1 %v1466_v62  ;;  %v1514_v44 = vld [vmem:[%s1987_s3 + $0x140] ss:$16 sps:$4 sm:$0xff]   ;;  %v1518_v45 = vld [vmem:[%s1987_s3 + $0x124] ss:$16 sps:$4 sm:$0xff]   ;;  %v1473_v56 = vld [vmem:[%s1987_s3 + $0x48] ss:$16 sps:$4 sm:$0xff]  }
  0x29   : > { %1052 = vmatprep.subr.bf16.mxu1 %v1470_v63  ;;  %v1520_v50 = vld [vmem:[%s1987_s3 + $0x120] ss:$16 sps:$4 sm:$0xff]   ;;  %v1479_v59 = vld [vmem:[%s1987_s3 + $0x28] ss:$16 sps:$4 sm:$0xff]   ;;  %v1493_v62 = vld [vmem:[%s1987_s3 + $0x1ec] ss:$16 sps:$4 sm:$0xff]  }
  0x2a   : > { %531 = vmatpush1.bf16.msra.mxu0 %v1412_v28  ;;  %v610_v9 = vadd.f32 %v608_v5, %v577_v3  ;;  %v310_v28 = vpack.c.bf16 %v1695_v27, %v1693_v26  ;;  %v1526_v55 = vld [vmem:[%s1987_s3 + $0x100] ss:$16 sps:$4 sm:$0xff]   ;;  %v1485_v61 = vld [vmem:[%s1987_s3 + $0x8] ss:$16 sps:$4 sm:$0xff]   ;;  %v1505_v2 = vld [vmem:[%s1987_s3 + $0x1ac] ss:$16 sps:$4 sm:$0xff]  }
  0x2b   : > { %532 = vmatprep.subr.bf16.mxu0 %v1413_v29  ;;  %v1443_v29 = vld [vmem:[%s1987_s3 + $0xe8] ss:$16 sps:$4 sm:$0xff]   ;;  %v1511_v5 = vld [vmem:[%s1987_s3 + $0x18c] ss:$16 sps:$4 sm:$0xff]  }
  0x2c   : > { %615 = vst.msk [vmem:[#allocation2] sm:$0x3] %vm1624_vm0, %v610_v9  ;;  %1053 = vmatpush1.bf16.msra.mxu1 %v1472_v6  ;;  %v1491_v63 = vld [vmem:[%s1987_s3 + $0x1e8] ss:$16 sps:$4 sm:$0xff]   ;;  %v1523_v9 = vld [vmem:[%s1987_s3 + $0x14c] ss:$16 sps:$4 sm:$0xff]  }
  0x2d   : > { %1054 = vmatprep.subr.bf16.mxu1 %v1476_v7  ;;  %v1503_v3 = vld [vmem:[%s1987_s3 + $0x1a8] ss:$16 sps:$4 sm:$0xff]   ;;  %v1517_v7 = vld [vmem:[%s1987_s3 + $0x16c] ss:$16 sps:$4 sm:$0xff]  }
  0x2e   : > { %533 = vmatpush2.bf16.msra.mxu0 %v1415_v36  ;;  %v1449_v36 = vld [vmem:[%s1987_s3 + $0xc8] ss:$16 sps:$4 sm:$0xff]  }
  0x2f   : > { %534 = vmatprep.subr.bf16.mxu0 %v1416_v41  ;;  %v1509_v6 = vld [vmem:[%s1987_s3 + $0x188] ss:$16 sps:$4 sm:$0xff]  }
  0x30   : > { %1055 = vmatpush1.bf16.msra.mxu1 %v1478_v11  ;;  %v1529_v11 = vld [vmem:[%s1987_s3 + $0x12c] ss:$16 sps:$4 sm:$0xff]  }
  0x31   : > { %1056 = vmatprep.subr.bf16.mxu1 %v1482_v12  ;;  %v1527_v12 = vld [vmem:[%s1987_s3 + $0x128] ss:$16 sps:$4 sm:$0xff]  }
  0x32   : > { %535 = vmatpush2.bf16.msra.mxu0 %v1418_v47  ;;  %v1862_v47 = vsub.s32 0, %v1730_v48 }
  0x33   : > { %536 = vmatprep.subr.bf16.mxu0 %v1419_v51  ;;  %v619_v33 = vld [vmem:[#allocation2] sm:$0x3]  ;;  %v1524_v51 = vld [vmem:[%s1987_s3 + $0x104] ss:$16 sps:$4 sm:$0xff]  }
  0x34   : > { %1057 = vmatpush2.bf16.msra.mxu1 %v1484_v14  ;;  %v620_v35 = vmul.f32 0.0625, %v619_v33  ;;  %v344_v14 = vld [vmem:[%s1986_s2] sm:$0x3] }
  0x35   : > { %1058 = vmatprep.subr.bf16.mxu1 %v1488_v15  ;;  %v349_v15 = vrot.slane %v344_v14, %v1862_v47 }
  0x36   : > { %537 = vmatpush2.bf16.msra.mxu0 %v1421_v57  ;;  %v629_v37 = vrot.slane %v620_v35, %v1825_v31  ;;  %v625_v53 = vrot.slane %v620_v35, %v1862_v47 }
  0x37   : > { %538 = vmatprep.subr.bf16.mxu0 %v1422_v60  ;;  %v1487_v60 = vld [vmem:[%s1987_s3 + $0xc] ss:$16 sps:$4 sm:$0xff]  }
  0x38   : > { %1059 = vmatpush2.bf16.msra.mxu1 %v1490_v18  ;;  %v633_v41 = vpack.c.bf16 %v629_v37, %v629_v37  ;;  %v632_v57 = vpack.c.bf16 %v625_v53, %v625_v53 }
  0x39   : > { %1060 = vmatprep.subr.bf16.mxu1 %v1494_v19 }
  0x3a   : > { %539 = vmatpush2.bf16.msra.mxu0 %v1424_v0  ;;  %1072 = vmatprep.mubr.bf16.mxu1 %v633_v41  ;;  %v1499_v0 = vld [vmem:[%s1987_s3 + $0x1cc] ss:$16 sps:$4 sm:$0xff]  }
  0x3b   : > { %540 = vmatprep.subr.bf16.mxu0 %v1425_v1  ;;  %v1497_v1 = vld [vmem:[%s1987_s3 + $0x1c8] ss:$16 sps:$4 sm:$0xff]  }
  0x3c   : > { %1061 = vmatpush2.bf16.msra.mxu1 %v1496_v24 }
  0x3d   : > { %1062 = vmatprep.subr.bf16.mxu1 %v1500_v25 }
  0x3e   : > { %541 = vmatpush2.bf16.msra.mxu0 %v1427_v8  ;;  %v1515_v8 = vld [vmem:[%s1987_s3 + $0x168] ss:$16 sps:$4 sm:$0xff]  }
  0x3f   : > { %542 = vmatprep.subr.bf16.mxu0 %v1428_v10  ;;  %v1521_v10 = vld [vmem:[%s1987_s3 + $0x148] ss:$16 sps:$4 sm:$0xff]  }
  0x40   : > { %1063 = vmatpush2.bf16.msra.mxu1 %v1502_v32 }
  0x41   : > { %1064 = vmatprep.subr.bf16.mxu1 %v1506_v34 }
  0x42   : > { %543 = vmatpush2.bf16.msra.mxu0 %v1430_v13  ;;  %v1532_v13 = vld [vmem:[%s1987_s3 + $0x10c] ss:$16 sps:$4 sm:$0xff]  }
  0x43   : > { %544 = vmatprep.subr.bf16.mxu0 %v1431_v4  ;;  %v1530_v4 = vld [vmem:[%s1987_s3 + $0x108] ss:$16 sps:$4 sm:$0xff]  }
  0x44   : > { %1065 = vmatpush2.bf16.msra.mxu1 %v1508_v39 }
  0x45   : > { %1066 = vmatprep.subr.bf16.mxu1 %v1512_v40 }
  0x46   : > { %545 = vmatpush2.bf16.msra.mxu0 %v1433_v16  ;;  %v353_v16 = vrot.slane %v344_v14, %v1825_v31 }
  0x47   : > { %546 = vmatprep.subr.bf16.mxu0 %v1437_v17 }
  0x48   : > { %1067 = vmatpush2.bf16.msra.mxu1 %v1514_v44 }
  0x49   : > { %1068 = vmatprep.subr.bf16.mxu1 %v1518_v45 }
  0x4a   : > { %547 = vmatpush2.bf16.msra.mxu0 %v1439_v21 }
  0x4b   : > { %1081 = vmatprep.subr.bf16.mxu0 %v1445_v23 }
  0x4c   : > { %1069 = vmatpush2.bf16.msra.mxu1 %v1520_v50 }
  0x4d   : > { %549 = vmatmul.mubr.bf16.vlgmr.msra.gmra.mxu0 %v310_v28  ;;  %1070 = vmatprep.subr.bf16.mxu1 %v1524_v51 }
  0x4e   : > { %1082 = vmatpush1.bf16.msra.mxu0 %v1443_v29  ;;  %1113 = vmatprep.mubr.bf16.mxu0 %v633_v41 }
  0x4f   : > { %1083 = vmatprep.subr.bf16.mxu0 %v1451_v30 }
  0x50   : > { %1071 = vmatpush2.bf16.msra.mxu1 %v1526_v55 }
  0x52   : > { %1084 = vmatpush1.bf16.msra.mxu0 %v1449_v36 }
  0x53   : > { %1085 = vmatprep.subr.bf16.mxu0 %v1457_v38  ;;  %1073 = vmatmul.mubr.bf16.vlgmr.msra.gmra.mxu1 %v632_v57 }
  0x56   : > { %1086 = vmatpush1.bf16.msra.mxu0 %v1455_v42 }
  0x57   : > { %1087 = vmatprep.subr.bf16.mxu0 %v1463_v43  ;;  %v1030_v43 = vsub.s32 2, %v1730_v48 }
  0x5a   : > { %1088 = vmatpush1.bf16.msra.mxu0 %v1461_v46 }
  0x5b   : > { %1089 = vmatprep.subr.bf16.mxu0 %v1469_v49 }
  0x5e   : > { %1090 = vmatpush1.bf16.msra.mxu0 %v1467_v52 }
  0x5f   : > { %1091 = vmatprep.subr.bf16.mxu0 %v1475_v54 }
  0x62   : > { %1092 = vmatpush1.bf16.msra.mxu0 %v1473_v56 }
  0x63   : > { %1093 = vmatprep.subr.bf16.mxu0 %v1481_v58 }
  0x66   : > { %1094 = vmatpush1.bf16.msra.mxu0 %v1479_v59 }
  0x67   : > { %1095 = vmatprep.subr.bf16.mxu0 %v1487_v60 }
  0x6a   : > { %1096 = vmatpush1.bf16.msra.mxu0 %v1485_v61 }
  0x6b   : > { %1097 = vmatprep.subr.bf16.mxu0 %v1493_v62 }
  0x6e   : > { %1098 = vmatpush2.bf16.msra.mxu0 %v1491_v63 }
  0x6f   : > { %1099 = vmatprep.subr.bf16.mxu0 %v1499_v0 }
  0x72   : > { %1100 = vmatpush2.bf16.msra.mxu0 %v1497_v1 }
  0x73   : > { %1101 = vmatprep.subr.bf16.mxu0 %v1505_v2 }
  0x76   : > { %1102 = vmatpush2.bf16.msra.mxu0 %v1503_v3 }
  0x77   : > { %1103 = vmatprep.subr.bf16.mxu0 %v1511_v5 }
  0x7a   : > { %1104 = vmatpush2.bf16.msra.mxu0 %v1509_v6 }
  0x7b   : > { %1105 = vmatprep.subr.bf16.mxu0 %v1517_v7 }
  0x7e   : > { %1106 = vmatpush2.bf16.msra.mxu0 %v1515_v8 }
  0x7f   : > { %1107 = vmatprep.subr.bf16.mxu0 %v1523_v9 }
  0x82   : > { %1108 = vmatpush2.bf16.msra.mxu0 %v1521_v10 }
  0x83   : > { %1109 = vmatprep.subr.bf16.mxu0 %v1529_v11 }
  0x86   : > { %1110 = vmatpush2.bf16.msra.mxu0 %v1527_v12 }
  0x87   : > { %1111 = vmatprep.subr.bf16.mxu0 %v1532_v13 }
  0x8a   : > { %1112 = vmatpush2.bf16.msra.mxu0 %v1530_v4 }
  0x8d   : > { %1114 = vmatmul.mubr.bf16.vlgmr.msra.gmra.mxu0 %v632_v57 }
 0x10d   : > { %v550_v17 = vpop.f32.mrf.mxu0 }
 0x10e   : > { %v551_v18 = vadd.f32 %v550_v17, %v349_v15 }
 0x10f   : > { %v552_v19 = vpop.f32.mrf.mxu0 }
 0x110   : > { %v559_v21 = vsub.f32 %v1693_v26, %v551_v18  ;;  %v553_v23 = vadd.f32 %v552_v19, %v353_v16 }
 0x111   : > { %v554_v24 = vpop.f32.mrf.mxu0 }
 0x112   : > { %v560_v25 = vsub.f32 %v1679_v20, %v553_v23  ;;  %v555_v28 = vadd.f32 %v554_v24, %v349_v15  ;;  %v698_v20 = vld [vmem:[%s1988_s4] sm:$0xf] }
 0x113   : > { %v556_v29 = vpop.f32.mrf.mxu0  ;;  %v1023_v35 = vrot.slane %v698_v20, %v1862_v47  ;;  %v1027_v36 = vrot.slane %v698_v20, %v1825_v31  ;;  %v1074_v37 = vpop.f32.mrf.mxu1  ;;  %v1034_v31 = vsub.s32 3, %v1730_v48  ;;  %v1031_v44 = vrot.slane %v698_v20, %v1030_v43 }
 0x114   : > { %v1361_v30 = vpack.c.bf16 %v560_v25, %v559_v21  ;;  %v557_v32 = vadd.f32 %v556_v29, %v353_v16  ;;  %v561_v33 = vsub.f32 %v1695_v27, %v555_v28 }
 0x115   : > { %v1075_v38 = vadd.f32 %v1074_v37, %v1023_v35  ;;  %v1035_v45 = vrot.slane %v698_v20, %v1034_v31 }
 0x116   : > { %575 = vst [vmem:[%s289_s13] sm:$0xff] %v1361_v30  ;;  %v562_v34 = vsub.f32 %v1684_v22, %v557_v32  ;;  %v1076_v22 = vpop.f32.mrf.mxu1 }
 0x117   : > { %v1125_v27 = vrot.slane %v1075_v38, %v1862_v47  ;;  %v1077_v39 = vadd.f32 %v1076_v22, %v1027_v36 }
 0x118   : > { %v1362_v26 = vpack.c.bf16 %v562_v34, %v561_v33  ;;  %v1078_v40 = vpop.f32.mrf.mxu1 }
 0x119   : > { %1138 = vst [vmem:[%s296_s18] sm:$0xff] %v1125_v27  ;;  %v1129_v41 = vrot.slane %v1077_v39, %v1862_v47 }
 0x11a   : > { %576 = vst [vmem:[%s289_s13 + $0x8] sm:$0xff] %v1362_v26  ;;  %v1079_v42 = vpop.f32.mrf.mxu1 }
 0x11b   : > { %1139 = vst [vmem:[%s296_s18 + $0x8] sm:$0xff] %v1129_v41 }
 0x14d   : > { %v1115_v46 = vpop.f32.mrf.mxu0 }
 0x14e   : > { %v1116_v49 = vadd.f32 %v1115_v46, %v1031_v44 }
 0x14f   : > { %v1117_v50 = vpop.f32.mrf.mxu0 }
 0x150   : > { %v1133_v51 = vrot.slane %v1116_v49, %v1862_v47  ;;  %v1118_v52 = vadd.f32 %v1117_v50, %v1035_v45 }
 0x151   : > { %v1119_v53 = vpop.f32.mrf.mxu0 }
 0x152   : > { %1140 = vst [vmem:[%s296_s18 + $0x10] sm:$0xff] %v1133_v51  ;;  %v1137_v54 = vrot.slane %v1118_v52, %v1862_v47 }
 0x153   : > { %v1120_v55 = vpop.f32.mrf.mxu0 }
 0x154   : > { %1141 = vst [vmem:[%s296_s18 + $0x18] sm:$0xff] %v1137_v54 }
 0x155 PF: > { %s17_s23 = sadd.s32 1, %s1555_s23   ;;  %s1993_s21 = smov %s1551_s22 }
 0x156   : > { %p14_p6 = scmp.ge.s32.totalorder %s17_s23, 4   ;;  %s1994_s22 = smov %s1996_s24 }
 0x158   :  { %16 = sbr.rel (!%p14_p6) target bundleno = 2 (0x2), region = 90 }

// kernel: model_forward.7
= control target key start
LH: loop header
LB: loop body
LE: loop exit
PB: predicated region body
PF: predicated region fallthrough
CT: control target
= control target key end

     0   :  { %18 = vsyncpa [#allocation4], 0  ;;  %vm56_vm0 = vcmask 1043456   ;;  %vm296_vm1 = vcmask 1041409   ;;  %s3992_s0 = inlined_call_operand.vmem [shape: f32[2,4,512], index: 0, kind: input, shape index: {}]   ;;  %s3993_s1 = inlined_call_operand.vmem [shape: bf16[512,512], index: 1, kind: input, shape index: {}]   ;;  %s3994_s2 = inlined_call_operand.vmem [shape: f32[1,512], index: 2, kind: input, shape index: {}]   ;;  %s3995_s3 = inlined_call_operand.vmem [shape: bf16[512,512], index: 3, kind: input, shape index: {}]   ;;  %s3996_s4 = inlined_call_operand.vmem [shape: f32[1,512], index: 4, kind: input, shape index: {}]   ;;  %s3997_s5 = inlined_call_operand.vmem [shape: f32[2,512], index: 5, kind: input, shape index: {}]   ;;  %s3998_s6 = inlined_call_operand.vmem [shape: f32[2,512], index: 6, kind: input, shape index: {}]   ;;  %s3999_s7 = inlined_call_operand.vmem [shape: f32[2,512], index: 7, kind: input, shape index: {}]   ;;  %s4000_s8 = inlined_call_operand.vmem [shape: f32[1,512], index: 8, kind: input, shape index: {}]   ;;  %s4001_s9 = inlined_call_operand.<no memory space> [shape: f32[1,1], index: 9, kind: input, shape index: {}]   ;;  %s4002_s10 = inlined_call_operand.hbm [shape: f32[2,512], index: 10, kind: output, shape index: {0}]   ;;  %s4003_s11 = inlined_call_operand.hbm [shape: f32[2,512], index: 11, kind: output, shape index: {1}]  }
   0x1   :  { %v2558_v0 = vld [vmem:[%s3993_s1 + $0xe4] ss:$16 sps:$4 sm:$0xff]   ;;  %v2562_v2 = vld [vmem:[%s3993_s1 + $0xe0] ss:$16 sps:$4 sm:$0xff]   ;;  %v41_v51 = vld [vmem:[%s3992_s0 + $0x8] sm:$0xff] }
   0x2   :  { %v2560_v1 = vld [vmem:[%s3993_s1 + $0x2e4] ss:$16 sps:$4 sm:$0xff]   ;;  %949 = vmatprep.subr.bf16.mxu0 %v2558_v0  ;;  %v2563_v3 = vld [vmem:[%s3993_s1 + $0x2e0] ss:$16 sps:$4 sm:$0xff]   ;;  %v43_v52 = vld [vmem:[%s3992_s0 + $0x18] sm:$0xff]  ;;  %v49_v56 = vcombine.high %v41_v51, %v41_v51  ;;  %v71_v62 = vsel %vm56_vm0, %v41_v51, 0.0 }
   0x3   :  { %990 = vmatprep.subr.bf16.mxu1 %v2560_v1  ;;  %v2564_v4 = vld [vmem:[%s3993_s1 + $0xc4] ss:$16 sps:$4 sm:$0xff]   ;;  %950 = vmatpush1.bf16.msra.mxu0 %v2562_v2  ;;  %v2568_v6 = vld [vmem:[%s3993_s1 + $0xc0] ss:$16 sps:$4 sm:$0xff]   ;;  %v51_v57 = vcombine.high %v43_v52, %v43_v52  ;;  %v99_v63 = vsel %vm56_vm0, %v43_v52, 0.0 }
   0x4   :  { %991 = vmatpush1.bf16.msra.mxu1 %v2563_v3  ;;  %v2566_v5 = vld [vmem:[%s3993_s1 + $0x2c4] ss:$16 sps:$4 sm:$0xff]   ;;  %951 = vmatprep.subr.bf16.mxu0 %v2564_v4  ;;  %v2569_v7 = vld [vmem:[%s3993_s1 + $0x2c0] ss:$16 sps:$4 sm:$0xff]   ;;  %v78_v2 = vsel %vm56_vm0, %v49_v56, 0.0 }
   0x5   :  { %992 = vmatprep.subr.bf16.mxu1 %v2566_v5  ;;  %v2570_v8 = vld [vmem:[%s3993_s1 + $0xa4] ss:$16 sps:$4 sm:$0xff]   ;;  %v2574_v10 = vld [vmem:[%s3993_s1 + $0xa0] ss:$16 sps:$4 sm:$0xff]   ;;  %v106_v3 = vsel %vm56_vm0, %v51_v57, 0.0 }
   0x6   :  { %v2572_v9 = vld [vmem:[%s3993_s1 + $0x2a4] ss:$16 sps:$4 sm:$0xff]   ;;  %v2575_v11 = vld [vmem:[%s3993_s1 + $0x2a0] ss:$16 sps:$4 sm:$0xff]  }
   0x7   :  { %952 = vmatpush1.bf16.msra.mxu0 %v2568_v6  ;;  %v2576_v12 = vld [vmem:[%s3993_s1 + $0x84] ss:$16 sps:$4 sm:$0xff]   ;;  %v2580_v14 = vld [vmem:[%s3993_s1 + $0x80] ss:$16 sps:$4 sm:$0xff]   ;;  %v79_v6 = vrot.slane %v78_v2, 4 }
   0x8   :  { %993 = vmatpush1.bf16.msra.mxu1 %v2569_v7  ;;  %953 = vmatprep.subr.bf16.mxu0 %v2570_v8  ;;  %v2578_v13 = vld [vmem:[%s3993_s1 + $0x284] ss:$16 sps:$4 sm:$0xff]   ;;  %v2581_v15 = vld [vmem:[%s3993_s1 + $0x280] ss:$16 sps:$4 sm:$0xff]   ;;  %v107_v7 = vrot.slane %v106_v3, 4 }
   0x9   :  { %994 = vmatprep.subr.bf16.mxu1 %v2572_v9  ;;  %v2582_v16 = vld [vmem:[%s3993_s1 + $0x64] ss:$16 sps:$4 sm:$0xff]   ;;  %v2586_v18 = vld [vmem:[%s3993_s1 + $0x60] ss:$16 sps:$4 sm:$0xff]  }
   0xa   :  { %v2584_v17 = vld [vmem:[%s3993_s1 + $0x264] ss:$16 sps:$4 sm:$0xff]   ;;  %v2587_v19 = vld [vmem:[%s3993_s1 + $0x260] ss:$16 sps:$4 sm:$0xff]  }
   0xb   :  { %954 = vmatpush1.bf16.msra.mxu0 %v2574_v10  ;;  %v2588_v20 = vld [vmem:[%s3993_s1 + $0x44] ss:$16 sps:$4 sm:$0xff]   ;;  %v2592_v22 = vld [vmem:[%s3993_s1 + $0x40] ss:$16 sps:$4 sm:$0xff]  }
   0xc   :  { %995 = vmatpush1.bf16.msra.mxu1 %v2575_v11  ;;  %955 = vmatprep.subr.bf16.mxu0 %v2576_v12  ;;  %v2590_v21 = vld [vmem:[%s3993_s1 + $0x244] ss:$16 sps:$4 sm:$0xff]   ;;  %v2593_v23 = vld [vmem:[%s3993_s1 + $0x240] ss:$16 sps:$4 sm:$0xff]   ;;  %v72_v12 = vrot.slane %v71_v62, 4 }
   0xd   :  { %996 = vmatprep.subr.bf16.mxu1 %v2578_v13  ;;  %v2594_v24 = vld [vmem:[%s3993_s1 + $0x24] ss:$16 sps:$4 sm:$0xff]   ;;  %v2598_v26 = vld [vmem:[%s3993_s1 + $0x20] ss:$16 sps:$4 sm:$0xff]   ;;  %v100_v13 = vrot.slane %v99_v63, 4 }
   0xe   :  { %v2596_v25 = vld [vmem:[%s3993_s1 + $0x224] ss:$16 sps:$4 sm:$0xff]   ;;  %v2599_v27 = vld [vmem:[%s3993_s1 + $0x220] ss:$16 sps:$4 sm:$0xff]  }
   0xf   :  { %956 = vmatpush1.bf16.msra.mxu0 %v2580_v14  ;;  %v2600_v28 = vld [vmem:[%s3993_s1 + $0x4] ss:$16 sps:$4 sm:$0xff]   ;;  %v2604_v30 = vld [vmem:[%s3993_s1] ss:$16 sps:$4 sm:$0xff]  }
  0x10   :  { %997 = vmatpush1.bf16.msra.mxu1 %v2581_v15  ;;  %957 = vmatprep.subr.bf16.mxu0 %v2582_v16  ;;  %v2602_v29 = vld [vmem:[%s3993_s1 + $0x204] ss:$16 sps:$4 sm:$0xff]   ;;  %v2605_v31 = vld [vmem:[%s3993_s1 + $0x200] ss:$16 sps:$4 sm:$0xff]  }
  0x11   :  { %998 = vmatprep.subr.bf16.mxu1 %v2584_v17  ;;  %v2606_v32 = vld [vmem:[%s3993_s1 + $0x1e4] ss:$16 sps:$4 sm:$0xff]   ;;  %v2610_v34 = vld [vmem:[%s3993_s1 + $0x1e0] ss:$16 sps:$4 sm:$0xff]   ;;  %v80_v17 = vadd.f32 %v79_v6, %v78_v2 }
  0x12   :  { %v2608_v33 = vld [vmem:[%s3993_s1 + $0x3e4] ss:$16 sps:$4 sm:$0xff]   ;;  %v2611_v35 = vld [vmem:[%s3993_s1 + $0x3e0] ss:$16 sps:$4 sm:$0xff]  }
  0x13   :  { %958 = vmatpush1.bf16.msra.mxu0 %v2586_v18  ;;  %v2612_v36 = vld [vmem:[%s3993_s1 + $0x1c4] ss:$16 sps:$4 sm:$0xff]   ;;  %v2616_v38 = vld [vmem:[%s3993_s1 + $0x1c0] ss:$16 sps:$4 sm:$0xff]   ;;  %v108_v18 = vadd.f32 %v107_v7, %v106_v3 }
  0x14   :  { %999 = vmatpush1.bf16.msra.mxu1 %v2587_v19  ;;  %959 = vmatprep.subr.bf16.mxu0 %v2588_v20  ;;  %v2614_v37 = vld [vmem:[%s3993_s1 + $0x3c4] ss:$16 sps:$4 sm:$0xff]   ;;  %v2617_v39 = vld [vmem:[%s3993_s1 + $0x3c0] ss:$16 sps:$4 sm:$0xff]  }
  0x15   :  { %1000 = vmatprep.subr.bf16.mxu1 %v2590_v21  ;;  %v2618_v40 = vld [vmem:[%s3993_s1 + $0x1a4] ss:$16 sps:$4 sm:$0xff]   ;;  %v2622_v42 = vld [vmem:[%s3993_s1 + $0x1a0] ss:$16 sps:$4 sm:$0xff]  }
  0x16   :  { %v2620_v41 = vld [vmem:[%s3993_s1 + $0x3a4] ss:$16 sps:$4 sm:$0xff]   ;;  %v2623_v43 = vld [vmem:[%s3993_s1 + $0x3a0] ss:$16 sps:$4 sm:$0xff]  }
  0x17   :  { %960 = vmatpush1.bf16.msra.mxu0 %v2592_v22  ;;  %v2624_v44 = vld [vmem:[%s3993_s1 + $0x184] ss:$16 sps:$4 sm:$0xff]   ;;  %v2628_v46 = vld [vmem:[%s3993_s1 + $0x180] ss:$16 sps:$4 sm:$0xff]  }
  0x18   :  { %1001 = vmatpush1.bf16.msra.mxu1 %v2593_v23  ;;  %961 = vmatprep.subr.bf16.mxu0 %v2594_v24  ;;  %v2626_v45 = vld [vmem:[%s3993_s1 + $0x384] ss:$16 sps:$4 sm:$0xff]   ;;  %v2629_v47 = vld [vmem:[%s3993_s1 + $0x380] ss:$16 sps:$4 sm:$0xff]   ;;  %v73_v23 = vadd.f32 %v72_v12, %v71_v62  ;;  %v101_v24 = vadd.f32 %v100_v13, %v99_v63 }
  0x19   :  { %1002 = vmatprep.subr.bf16.mxu1 %v2596_v25  ;;  %v40_v48 = vld [vmem:[%s3992_s0] sm:$0xff]  ;;  %v42_v49 = vld [vmem:[%s3992_s0 + $0x10] sm:$0xff] }
  0x1a   :  { %v48_v50 = vcombine.high %v40_v48, %v40_v48  ;;  %v57_v53 = vsel %vm56_vm0, %v40_v48, 0.0  ;;  %v2630_v54 = vld [vmem:[%s3993_s1 + $0x164] ss:$16 sps:$4 sm:$0xff]   ;;  %v50_v55 = vcombine.high %v42_v49, %v42_v49  ;;  %v85_v61 = vsel %vm56_vm0, %v42_v49, 0.0  ;;  %v2634_v4 = vld [vmem:[%s3993_s1 + $0x160] ss:$16 sps:$4 sm:$0xff]  }
  0x1b   :  { %962 = vmatpush1.bf16.msra.mxu0 %v2598_v26  ;;  %v58_v58 = vrot.slane %v57_v53, 4  ;;  %v2632_v59 = vld [vmem:[%s3993_s1 + $0x364] ss:$16 sps:$4 sm:$0xff]   ;;  %v2635_v9 = vld [vmem:[%s3993_s1 + $0x360] ss:$16 sps:$4 sm:$0xff]   ;;  %v86_v11 = vrot.slane %v85_v61, 4 }
  0x1c   :  { %1003 = vmatpush1.bf16.msra.mxu1 %v2599_v27  ;;  %963 = vmatprep.subr.bf16.mxu0 %v2600_v28  ;;  %v64_v60 = vsel %vm56_vm0, %v48_v50, 0.0  ;;  %v92_v1 = vsel %vm56_vm0, %v50_v55, 0.0  ;;  %v2636_v14 = vld [vmem:[%s3993_s1 + $0x144] ss:$16 sps:$4 sm:$0xff]   ;;  %v2640_v20 = vld [vmem:[%s3993_s1 + $0x140] ss:$16 sps:$4 sm:$0xff]  }
  0x1d   :  { %1004 = vmatprep.subr.bf16.mxu1 %v2602_v29  ;;  %v65_v0 = vrot.slane %v64_v60, 4  ;;  %v93_v5 = vrot.slane %v92_v1, 4  ;;  %v59_v8 = vadd.f32 %v58_v58, %v57_v53  ;;  %v2638_v15 = vld [vmem:[%s3993_s1 + $0x344] ss:$16 sps:$4 sm:$0xff]   ;;  %v87_v22 = vadd.f32 %v86_v11, %v85_v61  ;;  %v2641_v29 = vld [vmem:[%s3993_s1 + $0x340] ss:$16 sps:$4 sm:$0xff]  }
  0x1e   :  { %v81_v26 = vrot.slane %v80_v17, 2  ;;  %v109_v27 = vrot.slane %v108_v18, 2  ;;  %v2648_v50 = vld [vmem:[%s3993_s1 + $0x104] ss:$16 sps:$4 sm:$0xff]  }
  0x1f   :  { %964 = vmatpush1.bf16.msra.mxu0 %v2604_v30  ;;  %v66_v10 = vadd.f32 %v65_v0, %v64_v60  ;;  %v94_v16 = vadd.f32 %v93_v5, %v92_v1  ;;  %v60_v19 = vrot.slane %v59_v8, 2  ;;  %v2650_v55 = vld [vmem:[%s3993_s1 + $0x304] ss:$16 sps:$4 sm:$0xff]   ;;  %v2652_v0 = vld [vmem:[%s3993_s1 + $0x100] ss:$16 sps:$4 sm:$0xff]  }
  0x20   :  { %1005 = vmatpush1.bf16.msra.mxu1 %v2605_v31  ;;  %965 = vmatprep.subr.bf16.mxu0 %v2606_v32  ;;  %v88_v31 = vrot.slane %v87_v22, 2  ;;  %v74_v32 = vrot.slane %v73_v23, 2  ;;  %v2653_v5 = vld [vmem:[%s3993_s1 + $0x300] ss:$16 sps:$4 sm:$0xff]  }
  0x21   :  { %1006 = vmatprep.subr.bf16.mxu1 %v2608_v33  ;;  %v67_v21 = vrot.slane %v66_v10, 2  ;;  %v95_v25 = vrot.slane %v94_v16, 2  ;;  %v61_v28 = vadd.f32 %v60_v19, %v59_v8  ;;  %v102_v33 = vrot.slane %v101_v24, 2 }
  0x23   :  { %966 = vmatpush2.bf16.msra.mxu0 %v2610_v34  ;;  %v68_v30 = vadd.f32 %v67_v21, %v66_v10  ;;  %v2642_v34 = vld [vmem:[%s3993_s1 + $0x124] ss:$16 sps:$4 sm:$0xff]  }
  0x24   :  { %1007 = vmatpush2.bf16.msra.mxu1 %v2611_v35  ;;  %967 = vmatprep.subr.bf16.mxu0 %v2612_v36  ;;  %v2644_v35 = vld [vmem:[%s3993_s1 + $0x324] ss:$16 sps:$4 sm:$0xff]   ;;  %v96_v36 = vadd.f32 %v95_v25, %v94_v16 }
  0x25   :  { %1008 = vmatprep.subr.bf16.mxu1 %v2614_v37  ;;  %v82_v37 = vadd.f32 %v81_v26, %v80_v17 }
  0x27   :  { %968 = vmatpush2.bf16.msra.mxu0 %v2616_v38  ;;  %v110_v38 = vadd.f32 %v109_v27, %v108_v18 }
  0x28   :  { %1009 = vmatpush2.bf16.msra.mxu1 %v2617_v39  ;;  %969 = vmatprep.subr.bf16.mxu0 %v2618_v40  ;;  %v62_v39 = vrot.slane %v61_v28, 1  ;;  %v2646_v40 = vld [vmem:[%s3993_s1 + $0x120] ss:$16 sps:$4 sm:$0xff]  }
  0x29   :  { %1010 = vmatprep.subr.bf16.mxu1 %v2620_v41  ;;  %v69_v41 = vrot.slane %v68_v30, 1  ;;  %v111_v48 = vrot.slane %v110_v38, 1 }
  0x2a   :  { %v63_v49 = vadd.f32 %v62_v39, %v61_v28  ;;  %v2658_v28 = vld [vmem:[%s3993_s1 + $0xe8] ss:$16 sps:$4 sm:$0xff]  }
  0x2b   :  { %970 = vmatpush2.bf16.msra.mxu0 %v2622_v42  ;;  %v89_v42 = vadd.f32 %v88_v31, %v87_v22  ;;  %v70_v51 = vadd.f32 %v69_v41, %v68_v30  ;;  %v112_v58 = vadd.f32 %v111_v48, %v110_v38  ;;  %v2664_v38 = vld [vmem:[%s3993_s1 + $0xc8] ss:$16 sps:$4 sm:$0xff]   ;;  %v2675_v41 = vld [vmem:[%s3993_s1 + $0x2ac] ss:$16 sps:$4 sm:$0xff]  }
  0x2c   :  { %1011 = vmatpush2.bf16.msra.mxu1 %v2623_v43  ;;  %971 = vmatprep.subr.bf16.mxu0 %v2624_v44  ;;  %v75_v43 = vadd.f32 %v74_v32, %v73_v23  ;;  %v103_v44 = vadd.f32 %v102_v33, %v101_v24  ;;  %v2667_v39 = vld [vmem:[%s3993_s1 + $0x2c8] ss:$16 sps:$4 sm:$0xff]   ;;  %v2684_v48 = vld [vmem:[%s3993_s1 + $0x6c] ss:$16 sps:$4 sm:$0xff]  }
  0x2d   :  { %1012 = vmatprep.subr.bf16.mxu1 %v2626_v45  ;;  %v2647_v45 = vld [vmem:[%s3993_s1 + $0x320] ss:$16 sps:$4 sm:$0xff]   ;;  %v90_v52 = vrot.slane %v89_v42, 1  ;;  %v3266_v60 = vmul.f32 0.25, %v70_v51  ;;  %v3275_v3 = vmul.f32 0.25, %v112_v58 }
  0x2e   :  { %v76_v53 = vrot.slane %v75_v43, 1  ;;  %v2685_v51 = vld [vmem:[%s3993_s1 + $0x268] ss:$16 sps:$4 sm:$0xff]  }
  0x2f   :  { %972 = vmatpush2.bf16.msra.mxu0 %v2628_v46  ;;  %v97_v46 = vrot.slane %v96_v36, 1  ;;  %v91_v61 = vadd.f32 %v90_v52, %v89_v42  ;;  %v123_v6 = vpack.c.bf16 %v3266_v60, %v3266_v60  ;;  %v129_v12 = vpack.c.bf16 %v3275_v3, %v3275_v3  ;;  %v2670_v42 = vld [vmem:[%s3993_s1 + $0xa8] ss:$16 sps:$4 sm:$0xff]   ;;  %v2690_v52 = vld [vmem:[%s3993_s1 + $0x4c] ss:$16 sps:$4 sm:$0xff]  }
  0x30   :  { %1013 = vmatpush2.bf16.msra.mxu1 %v2629_v47  ;;  %973 = vmatprep.subr.bf16.mxu0 %v2630_v54  ;;  %v83_v47 = vrot.slane %v82_v37, 1  ;;  %v104_v54 = vrot.slane %v103_v44, 1  ;;  %v77_v62 = vadd.f32 %v76_v53, %v75_v43  ;;  %v2673_v43 = vld [vmem:[%s3993_s1 + $0x2a8] ss:$16 sps:$4 sm:$0xff]   ;;  %v2693_v53 = vld [vmem:[%s3993_s1 + $0x24c] ss:$16 sps:$4 sm:$0xff]  }
  0x31   :  { %1014 = vmatprep.subr.bf16.mxu1 %v2632_v59  ;;  %v98_v56 = vadd.f32 %v97_v46, %v96_v36  ;;  %v3264_v59 = vmul.f32 0.25, %v63_v49  ;;  %v3284_v7 = vmul.f32 0.25, %v91_v61  ;;  %v289_v16 = vunpack.c.l.b16 %v123_v6  ;;  %v2676_v46 = vld [vmem:[%s3993_s1 + $0x88] ss:$16 sps:$4 sm:$0xff]   ;;  %v2687_v49 = vld [vmem:[%s3993_s1 + $0x26c] ss:$16 sps:$4 sm:$0xff]  }
  0x32   :  { %v84_v57 = vadd.f32 %v83_v47, %v82_v37  ;;  %v105_v63 = vadd.f32 %v104_v54, %v103_v44  ;;  %v3286_v8 = vmul.f32 0.25, %v77_v62  ;;  %v295_v22 = vunpack.c.l.b16 %v129_v12  ;;  %v2669_v37 = vld [vmem:[%s3993_s1 + $0x2cc] ss:$16 sps:$4 sm:$0xff]   ;;  %v2679_v47 = vld [vmem:[%s3993_s1 + $0x288] ss:$16 sps:$4 sm:$0xff]  }
  0x33   :  { %974 = vmatpush2.bf16.msra.mxu0 %v2634_v4  ;;  %v3271_v1 = vmul.f32 0.25, %v98_v56  ;;  %v122_v4 = vpack.c.bf16 %v3264_v59, %v3264_v59  ;;  %v126_v17 = vpack.c.bf16 %v3284_v7, %v3284_v7  ;;  %v2678_v44 = vld [vmem:[%s3993_s1 + $0x8c] ss:$16 sps:$4 sm:$0xff]   ;;  %v2688_v54 = vld [vmem:[%s3993_s1 + $0x48] ss:$16 sps:$4 sm:$0xff]  }
  0x34   :  { %1015 = vmatpush2.bf16.msra.mxu1 %v2635_v9  ;;  %975 = vmatprep.subr.bf16.mxu0 %v2636_v14  ;;  %v3273_v2 = vmul.f32 0.25, %v84_v57  ;;  %v3288_v9 = vmul.f32 0.25, %v105_v63  ;;  %v2660_v14 = vld [vmem:[%s3993_s1 + $0xec] ss:$16 sps:$4 sm:$0xff]   ;;  %v124_v18 = vpack.c.bf16 %v3286_v8, %v3286_v8  ;;  %v2694_v58 = vld [vmem:[%s3993_s1 + $0x28] ss:$16 sps:$4 sm:$0xff]  }
  0x35   :  { %1016 = vmatprep.subr.bf16.mxu1 %v2638_v15  ;;  %v127_v10 = vpack.c.bf16 %v3271_v1, %v3271_v1  ;;  %v288_v13 = vunpack.c.l.b16 %v122_v4  ;;  %v2663_v15 = vld [vmem:[%s3993_s1 + $0x2ec] ss:$16 sps:$4 sm:$0xff]   ;;  %v292_v23 = vunpack.c.l.b16 %v126_v17  ;;  %v2697_v61 = vld [vmem:[%s3993_s1 + $0x228] ss:$16 sps:$4 sm:$0xff]  }
  0x36   :  { %v125_v11 = vpack.c.bf16 %v3273_v2, %v3273_v2  ;;  %v128_v19 = vpack.c.bf16 %v3288_v9, %v3288_v9  ;;  %v290_v24 = vunpack.c.l.b16 %v124_v18  ;;  %v2696_v56 = vld [vmem:[%s3993_s1 + $0x2c] ss:$16 sps:$4 sm:$0xff]   ;;  %v2703_v4 = vld [vmem:[%s3993_s1 + $0x208] ss:$16 sps:$4 sm:$0xff]  }
  0x37   :  { %976 = vmatpush2.bf16.msra.mxu0 %v2640_v20  ;;  %v293_v20 = vunpack.c.l.b16 %v127_v10  ;;  %v297_v32 = vsel %vm296_vm1, %v292_v23, %v288_v13  ;;  %v2699_v57 = vld [vmem:[%s3993_s1 + $0x22c] ss:$16 sps:$4 sm:$0xff]   ;;  %v2706_v10 = vld [vmem:[%s3993_s1 + $0x1e8] ss:$16 sps:$4 sm:$0xff]  }
  0x38   :  { %1017 = vmatpush2.bf16.msra.mxu1 %v2641_v29  ;;  %977 = vmatprep.subr.bf16.mxu0 %v2642_v34  ;;  %v291_v21 = vunpack.c.l.b16 %v125_v11  ;;  %v294_v25 = vunpack.c.l.b16 %v128_v19  ;;  %v2661_v29 = vld [vmem:[%s3993_s1 + $0x2e8] ss:$16 sps:$4 sm:$0xff]   ;;  %v2666_v34 = vld [vmem:[%s3993_s1 + $0xcc] ss:$16 sps:$4 sm:$0xff]  }
  0x39   :  { %1018 = vmatprep.subr.bf16.mxu1 %v2644_v35  ;;  %v298_v26 = vsel %vm296_vm1, %v293_v20, %v289_v16  ;;  %v3321_v35 = vpack.c.b16 %v297_v32, %v297_v32  ;;  %v2702_v62 = vld [vmem:[%s3993_s1 + $0xc] ss:$16 sps:$4 sm:$0xff]   ;;  %v2709_v11 = vld [vmem:[%s3993_s1 + $0x3e8] ss:$16 sps:$4 sm:$0xff]  }
  0x3a   :  { %v300_v27 = vsel %vm296_vm1, %v295_v22, %v291_v21  ;;  %v302_v30 = vpack.c.b16 %v298_v26, %v298_v26  ;;  %v299_v33 = vsel %vm296_vm1, %v294_v25, %v290_v24  ;;  %v2705_v63 = vld [vmem:[%s3993_s1 + $0x20c] ss:$16 sps:$4 sm:$0xff]   ;;  %v2718_v18 = vld [vmem:[%s3993_s1 + $0x1a8] ss:$16 sps:$4 sm:$0xff]  }
  0x3b   :  { %978 = vmatpush2.bf16.msra.mxu0 %v2646_v40  ;;  %v304_v31 = vpack.c.b16 %v300_v27, %v300_v27  ;;  %v3323_v36 = vpack.c.b16 %v299_v33, %v299_v33  ;;  %v2672_v40 = vld [vmem:[%s3993_s1 + $0xac] ss:$16 sps:$4 sm:$0xff]   ;;  %v2721_v19 = vld [vmem:[%s3993_s1 + $0x3a8] ss:$16 sps:$4 sm:$0xff]  }
  0x3c   :  { %1019 = vmatpush2.bf16.msra.mxu1 %v2647_v45  ;;  %979 = vmatprep.subr.bf16.mxu0 %v2648_v50  ;;  %v2681_v45 = vld [vmem:[%s3993_s1 + $0x28c] ss:$16 sps:$4 sm:$0xff]   ;;  %v2682_v50 = vld [vmem:[%s3993_s1 + $0x68] ss:$16 sps:$4 sm:$0xff]  }
  0x3d   :  { %1020 = vmatprep.subr.bf16.mxu1 %v2650_v55  ;;  %981 = vmatprep.mubr.bf16.mxu0 %v302_v30  ;;  %v2691_v55 = vld [vmem:[%s3993_s1 + $0x248] ss:$16 sps:$4 sm:$0xff]   ;;  %v2711_v6 = vld [vmem:[%s3993_s1 + $0x3ec] ss:$16 sps:$4 sm:$0xff]  }
  0x3e   :  { %1022 = vmatprep.mubr.bf16.mxu1 %v304_v31  ;;  %v2714_v12 = vld [vmem:[%s3993_s1 + $0x1cc] ss:$16 sps:$4 sm:$0xff]   ;;  %v2724_v22 = vld [vmem:[%s3993_s1 + $0x188] ss:$16 sps:$4 sm:$0xff]  }
  0x3f   :  { %980 = vmatpush2.bf16.msra.mxu0 %v2652_v0  ;;  %v2700_v0 = vld [vmem:[%s3993_s1 + $0x8] ss:$16 sps:$4 sm:$0xff]   ;;  %v2717_v13 = vld [vmem:[%s3993_s1 + $0x3cc] ss:$16 sps:$4 sm:$0xff]  }
  0x40   :  { %1021 = vmatpush2.bf16.msra.mxu1 %v2653_v5  ;;  %1031 = vmatprep.subr.bf16.mxu0 %v2660_v14  ;;  %v2708_v5 = vld [vmem:[%s3993_s1 + $0x1ec] ss:$16 sps:$4 sm:$0xff]   ;;  %v2712_v14 = vld [vmem:[%s3993_s1 + $0x1c8] ss:$16 sps:$4 sm:$0xff]  }
  0x41   :  { %1072 = vmatprep.subr.bf16.mxu1 %v2663_v15  ;;  %v2715_v15 = vld [vmem:[%s3993_s1 + $0x3c8] ss:$16 sps:$4 sm:$0xff]   ;;  %v2720_v16 = vld [vmem:[%s3993_s1 + $0x1ac] ss:$16 sps:$4 sm:$0xff]  }
  0x42   :  { %982 = vmatmul.mubr.bf16.vlgmr.msra.gmra.mxu0 %v3321_v35  ;;  %v2723_v17 = vld [vmem:[%s3993_s1 + $0x3ac] ss:$16 sps:$4 sm:$0xff]   ;;  %v2727_v23 = vld [vmem:[%s3993_s1 + $0x388] ss:$16 sps:$4 sm:$0xff]  }
  0x43   :  { %1023 = vmatmul.mubr.bf16.vlgmr.msra.gmra.mxu1 %v3323_v36  ;;  %1032 = vmatpush1.bf16.msra.mxu0 %v2658_v28  ;;  %v2726_v20 = vld [vmem:[%s3993_s1 + $0x18c] ss:$16 sps:$4 sm:$0xff]   ;;  %v2730_v26 = vld [vmem:[%s3993_s1 + $0x168] ss:$16 sps:$4 sm:$0xff]  }
  0x44   :  { %1073 = vmatpush1.bf16.msra.mxu1 %v2661_v29  ;;  %1033 = vmatprep.subr.bf16.mxu0 %v2666_v34  ;;  %v2729_v21 = vld [vmem:[%s3993_s1 + $0x38c] ss:$16 sps:$4 sm:$0xff]   ;;  %v2733_v27 = vld [vmem:[%s3993_s1 + $0x368] ss:$16 sps:$4 sm:$0xff]  }
  0x45   :  { %1074 = vmatprep.subr.bf16.mxu1 %v2669_v37  ;;  %1063 = vmatprep.mubr.bf16.mxu0 %v302_v30  ;;  %v2732_v24 = vld [vmem:[%s3993_s1 + $0x16c] ss:$16 sps:$4 sm:$0xff]   ;;  %v2736_v30 = vld [vmem:[%s3993_s1 + $0x148] ss:$16 sps:$4 sm:$0xff]  }
  0x46   :  { %1104 = vmatprep.mubr.bf16.mxu1 %v304_v31  ;;  %v2735_v25 = vld [vmem:[%s3993_s1 + $0x36c] ss:$16 sps:$4 sm:$0xff]   ;;  %v2739_v31 = vld [vmem:[%s3993_s1 + $0x348] ss:$16 sps:$4 sm:$0xff]  }
  0x47   :  { %1034 = vmatpush1.bf16.msra.mxu0 %v2664_v38  ;;  %v2738_v28 = vld [vmem:[%s3993_s1 + $0x14c] ss:$16 sps:$4 sm:$0xff]   ;;  %v2742_v34 = vld [vmem:[%s3993_s1 + $0x128] ss:$16 sps:$4 sm:$0xff]  }
  0x48   :  { %1075 = vmatpush1.bf16.msra.mxu1 %v2667_v39  ;;  %1035 = vmatprep.subr.bf16.mxu0 %v2672_v40  ;;  %v2741_v29 = vld [vmem:[%s3993_s1 + $0x34c] ss:$16 sps:$4 sm:$0xff]   ;;  %v2745_v37 = vld [vmem:[%s3993_s1 + $0x328] ss:$16 sps:$4 sm:$0xff]  }
  0x49   :  { %1076 = vmatprep.subr.bf16.mxu1 %v2675_v41  ;;  %v2744_v32 = vld [vmem:[%s3993_s1 + $0x12c] ss:$16 sps:$4 sm:$0xff]   ;;  %v2748_v40 = vld [vmem:[%s3993_s1 + $0x108] ss:$16 sps:$4 sm:$0xff]  }
  0x4a   :  { %v2747_v33 = vld [vmem:[%s3993_s1 + $0x32c] ss:$16 sps:$4 sm:$0xff]   ;;  %v2751_v41 = vld [vmem:[%s3993_s1 + $0x308] ss:$16 sps:$4 sm:$0xff]  }
  0x4b   :  { %1036 = vmatpush1.bf16.msra.mxu0 %v2670_v42  ;;  %v2750_v38 = vld [vmem:[%s3993_s1 + $0x10c] ss:$16 sps:$4 sm:$0xff]   ;;  %v2756_v42 = vld [vmem:[%s3995_s3 + $0xe4] ss:$16 sps:$4 sm:$0xff]  }
  0x4c   :  { %1077 = vmatpush1.bf16.msra.mxu1 %v2673_v43  ;;  %1037 = vmatprep.subr.bf16.mxu0 %v2678_v44  ;;  %v2753_v39 = vld [vmem:[%s3993_s1 + $0x30c] ss:$16 sps:$4 sm:$0xff]   ;;  %v2754_v43 = vld [vmem:[%s3995_s3 + $0xe0] ss:$16 sps:$4 sm:$0xff]   ;;  %v2759_v44 = vld [vmem:[%s3995_s3 + $0xc4] ss:$16 sps:$4 sm:$0xff]  }
  0x4d   :  { %1078 = vmatprep.subr.bf16.mxu1 %v2681_v45  ;;  %v2757_v45 = vld [vmem:[%s3995_s3 + $0xc0] ss:$16 sps:$4 sm:$0xff]  }
  0x4f   :  { %1038 = vmatpush1.bf16.msra.mxu0 %v2676_v46  ;;  %v2762_v46 = vld [vmem:[%s3995_s3 + $0xa4] ss:$16 sps:$4 sm:$0xff]  }
  0x50   :  { %1079 = vmatpush1.bf16.msra.mxu1 %v2679_v47  ;;  %1039 = vmatprep.subr.bf16.mxu0 %v2684_v48  ;;  %v2760_v47 = vld [vmem:[%s3995_s3 + $0xa0] ss:$16 sps:$4 sm:$0xff]   ;;  %v2804_v48 = vld [vmem:[%s3995_s3 + $0x2e4] ss:$16 sps:$4 sm:$0xff]  }
  0x51   :  { %1080 = vmatprep.subr.bf16.mxu1 %v2687_v49  ;;  %v2768_v49 = vld [vmem:[%s3995_s3 + $0x64] ss:$16 sps:$4 sm:$0xff]  }
  0x53   :  { %1040 = vmatpush1.bf16.msra.mxu0 %v2682_v50  ;;  %v2802_v50 = vld [vmem:[%s3995_s3 + $0x2e0] ss:$16 sps:$4 sm:$0xff]  }
  0x54   :  { %1081 = vmatpush1.bf16.msra.mxu1 %v2685_v51  ;;  %1041 = vmatprep.subr.bf16.mxu0 %v2690_v52  ;;  %v2810_v51 = vld [vmem:[%s3995_s3 + $0x2c4] ss:$16 sps:$4 sm:$0xff]   ;;  %v2766_v52 = vld [vmem:[%s3995_s3 + $0x60] ss:$16 sps:$4 sm:$0xff]  }
  0x55   :  { %1082 = vmatprep.subr.bf16.mxu1 %v2693_v53  ;;  %v2808_v53 = vld [vmem:[%s3995_s3 + $0x2c0] ss:$16 sps:$4 sm:$0xff]  }
  0x57   :  { %1042 = vmatpush1.bf16.msra.mxu0 %v2688_v54 }
  0x58   :  { %1083 = vmatpush1.bf16.msra.mxu1 %v2691_v55  ;;  %1043 = vmatprep.subr.bf16.mxu0 %v2696_v56 }
  0x59   :  { %1084 = vmatprep.subr.bf16.mxu1 %v2699_v57 }
  0x5b   :  { %1044 = vmatpush1.bf16.msra.mxu0 %v2694_v58 }
  0x5c   :  { %1085 = vmatpush1.bf16.msra.mxu1 %v2697_v61  ;;  %1045 = vmatprep.subr.bf16.mxu0 %v2702_v62 }
  0x5d   :  { %1086 = vmatprep.subr.bf16.mxu1 %v2705_v63 }
  0x5f   :  { %1046 = vmatpush1.bf16.msra.mxu0 %v2700_v0 }
  0x60   :  { %1087 = vmatpush1.bf16.msra.mxu1 %v2703_v4  ;;  %1047 = vmatprep.subr.bf16.mxu0 %v2708_v5 }
  0x61   :  { %1088 = vmatprep.subr.bf16.mxu1 %v2711_v6 }
  0x63   :  { %1048 = vmatpush2.bf16.msra.mxu0 %v2706_v10 }
  0x64   :  { %1089 = vmatpush2.bf16.msra.mxu1 %v2709_v11  ;;  %1049 = vmatprep.subr.bf16.mxu0 %v2714_v12 }
  0x65   :  { %1090 = vmatprep.subr.bf16.mxu1 %v2717_v13 }
  0x67   :  { %1050 = vmatpush2.bf16.msra.mxu0 %v2712_v14 }
  0x68   :  { %1091 = vmatpush2.bf16.msra.mxu1 %v2715_v15  ;;  %1051 = vmatprep.subr.bf16.mxu0 %v2720_v16 }
  0x69   :  { %1092 = vmatprep.subr.bf16.mxu1 %v2723_v17 }
  0x6b   :  { %1052 = vmatpush2.bf16.msra.mxu0 %v2718_v18 }
  0x6c   :  { %1093 = vmatpush2.bf16.msra.mxu1 %v2721_v19  ;;  %1053 = vmatprep.subr.bf16.mxu0 %v2726_v20 }
  0x6d   :  { %1094 = vmatprep.subr.bf16.mxu1 %v2729_v21 }
  0x6f   :  { %1054 = vmatpush2.bf16.msra.mxu0 %v2724_v22 }
  0x70   :  { %1095 = vmatpush2.bf16.msra.mxu1 %v2727_v23  ;;  %1055 = vmatprep.subr.bf16.mxu0 %v2732_v24 }
  0x71   :  { %1096 = vmatprep.subr.bf16.mxu1 %v2735_v25 }
  0x73   :  { %1056 = vmatpush2.bf16.msra.mxu0 %v2730_v26 }
  0x74   :  { %1097 = vmatpush2.bf16.msra.mxu1 %v2733_v27  ;;  %1057 = vmatprep.subr.bf16.mxu0 %v2738_v28 }
  0x75   :  { %1098 = vmatprep.subr.bf16.mxu1 %v2741_v29 }
  0x77   :  { %1058 = vmatpush2.bf16.msra.mxu0 %v2736_v30 }
  0x78   :  { %1099 = vmatpush2.bf16.msra.mxu1 %v2739_v31  ;;  %1059 = vmatprep.subr.bf16.mxu0 %v2744_v32 }
  0x79   :  { %1100 = vmatprep.subr.bf16.mxu1 %v2747_v33 }
  0x7b   :  { %1060 = vmatpush2.bf16.msra.mxu0 %v2742_v34 }
  0x7c   :  { %1101 = vmatpush2.bf16.msra.mxu1 %v2745_v37  ;;  %1061 = vmatprep.subr.bf16.mxu0 %v2750_v38 }
  0x7d   :  { %1102 = vmatprep.subr.bf16.mxu1 %v2753_v39 }
  0x7f   :  { %1062 = vmatpush2.bf16.msra.mxu0 %v2748_v40 }
  0x80   :  { %1103 = vmatpush2.bf16.msra.mxu1 %v2751_v41  ;;  %1987 = vmatprep.subr.bf16.mxu0 %v2756_v42 }
  0x81   :  { %2028 = vmatprep.subr.bf16.mxu1 %v2804_v48 }
  0x82   :  { %1064 = vmatmul.mubr.bf16.vlgmr.msra.gmra.mxu0 %v3321_v35  ;;  %v2765_v35 = vld [vmem:[%s3995_s3 + $0x84] ss:$16 sps:$4 sm:$0xff]  }
  0x83   :  { %1105 = vmatmul.mubr.bf16.vlgmr.msra.gmra.mxu1 %v3323_v36  ;;  %1988 = vmatpush1.bf16.msra.mxu0 %v2754_v43  ;;  %v2763_v36 = vld [vmem:[%s3995_s3 + $0x80] ss:$16 sps:$4 sm:$0xff]  }
  0x84   :  { %1989 = vmatprep.subr.bf16.mxu0 %v2759_v44  ;;  %2029 = vmatpush1.bf16.msra.mxu1 %v2802_v50 }
  0x87   :  { %1990 = vmatpush1.bf16.msra.mxu0 %v2757_v45 }
  0x88   :  { %1991 = vmatprep.subr.bf16.mxu0 %v2762_v46 }
  0x8b   :  { %1992 = vmatpush1.bf16.msra.mxu0 %v2760_v47 }
  0x8c   :  { %1993 = vmatprep.subr.bf16.mxu0 %v2765_v35 }
  0x8f   :  { %1994 = vmatpush1.bf16.msra.mxu0 %v2763_v36 }
  0x90   :  { %19 = vsyncpa [#allocation6], 0  ;;  %1995 = vmatprep.subr.bf16.mxu0 %v2768_v49  ;;  %v2771_v54 = vld [vmem:[%s3995_s3 + $0x44] ss:$16 sps:$4 sm:$0xff]   ;;  %2030 = vmatprep.subr.bf16.mxu1 %v2810_v51  ;;  %v2814_v55 = vld [vmem:[%s3995_s3 + $0x2a0] ss:$16 sps:$4 sm:$0xff]   ;;  %v260_v50 = vlaneseq }
  0x91   :  { %2031 = vmatpush1.bf16.msra.mxu1 %v2808_v53  ;;  %v2816_v56 = vld [vmem:[%s3995_s3 + $0x2a4] ss:$16 sps:$4 sm:$0xff]   ;;  %v2769_v57 = vld [vmem:[%s3995_s3 + $0x40] ss:$16 sps:$4 sm:$0xff]   ;;  %v2807_v44 = vld [vmem:[%s3995_s3 + $0xec] ss:$16 sps:$4 sm:$0xff]  }
  0x92   :  { %2032 = vmatprep.subr.bf16.mxu1 %v2816_v56  ;;  %v2774_v58 = vld [vmem:[%s3995_s3 + $0x24] ss:$16 sps:$4 sm:$0xff]   ;;  %v2820_v61 = vld [vmem:[%s3995_s3 + $0x280] ss:$16 sps:$4 sm:$0xff]   ;;  %v2900_v49 = vld [vmem:[%s3995_s3 + $0x2ec] ss:$16 sps:$4 sm:$0xff]  }
  0x93   :  { %1996 = vmatpush1.bf16.msra.mxu0 %v2766_v52  ;;  %v2822_v62 = vld [vmem:[%s3995_s3 + $0x284] ss:$16 sps:$4 sm:$0xff]   ;;  %v2772_v63 = vld [vmem:[%s3995_s3 + $0x20] ss:$16 sps:$4 sm:$0xff]   ;;  %v3704_v51 = vshrl.u32 %v260_v50, 7  ;;  %vm1185_vm2 = vcmask 1043459  }
  0x94   :  { %1997 = vmatprep.subr.bf16.mxu0 %v2771_v54  ;;  %v2777_v0 = vld [vmem:[%s3995_s3 + $0x4] ss:$16 sps:$4 sm:$0xff]   ;;  %v2826_v4 = vld [vmem:[%s3995_s3 + $0x260] ss:$16 sps:$4 sm:$0xff]   ;;  %v2994_v50 = vmov 1983009808  }
  0x95   :  { %2033 = vmatpush1.bf16.msra.mxu1 %v2814_v55  ;;  %v2828_v5 = vld [vmem:[%s3995_s3 + $0x264] ss:$16 sps:$4 sm:$0xff]   ;;  %v2775_v6 = vld [vmem:[%s3995_s3] ss:$16 sps:$4 sm:$0xff]   ;;  %v3707_v52 = vsub.s32 0, %v3704_v51  ;;  %v3715_v54 = vsub.s32 1, %v3704_v51 }
  0x96   :  { %2034 = vmatprep.subr.bf16.mxu1 %v2822_v62  ;;  %v2780_v10 = vld [vmem:[%s3995_s3 + $0x1e4] ss:$16 sps:$4 sm:$0xff]   ;;  %v2832_v11 = vld [vmem:[%s3995_s3 + $0x240] ss:$16 sps:$4 sm:$0xff]   ;;  %vm1187_vm3 = vcmask 1045509   ;;  %vm1189_vm4 = vcmask 1047559  }
  0x97   :  { %1998 = vmatpush1.bf16.msra.mxu0 %v2769_v57  ;;  %v2834_v12 = vld [vmem:[%s3995_s3 + $0x244] ss:$16 sps:$4 sm:$0xff]   ;;  %v2778_v13 = vld [vmem:[%s3995_s3 + $0x1e0] ss:$16 sps:$4 sm:$0xff]   ;;  %vm2238_vm5 = vcmask 1041408  }
  0x98   :  { %1999 = vmatprep.subr.bf16.mxu0 %v2774_v58  ;;  %v2783_v14 = vld [vmem:[%s3995_s3 + $0x1c4] ss:$16 sps:$4 sm:$0xff]   ;;  %v2838_v15 = vld [vmem:[%s3995_s3 + $0x220] ss:$16 sps:$4 sm:$0xff]  }
  0x99   :  { %2035 = vmatpush1.bf16.msra.mxu1 %v2820_v61  ;;  %v2840_v16 = vld [vmem:[%s3995_s3 + $0x224] ss:$16 sps:$4 sm:$0xff]   ;;  %v2781_v17 = vld [vmem:[%s3995_s3 + $0x1c0] ss:$16 sps:$4 sm:$0xff]  }
  0x9a   :  { %2036 = vmatprep.subr.bf16.mxu1 %v2828_v5  ;;  %v2786_v18 = vld [vmem:[%s3995_s3 + $0x1a4] ss:$16 sps:$4 sm:$0xff]   ;;  %v2844_v19 = vld [vmem:[%s3995_s3 + $0x200] ss:$16 sps:$4 sm:$0xff]  }
  0x9b   :  { %2000 = vmatpush1.bf16.msra.mxu0 %v2772_v63  ;;  %v2846_v20 = vld [vmem:[%s3995_s3 + $0x204] ss:$16 sps:$4 sm:$0xff]   ;;  %v2784_v21 = vld [vmem:[%s3995_s3 + $0x1a0] ss:$16 sps:$4 sm:$0xff]  }
  0x9c   :  { %2001 = vmatprep.subr.bf16.mxu0 %v2777_v0  ;;  %v2789_v22 = vld [vmem:[%s3995_s3 + $0x184] ss:$16 sps:$4 sm:$0xff]   ;;  %v2850_v23 = vld [vmem:[%s3995_s3 + $0x3e0] ss:$16 sps:$4 sm:$0xff]  }
  0x9d   :  { %2037 = vmatpush1.bf16.msra.mxu1 %v2826_v4  ;;  %v2852_v24 = vld [vmem:[%s3995_s3 + $0x3e4] ss:$16 sps:$4 sm:$0xff]   ;;  %v2787_v25 = vld [vmem:[%s3995_s3 + $0x180] ss:$16 sps:$4 sm:$0xff]  }
  0x9e   :  { %2038 = vmatprep.subr.bf16.mxu1 %v2834_v12  ;;  %v2792_v26 = vld [vmem:[%s3995_s3 + $0x164] ss:$16 sps:$4 sm:$0xff]   ;;  %v2856_v27 = vld [vmem:[%s3995_s3 + $0x3c0] ss:$16 sps:$4 sm:$0xff]  }
  0x9f   :  { %2002 = vmatpush1.bf16.msra.mxu0 %v2775_v6  ;;  %v2858_v28 = vld [vmem:[%s3995_s3 + $0x3c4] ss:$16 sps:$4 sm:$0xff]   ;;  %v2790_v29 = vld [vmem:[%s3995_s3 + $0x160] ss:$16 sps:$4 sm:$0xff]  }
  0xa0   :  { %2003 = vmatprep.subr.bf16.mxu0 %v2780_v10  ;;  %v2795_v30 = vld [vmem:[%s3995_s3 + $0x144] ss:$16 sps:$4 sm:$0xff]   ;;  %v2862_v31 = vld [vmem:[%s3995_s3 + $0x3a0] ss:$16 sps:$4 sm:$0xff]  }
  0xa1   :  { %2039 = vmatpush1.bf16.msra.mxu1 %v2832_v11  ;;  %v2864_v32 = vld [vmem:[%s3995_s3 + $0x3a4] ss:$16 sps:$4 sm:$0xff]   ;;  %v2793_v33 = vld [vmem:[%s3995_s3 + $0x140] ss:$16 sps:$4 sm:$0xff]  }
  0xa2   :  { %2040 = vmatprep.subr.bf16.mxu1 %v2840_v16  ;;  %v2798_v34 = vld [vmem:[%s3995_s3 + $0x124] ss:$16 sps:$4 sm:$0xff]   ;;  %v2868_v37 = vld [vmem:[%s3995_s3 + $0x380] ss:$16 sps:$4 sm:$0xff]  }
  0xa3   :  { %2004 = vmatpush2.bf16.msra.mxu0 %v2778_v13  ;;  %v2870_v38 = vld [vmem:[%s3995_s3 + $0x384] ss:$16 sps:$4 sm:$0xff]   ;;  %v2796_v39 = vld [vmem:[%s3995_s3 + $0x120] ss:$16 sps:$4 sm:$0xff]  }
  0xa4   :  { %2005 = vmatprep.subr.bf16.mxu0 %v2783_v14  ;;  %v2801_v40 = vld [vmem:[%s3995_s3 + $0x104] ss:$16 sps:$4 sm:$0xff]   ;;  %v2874_v41 = vld [vmem:[%s3995_s3 + $0x360] ss:$16 sps:$4 sm:$0xff]  }
  0xa5   :  { %2041 = vmatpush1.bf16.msra.mxu1 %v2838_v15  ;;  %v2876_v42 = vld [vmem:[%s3995_s3 + $0x364] ss:$16 sps:$4 sm:$0xff]   ;;  %v2799_v43 = vld [vmem:[%s3995_s3 + $0x100] ss:$16 sps:$4 sm:$0xff]  }
  0xa6   :  { %2042 = vmatprep.subr.bf16.mxu1 %v2846_v20  ;;  %v2880_v45 = vld [vmem:[%s3995_s3 + $0x340] ss:$16 sps:$4 sm:$0xff]   ;;  %v2882_v46 = vld [vmem:[%s3995_s3 + $0x344] ss:$16 sps:$4 sm:$0xff]  }
  0xa7   :  { %2006 = vmatpush2.bf16.msra.mxu0 %v2781_v17  ;;  %v2888_v47 = vld [vmem:[%s3995_s3 + $0x324] ss:$16 sps:$4 sm:$0xff]   ;;  %v2886_v35 = vld [vmem:[%s3995_s3 + $0x320] ss:$16 sps:$4 sm:$0xff]  }
  0xa8   :  { %2007 = vmatprep.subr.bf16.mxu0 %v2786_v18  ;;  %v2894_v36 = vld [vmem:[%s3995_s3 + $0x304] ss:$16 sps:$4 sm:$0xff]   ;;  %v2892_v48 = vld [vmem:[%s3995_s3 + $0x300] ss:$16 sps:$4 sm:$0xff]  }
  0xa9   :  { %2043 = vmatpush1.bf16.msra.mxu1 %v2844_v19  ;;  %v3712_v53 = vld [vmem:[%s3994_s2] sm:$0xf]  ;;  %v2805_v19 = vld [vmem:[%s3995_s3 + $0xe8] ss:$16 sps:$4 sm:$0xff]  }
  0xaa   :  { %2044 = vmatprep.subr.bf16.mxu1 %v2852_v24  ;;  %v263_v55 = vrot.slane %v3712_v53, %v3707_v52  ;;  %v267_v56 = vrot.slane %v3712_v53, %v3715_v54  ;;  %v2825_v24 = vld [vmem:[%s3995_s3 + $0x8c] ss:$16 sps:$4 sm:$0xff]  }
  0xab   :  { %2008 = vmatpush2.bf16.msra.mxu0 %v2784_v21 }
  0xac   :  { %2009 = vmatprep.subr.bf16.mxu0 %v2789_v22 }
  0xad   :  { %2045 = vmatpush2.bf16.msra.mxu1 %v2850_v23  ;;  %v2817_v23 = vld [vmem:[%s3995_s3 + $0xa8] ss:$16 sps:$4 sm:$0xff]  }
  0xae   :  { %2046 = vmatprep.subr.bf16.mxu1 %v2858_v28  ;;  %v2837_v28 = vld [vmem:[%s3995_s3 + $0x4c] ss:$16 sps:$4 sm:$0xff]  }
  0xaf   :  { %2010 = vmatpush2.bf16.msra.mxu0 %v2787_v25  ;;  %v2823_v25 = vld [vmem:[%s3995_s3 + $0x88] ss:$16 sps:$4 sm:$0xff]  }
  0xb0   :  { %2011 = vmatprep.subr.bf16.mxu0 %v2792_v26  ;;  %v2831_v26 = vld [vmem:[%s3995_s3 + $0x6c] ss:$16 sps:$4 sm:$0xff]  }
  0xb1   :  { %2047 = vmatpush2.bf16.msra.mxu1 %v2856_v27  ;;  %v2829_v27 = vld [vmem:[%s3995_s3 + $0x68] ss:$16 sps:$4 sm:$0xff]  }
  0xb2   :  { %2048 = vmatprep.subr.bf16.mxu1 %v2864_v32  ;;  %v2849_v32 = vld [vmem:[%s3995_s3 + $0xc] ss:$16 sps:$4 sm:$0xff]  }
  0xb3   :  { %2012 = vmatpush2.bf16.msra.mxu0 %v2790_v29  ;;  %v2835_v29 = vld [vmem:[%s3995_s3 + $0x48] ss:$16 sps:$4 sm:$0xff]  }
  0xb4   :  { %2013 = vmatprep.subr.bf16.mxu0 %v2795_v30  ;;  %v2843_v30 = vld [vmem:[%s3995_s3 + $0x2c] ss:$16 sps:$4 sm:$0xff]  }
  0xb5   :  { %2049 = vmatpush2.bf16.msra.mxu1 %v2862_v31  ;;  %v2841_v31 = vld [vmem:[%s3995_s3 + $0x28] ss:$16 sps:$4 sm:$0xff]  }
  0xb6   :  { %2050 = vmatprep.subr.bf16.mxu1 %v2870_v38  ;;  %v2861_v38 = vld [vmem:[%s3995_s3 + $0x1cc] ss:$16 sps:$4 sm:$0xff]  }
  0xb7   :  { %2014 = vmatpush2.bf16.msra.mxu0 %v2793_v33  ;;  %v2847_v33 = vld [vmem:[%s3995_s3 + $0x8] ss:$16 sps:$4 sm:$0xff]  }
  0xb8   :  { %2015 = vmatprep.subr.bf16.mxu0 %v2798_v34  ;;  %v2855_v34 = vld [vmem:[%s3995_s3 + $0x1ec] ss:$16 sps:$4 sm:$0xff]  }
  0xb9   :  { %2051 = vmatpush2.bf16.msra.mxu1 %v2868_v37  ;;  %v2853_v37 = vld [vmem:[%s3995_s3 + $0x1e8] ss:$16 sps:$4 sm:$0xff]  }
  0xba   :  { %2052 = vmatprep.subr.bf16.mxu1 %v2876_v42  ;;  %v2873_v42 = vld [vmem:[%s3995_s3 + $0x18c] ss:$16 sps:$4 sm:$0xff]  }
  0xbb   :  { %2016 = vmatpush2.bf16.msra.mxu0 %v2796_v39  ;;  %v2859_v39 = vld [vmem:[%s3995_s3 + $0x1c8] ss:$16 sps:$4 sm:$0xff]  }
  0xbc   :  { %2017 = vmatprep.subr.bf16.mxu0 %v2801_v40  ;;  %v2867_v40 = vld [vmem:[%s3995_s3 + $0x1ac] ss:$16 sps:$4 sm:$0xff]  }
  0xbd   :  { %2053 = vmatpush2.bf16.msra.mxu1 %v2874_v41  ;;  %v2865_v41 = vld [vmem:[%s3995_s3 + $0x1a8] ss:$16 sps:$4 sm:$0xff]  }
  0xbe   :  { %2054 = vmatprep.subr.bf16.mxu1 %v2882_v46  ;;  %v2885_v46 = vld [vmem:[%s3995_s3 + $0x14c] ss:$16 sps:$4 sm:$0xff]  }
  0xbf   :  { %2018 = vmatpush2.bf16.msra.mxu0 %v2799_v43  ;;  %v2871_v43 = vld [vmem:[%s3995_s3 + $0x188] ss:$16 sps:$4 sm:$0xff]  }
  0xc0   :  { %2069 = vmatprep.subr.bf16.mxu0 %v2807_v44  ;;  %v2879_v44 = vld [vmem:[%s3995_s3 + $0x16c] ss:$16 sps:$4 sm:$0xff]  }
  0xc1   :  { %2055 = vmatpush2.bf16.msra.mxu1 %v2880_v45  ;;  %v2877_v45 = vld [vmem:[%s3995_s3 + $0x168] ss:$16 sps:$4 sm:$0xff]  }
  0xc2   :  { %2056 = vmatprep.subr.bf16.mxu1 %v2888_v47  ;;  %v3815_v47 = vsub.s32 2, %v3704_v51 }
  0xc5   :  { %2057 = vmatpush2.bf16.msra.mxu1 %v2886_v35  ;;  %v2883_v35 = vld [vmem:[%s3995_s3 + $0x148] ss:$16 sps:$4 sm:$0xff]  }
  0xc6   :  { %2058 = vmatprep.subr.bf16.mxu1 %v2894_v36  ;;  %v3821_v36 = vsub.s32 3, %v3704_v51 }
  0xc9   :  { %2059 = vmatpush2.bf16.msra.mxu1 %v2892_v48  ;;  %v2891_v48 = vld [vmem:[%s3995_s3 + $0x12c] ss:$16 sps:$4 sm:$0xff]  }
  0xca   :  { %2110 = vmatprep.subr.bf16.mxu1 %v2900_v49  ;;  %v271_v49 = vrot.slane %v3712_v53, %v3815_v47 }
 0x102   :  { %v983_v57 = vpop.f32.mrf.mxu0 }
 0x103   :  { %v1024_v58 = vpop.f32.mrf.mxu1  ;;  %v984_v61 = vadd.f32 %v983_v57, %v263_v55  ;;  %v1148_v55 = vunpack.c.l.s4 %v2994_v50  ;;  %v275_v57 = vrot.slane %v3712_v53, %v3821_v36  ;;  %v2925_v50 = vld [vmem:[%s3995_s3 + $0x3c8] ss:$16 sps:$4 sm:$0xff]  }
 0x104   :  { %v985_v62 = vpop.f32.mrf.mxu0 }
 0x105   :  { %v1026_v63 = vpop.f32.mrf.mxu1  ;;  %v1025_v0 = vadd.f32 %v1024_v58, %v984_v61  ;;  %v986_v4 = vadd.f32 %v985_v62, %v267_v56  ;;  %v2889_v56 = vld [vmem:[%s3995_s3 + $0x128] ss:$16 sps:$4 sm:$0xff]   ;;  %v2897_v62 = vld [vmem:[%s3995_s3 + $0x10c] ss:$16 sps:$4 sm:$0xff]  }
 0x106   :  { %v987_v5 = vpop.f32.mrf.mxu0 }
 0x107   :  { %v1028_v6 = vpop.f32.mrf.mxu1  ;;  %v1117_v10 = vrot.slane %v1025_v0, 1  ;;  %v1129_v11 = vsub.f32 %v3264_v59, %v1025_v0  ;;  %v1027_v12 = vadd.f32 %v1026_v63, %v986_v4  ;;  %v3729_v20 = vpack.c.bf16 %v1025_v0, %v1025_v0  ;;  %v2813_v59 = vld [vmem:[%s3995_s3 + $0xcc] ss:$16 sps:$4 sm:$0xff]  }
 0x108   :  { %v988_v13 = vpop.f32.mrf.mxu0  ;;  %v1149_v0 = vunpack.c.0.s8 %v1148_v55  ;;  %v2930_v55 = vld [vmem:[%s3995_s3 + $0x3ac] ss:$16 sps:$4 sm:$0xff]  }
 0x109   :  { %v1029_v14 = vpop.f32.mrf.mxu1  ;;  %v3723_v15 = vsub.f32 %v3284_v7, %v1117_v10  ;;  %v1118_v16 = vrot.slane %v1027_v12, 1  ;;  %v1130_v17 = vsub.f32 %v3266_v60, %v1027_v12  ;;  %v1194_v18 = vpack.c.bf16 %v1027_v12, %v1027_v12  ;;  %v2811_v7 = vld [vmem:[%s3995_s3 + $0xc8] ss:$16 sps:$4 sm:$0xff]  }
 0x10b   :  { %v3735_v21 = vsub.f32 %v3271_v1, %v1118_v16  ;;  %v3737_v22 = vcombine.low %v1129_v11, %v1130_v17  ;;  %2019 = vmatprep.mubr.bf16.mxu0 %v1194_v18  ;;  %v2819_v1 = vld [vmem:[%s3995_s3 + $0xac] ss:$16 sps:$4 sm:$0xff]   ;;  %v2895_v11 = vld [vmem:[%s3995_s3 + $0x108] ss:$16 sps:$4 sm:$0xff]   ;;  %v3840_v16 = vsub.s32 %v1149_v0, %v3704_v51 }
 0x10c   :  { %2020 = vmatmul.mubr.bf16.vlgmr.msra.gmra.mxu0 %v3729_v20  ;;  %v2937_v0 = vld [vmem:[%s3995_s3 + $0x348] ss:$16 sps:$4 sm:$0xff]  }
 0x10d   :  { %v1162_v60 = vcombine.low %v3723_v15, %v3735_v21  ;;  %2070 = vmatpush1.bf16.msra.mxu0 %v2805_v19  ;;  %2101 = vmatprep.mubr.bf16.mxu0 %v1194_v18  ;;  %v2907_v15 = vld [vmem:[%s3995_s3 + $0x288] ss:$16 sps:$4 sm:$0xff]  }
 0x10e   :  { %2071 = vmatprep.subr.bf16.mxu0 %v2813_v59 }
 0x111   :  { %2072 = vmatpush1.bf16.msra.mxu0 %v2811_v7 }
 0x112   :  { %2073 = vmatprep.subr.bf16.mxu0 %v2819_v1 }
 0x115   :  { %2074 = vmatpush1.bf16.msra.mxu0 %v2817_v23  ;;  %v2898_v23 = vld [vmem:[%s3995_s3 + $0x2e8] ss:$16 sps:$4 sm:$0xff]  }
 0x116   :  { %2075 = vmatprep.subr.bf16.mxu0 %v2825_v24 }
 0x119   :  { %2076 = vmatpush1.bf16.msra.mxu0 %v2823_v25  ;;  %v2903_v25 = vld [vmem:[%s3995_s3 + $0x2cc] ss:$16 sps:$4 sm:$0xff]  }
 0x11a   :  { %2077 = vmatprep.subr.bf16.mxu0 %v2831_v26 }
 0x11d   :  { %2078 = vmatpush1.bf16.msra.mxu0 %v2829_v27 }
 0x11e   :  { %2079 = vmatprep.subr.bf16.mxu0 %v2837_v28 }
 0x121   :  { %2080 = vmatpush1.bf16.msra.mxu0 %v2835_v29 }
 0x122   :  { %2081 = vmatprep.subr.bf16.mxu0 %v2843_v30 }
 0x125   :  { %2082 = vmatpush1.bf16.msra.mxu0 %v2841_v31  ;;  %v2904_v31 = vld [vmem:[%s3995_s3 + $0x2a8] ss:$16 sps:$4 sm:$0xff]  }
 0x126   :  { %2083 = vmatprep.subr.bf16.mxu0 %v2849_v32 }
 0x129   :  { %2084 = vmatpush1.bf16.msra.mxu0 %v2847_v33  ;;  %v2909_v33 = vld [vmem:[%s3995_s3 + $0x28c] ss:$16 sps:$4 sm:$0xff]  }
 0x12a   :  { %2085 = vmatprep.subr.bf16.mxu0 %v2855_v34 }
 0x12d   :  { %2086 = vmatpush2.bf16.msra.mxu0 %v2853_v37 }
 0x12e   :  { %2087 = vmatprep.subr.bf16.mxu0 %v2861_v38 }
 0x131   :  { %2088 = vmatpush2.bf16.msra.mxu0 %v2859_v39 }
 0x132   :  { %2089 = vmatprep.subr.bf16.mxu0 %v2867_v40  ;;  %v2910_v40 = vld [vmem:[%s3995_s3 + $0x268] ss:$16 sps:$4 sm:$0xff]  }
 0x135   :  { %2090 = vmatpush2.bf16.msra.mxu0 %v2865_v41  ;;  %v2915_v41 = vld [vmem:[%s3995_s3 + $0x24c] ss:$16 sps:$4 sm:$0xff]  }
 0x136   :  { %2091 = vmatprep.subr.bf16.mxu0 %v2873_v42  ;;  %v2913_v42 = vld [vmem:[%s3995_s3 + $0x248] ss:$16 sps:$4 sm:$0xff]  }
 0x139   :  { %2092 = vmatpush2.bf16.msra.mxu0 %v2871_v43  ;;  %v2918_v43 = vld [vmem:[%s3995_s3 + $0x22c] ss:$16 sps:$4 sm:$0xff]  }
 0x13a   :  { %2093 = vmatprep.subr.bf16.mxu0 %v2879_v44  ;;  %v2916_v44 = vld [vmem:[%s3995_s3 + $0x228] ss:$16 sps:$4 sm:$0xff]  }
 0x13d   :  { %2094 = vmatpush2.bf16.msra.mxu0 %v2877_v45  ;;  %v2921_v45 = vld [vmem:[%s3995_s3 + $0x20c] ss:$16 sps:$4 sm:$0xff]  }
 0x13e   :  { %2095 = vmatprep.subr.bf16.mxu0 %v2885_v46  ;;  %v2919_v46 = vld [vmem:[%s3995_s3 + $0x208] ss:$16 sps:$4 sm:$0xff]  }
 0x141   :  { %2096 = vmatpush2.bf16.msra.mxu0 %v2883_v35  ;;  %v2924_v35 = vld [vmem:[%s3995_s3 + $0x3ec] ss:$16 sps:$4 sm:$0xff]  }
 0x142   :  { %v1065_v58 = vpop.f32.mrf.mxu0  ;;  %2097 = vmatprep.subr.bf16.mxu0 %v2891_v48  ;;  %v2922_v48 = vld [vmem:[%s3995_s3 + $0x3e8] ss:$16 sps:$4 sm:$0xff]  }
 0x143   :  { %v1106_v61 = vpop.f32.mrf.mxu1  ;;  %v1066_v63 = vadd.f32 %v1065_v58, %v271_v49  ;;  %v2927_v49 = vld [vmem:[%s3995_s3 + $0x3cc] ss:$16 sps:$4 sm:$0xff]   ;;  %v2931_v58 = vld [vmem:[%s3995_s3 + $0x388] ss:$16 sps:$4 sm:$0xff]  }
 0x144   :  { %v1067_v4 = vpop.f32.mrf.mxu0 }
 0x145   :  { %v1108_v5 = vpop.f32.mrf.mxu1  ;;  %v1107_v6 = vadd.f32 %v1106_v61, %v1066_v63  ;;  %v1068_v10 = vadd.f32 %v1067_v4, %v275_v57  ;;  %2098 = vmatpush2.bf16.msra.mxu0 %v2889_v56  ;;  %v2928_v56 = vld [vmem:[%s3995_s3 + $0x3a8] ss:$16 sps:$4 sm:$0xff]   ;;  %v2933_v57 = vld [vmem:[%s3995_s3 + $0x38c] ss:$16 sps:$4 sm:$0xff]  }
 0x146   :  { %v1069_v12 = vpop.f32.mrf.mxu0  ;;  %2099 = vmatprep.subr.bf16.mxu0 %v2897_v62  ;;  %v2936_v61 = vld [vmem:[%s3995_s3 + $0x36c] ss:$16 sps:$4 sm:$0xff]   ;;  %v2934_v62 = vld [vmem:[%s3995_s3 + $0x368] ss:$16 sps:$4 sm:$0xff]  }
 0x147   :  { %v1110_v53 = vpop.f32.mrf.mxu1  ;;  %v1119_v13 = vrot.slane %v1107_v6, 1  ;;  %v1109_v14 = vadd.f32 %v1108_v5, %v1068_v10  ;;  %v1131_v19 = vsub.f32 %v3286_v8, %v1107_v6  ;;  %v3847_v24 = vpack.c.bf16 %v1107_v6, %v1107_v6  ;;  %v2939_v63 = vld [vmem:[%s3995_s3 + $0x34c] ss:$16 sps:$4 sm:$0xff]   ;;  %v2940_v5 = vld [vmem:[%s3995_s3 + $0x328] ss:$16 sps:$4 sm:$0xff]  }
 0x148   :  { %v1070_v17 = vpop.f32.mrf.mxu0  ;;  %v2942_v4 = vld [vmem:[%s3995_s3 + $0x32c] ss:$16 sps:$4 sm:$0xff]   ;;  %v2943_v10 = vld [vmem:[%s3995_s3 + $0x308] ss:$16 sps:$4 sm:$0xff]  }
 0x149   :  { %v1111_v18 = vpop.f32.mrf.mxu1  ;;  %v1120_v59 = vrot.slane %v1109_v14, 1  ;;  %v1132_v7 = vsub.f32 %v3273_v2, %v1109_v14  ;;  %2100 = vmatpush2.bf16.msra.mxu0 %v2895_v11  ;;  %v1196_v1 = vpack.c.bf16 %v1109_v14, %v1109_v14  ;;  %v1135_v26 = vsub.f32 %v3288_v9, %v1119_v13  ;;  %v2901_v9 = vld [vmem:[%s3995_s3 + $0x2c8] ss:$16 sps:$4 sm:$0xff]   ;;  %v2945_v6 = vld [vmem:[%s3995_s3 + $0x30c] ss:$16 sps:$4 sm:$0xff]  }
 0x14a   :  { %v1153_v2 = vrot.slane %v3737_v22, %v3840_v16  ;;  %v1325_v14 = vld [vmem:[%s3996_s4] sm:$0xf] }
 0x14b   :  { %v1136_v27 = vsub.f32 %v3275_v3, %v1120_v59  ;;  %v1146_v8 = vcombine.low %v1131_v19, %v1132_v7  ;;  %2060 = vmatprep.mubr.bf16.mxu1 %v1196_v1  ;;  %v2906_v3 = vld [vmem:[%s3995_s3 + $0x2ac] ss:$16 sps:$4 sm:$0xff]   ;;  %v1330_v17 = vrot.slane %v1325_v14, %v3707_v52  ;;  %v1334_v18 = vrot.slane %v1325_v14, %v3715_v54 }
 0x14c   :  { %2102 = vmatmul.mubr.bf16.vlgmr.msra.gmra.mxu0 %v3729_v20  ;;  %2061 = vmatmul.mubr.bf16.vlgmr.msra.gmra.mxu1 %v3847_v24  ;;  %v1170_v20 = vrot.slane %v1162_v60, %v3840_v16  ;;  %v2912_v60 = vld [vmem:[%s3995_s3 + $0x26c] ss:$16 sps:$4 sm:$0xff]  }
 0x14d   :  { %v1160_v28 = vrot.slane %v1146_v8, %v3840_v16  ;;  %v1163_v29 = vcombine.low %v1135_v26, %v1136_v27  ;;  %2111 = vmatpush1.bf16.msra.mxu1 %v2898_v23  ;;  %2142 = vmatprep.mubr.bf16.mxu1 %v1196_v1 }
 0x14e   :  { %2112 = vmatprep.subr.bf16.mxu1 %v2903_v25 }
 0x14f   :  { %v1161_v22 = vcombine.low %v1153_v2, %v1160_v28  ;;  %v1177_v30 = vrot.slane %v1163_v29, %v3840_v16 }
 0x151   :  { %2113 = vmatpush1.bf16.msra.mxu1 %v2901_v9  ;;  %v1178_v32 = vcombine.low %v1170_v20, %v1177_v30  ;;  %v2179_v9 = vld [vmem:[%s4000_s8] sm:$0xf] }
 0x152   :  { %2114 = vmatprep.subr.bf16.mxu1 %v2906_v3  ;;  %v2184_v3 = vrot.slane %v2179_v9, %v3707_v52  ;;  %v2188_v20 = vrot.slane %v2179_v9, %v3715_v54  ;;  %v2196_v30 = vrot.slane %v2179_v9, %v3821_v36 }
 0x153   :  { %v1183_v34 = vrot.slane %v1178_v32, 7  ;;  %v1342_v32 = vrot.slane %v1325_v14, %v3821_v36 }
 0x154   :  { %v2197_v52 = vcombine.low %v2184_v3, %v2188_v20 }
 0x155   :  { %2115 = vmatpush1.bf16.msra.mxu1 %v2904_v31  ;;  %v1184_v21 = vsel %vm296_vm1, %v1183_v34, %v1161_v22  ;;  %v2192_v22 = vrot.slane %v2179_v9, %v3815_v47  ;;  %v1338_v31 = vrot.slane %v1325_v14, %v3815_v47  ;;  %v2154_v47 = vld [vmem:[%s3999_s7] sm:$0xff] }
 0x156   :  { %2116 = vmatprep.subr.bf16.mxu1 %v2909_v33  ;;  %v1186_v37 = vsel %vm1185_vm2, %v1183_v34, %v1184_v21 }
 0x157   :  { %v1188_v38 = vsel %vm1187_vm3, %v1183_v34, %v1186_v37  ;;  %v2198_v21 = vcombine.low %v2192_v22, %v2196_v30 }
 0x158   :  { %v1190_v39 = vsel %vm1189_vm4, %v1183_v34, %v1188_v38  ;;  %v2151_v34 = vld [vmem:[%s3997_s5] sm:$0xff]  ;;  %s2995_s5 = smov [#allocation5]  }
 0x159   :  { %2117 = vmatpush1.bf16.msra.mxu1 %v2907_v15  ;;  %1192 = vst [vmem:[#allocation5] sm:$0xff] %v1190_v39  ;;  %v2152_v15 = vld [vmem:[%s3998_s6] sm:$0xff]  ;;  %s2285_s6 = sshll.u32 %s2995_s5, 4  ;;  %s2286_s6 = int_to_ptr.vmem [resolvable:$true] %s2285_s6 }
 0x15a   :  { %2118 = vmatprep.subr.bf16.mxu1 %v2912_v60  ;;  %s2950_s7 = scalar_lea.vmem %s2286_s6, 128  ;;  %p2955_p1 = scmp.lt.s32.totalorder %s2286_s6, %s2286_s6 }
 0x15b   :  { %p2951_p0 = scmp.ne.s32.totalorder %s2286_s6, %s2950_s7  ;;  %p2956_p2 = scmp.lt.s32.totalorder %s2950_s7, %s2950_s7 }
 0x15d   :  { %2119 = vmatpush1.bf16.msra.mxu1 %v2910_v40  ;;  %v2153_v40 = vadd.f32 %v2152_v15, %v2151_v34  ;;  %p2957_p3 = por %p2956_p2, %p2955_p1 }
 0x15e   :  { %2120 = vmatprep.subr.bf16.mxu1 %v2915_v41 }
 0x15f   :  { %p2958_p4 = pnand %p2957_p3, %p2951_p0 }
 0x161   :  { %2121 = vmatpush1.bf16.msra.mxu1 %v2913_v42  ;;  %v2205_v42 = vrot.slane %v2197_v52, %v3840_v16 }
 0x162   :  { %2122 = vmatprep.subr.bf16.mxu1 %v2918_v43  ;;  %v2212_v43 = vrot.slane %v2198_v21, %v3840_v16 }
 0x165   :  { %2123 = vmatpush1.bf16.msra.mxu1 %v2916_v44 }
 0x166   :  { %2124 = vmatprep.subr.bf16.mxu1 %v2921_v45 }
 0x169   :  { %2125 = vmatpush1.bf16.msra.mxu1 %v2919_v46  ;;  %v2155_v46 = vadd.f32 %v2154_v47, %v2153_v40 }
 0x16a   :  { %2126 = vmatprep.subr.bf16.mxu1 %v2924_v35 }
 0x16d   :  { %2127 = vmatpush2.bf16.msra.mxu1 %v2922_v48 }
 0x16e   :  { %2128 = vmatprep.subr.bf16.mxu1 %v2927_v49  ;;  %v2213_v49 = vcombine.low %v2205_v42, %v2212_v43 }
 0x171   :  { %2129 = vmatpush2.bf16.msra.mxu1 %v2925_v50 }
 0x172   :  { %2130 = vmatprep.subr.bf16.mxu1 %v2930_v55 }
 0x175   :  { %2131 = vmatpush2.bf16.msra.mxu1 %v2928_v56 }
 0x176   :  { %2132 = vmatprep.subr.bf16.mxu1 %v2933_v57 }
 0x179   :  { %2133 = vmatpush2.bf16.msra.mxu1 %v2931_v58 }
 0x17a   :  { %2134 = vmatprep.subr.bf16.mxu1 %v2936_v61 }
 0x17d   :  { %2135 = vmatpush2.bf16.msra.mxu1 %v2934_v62 }
 0x17e   :  { %2136 = vmatprep.subr.bf16.mxu1 %v2939_v63 }
 0x181   :  { %2137 = vmatpush2.bf16.msra.mxu1 %v2937_v0 }
 0x182   :  { %2138 = vmatprep.subr.bf16.mxu1 %v2942_v4 }
 0x185   :  { %2139 = vmatpush2.bf16.msra.mxu1 %v2940_v5 }
 0x186   :  { %2140 = vmatprep.subr.bf16.mxu1 %v2945_v6 }
 0x189   :  { %2141 = vmatpush2.bf16.msra.mxu1 %v2943_v10 }
 0x18c   :  { %2143 = vmatmul.mubr.bf16.vlgmr.msra.gmra.mxu1 %v3847_v24 }
 0x1cc   :  { %v2021_v11 = vpop.f32.mrf.mxu0 }
 0x1cd   :  { %v2022_v19 = vadd.f32 %v2021_v11, %v1330_v17 }
 0x1ce   :  { %v2023_v12 = vpop.f32.mrf.mxu0 }
 0x1cf   :  { %v2024_v1 = vadd.f32 %v2023_v12, %v1334_v18 }
 0x1d0   :  { %v2025_v53 = vpop.f32.mrf.mxu0 }
 0x1d2   :  { %v2026_v13 = vpop.f32.mrf.mxu0 }
 0x20c   :  { %v2103_v59 = vpop.f32.mrf.mxu0  ;;  %v2062_v7 = vpop.f32.mrf.mxu1 }
 0x20d   :  { %v2063_v23 = vadd.f32 %v2062_v7, %v2022_v19  ;;  %v2104_v54 = vadd.f32 %v2103_v59, %v1338_v31 }
 0x20e   :  { %v2105_v25 = vpop.f32.mrf.mxu0  ;;  %v2064_v26 = vpop.f32.mrf.mxu1 }
 0x20f   :  { %v2065_v24 = vadd.f32 %v2064_v26, %v2024_v1  ;;  %v2106_v60 = vadd.f32 %v2105_v25, %v1342_v32 }
 0x210   :  { %v2107_v27 = vpop.f32.mrf.mxu0  ;;  %v2066_v8 = vpop.f32.mrf.mxu1 }
 0x211   :  { %v2160_v2 = vcombine.low %v2063_v23, %v2065_v24 }
 0x212   :  { %v2108_v28 = vpop.f32.mrf.mxu0  ;;  %v2067_v29 = vpop.f32.mrf.mxu1 }
 0x213   :  { %v2168_v45 = vrot.slane %v2160_v2, %v3840_v16 }
 0x24c   :  { %v2144_v33 = vpop.f32.mrf.mxu1 }
 0x24d   :  { %v2145_v38 = vadd.f32 %v2144_v33, %v2104_v54 }
 0x24e   :  { %v2146_v37 = vpop.f32.mrf.mxu1 }
 0x24f   :  { %v2147_v39 = vadd.f32 %v2146_v37, %v2106_v60 }
 0x250   :  { %v2148_v36 = vpop.f32.mrf.mxu1 }
 0x251   :  { %v2161_v41 = vcombine.low %v2145_v38, %v2147_v39 }
 0x252   :  { %v2149_v44 = vpop.f32.mrf.mxu1 }
 0x253   :  { %v2175_v35 = vrot.slane %v2161_v41, %v3840_v16 }
 0x255   :  { %v2176_v48 = vcombine.low %v2168_v45, %v2175_v35 }
 0x257   :  { %v2178_v50 = vadd.f32 %v2176_v48, %v2155_v46 }
 0x259   :  { %v2215_v55 = vmul.f32 %v2213_v49, %v2178_v50 }
 0x25b   :  { %v2217_v56 = vcombine.high %v2215_v55, %v2215_v55  ;;  %v2224_v57 = vrot.slane %v2215_v55, %v3840_v16 }
 0x25d   :  { %v2231_v58 = vrot.slane %v2217_v56, %v3840_v16  ;;  %v2232_v61 = vcombine.high %v2224_v57, %v2224_v57  ;;  %v2239_v63 = vsel %vm2238_vm5, %v2224_v57, 0.0 }
 0x25f   :  { %v2233_v62 = vcombine.high %v2231_v58, %v2231_v58  ;;  %v2240_v0 = vsel %vm2238_vm5, %v2232_v61, 0.0  ;;  %v2242_v5 = vsel %vm2238_vm5, %v2231_v58, 0.0 }
 0x260   :  { %v2241_v4 = vadd.f32 %v2240_v0, %v2239_v63 }
 0x261   :  { %v2244_v10 = vsel %vm2238_vm5, %v2233_v62, 0.0 }
 0x262   :  { %v2243_v6 = vadd.f32 %v2242_v5, %v2241_v4 }
 0x264   :  { %v2245_v11 = vadd.f32 %v2244_v10, %v2243_v6 }
 0x266   :  { %2246 = vadd.xlane.f32.xlu0 %v2245_v11 }
 0x267   :  { %2961 = shalt.err (!%p2958_p4)
}
 0x268   :  { %2288 = dma.vmem_to_hbm [thread:$0]  %s2286_s6, 128, %s4003_s11, [#allocation6]   ;;  %v2249_v16 = vstv %s4001_s9  ;;  %v2996_v18 = vmov 269488144  }
 0x269   :  { %v2259_v19 = vunpack.c.l.s4 %v2996_v18  ;;  %s2997_s15 = smov [#allocation3]  }
 0x26a   :  { %s2275_s11 = sshll.u32 %s2997_s15, 4  ;;  %s2276_s11 = int_to_ptr.vmem [resolvable:$true] %s2275_s11 }
 0x26b   :  { %v2260_v59 = vunpack.c.0.s8 %v2259_v19  ;;  %s2970_s9 = scalar_lea.vmem %s2276_s11, 128  ;;  %p2975_p6 = scmp.lt.s32.totalorder %s2276_s11, %s2276_s11 }
 0x26c   :  { %p2971_p5 = scmp.ne.s32.totalorder %s2276_s11, %s2970_s9  ;;  %p2976_p7 = scmp.lt.s32.totalorder %s2970_s9, %s2970_s9 }
 0x26d   :  { %v2263_v7 = vsub.s32 %v2260_v59, %v3704_v51 }
 0x26e   :  { %p2977_p8 = por %p2976_p7, %p2975_p6 }
 0x270   :  { %p2978_p9 = pnand %p2977_p8, %p2971_p5 }
 0x2ef   :  { %v2247_v12 = vpop.xlane.xlu0 %2246 }
 0x2f0   :  { %v2250_v53 = vadd.f32 %v2249_v16, %v2247_v12 }
 0x2f2   :  { %v2553_v13 = vmul.f32 -1.442695, %v2250_v53 }
 0x2f4   :  { %2946 = vpow2.f32 %v2553_v13 }
 0x301   :  { %v2947_v14 = vpop.eup %2946 }
 0x302   :  { %v2254_v17 = vadd.f32 1.0, %v2947_v14 }
 0x304   :  { %2948 = vrcp.f32 %v2254_v17 }
 0x311   :  { %v2949_v1 = vpop.eup %2948 }
 0x312   :  { %v2264_v23 = vrot.slane %v2949_v1, %v2263_v7 }
 0x314   :  { %v2266_v25 = vmul.f32 %v2264_v23, %v2178_v50 }
 0x316   :  { %v2267_v26 = vmax.f32 %v2266_v25, 0.0 }
 0x318   :  { %2268 = vst [vmem:[#allocation3] sm:$0xff] %v2267_v26 }
 0x319   :  { %2981 = shalt.err (!%p2978_p9)
}
 0x31a   :  { %2278 = dma.vmem_to_hbm [thread:$0]  %s2276_s11, 128, %s4002_s10, [#allocation4]  }
 0x31b   :  { %2990 = dma.done.wait [#allocation4], 128  }
 0x31c   :  { %2991 = vsyncadd [#allocation4], 4294967168 }
 0x31d   :  { %2992 = dma.done.wait [#allocation6], 128  }
 0x31e   :  { %2993 = vsyncadd [#allocation6], 4294967168 }
 0x31f   :  { %2295 = vsyncpa [#allocation4], 1 }
 0x320   :  { %2296 = vsyncpa [#allocation6], 1 }

</bundles_post_ra>
